<compile_context>
chip_gen: v5e
topology: v5e:2x2
jax: 0.10.0
libtpu: 0.0.40
codegen_flags: <defaults>
</compile_context>

<pallas_src>
import jax
import jax.numpy as jnp
from jax.experimental import pallas as pl
from jax.experimental.pallas import tpu as pltpu

# ---- problem sizes (small, consistent with the module defaults) -------------
BATCH = 2
N_POINTS = 128          # points per cloud
C_IN = 6                # normal_channel=True -> xyz + normals
C_PAD = 8               # padded contraction dim for the first layer
H1, H2 = 128, 128       # stand-in backbone hidden widths (lane-dense)
BACKBONE_OUT = 256      # backbone_outdims
MLP_HIDDEN = BACKBONE_OUT * 4
N_OUT = 10              # n_out_dims
N_OUT_PAD = 128         # lane-dense padded output width
B_PAD = 8               # padded head rows (full sublane tile)
CHUNK = 32              # backbone row-chunk size
CHUNKS_PER_CLOUD = N_POINTS // CHUNK


# =============================================================================
# Single fused kernel: backbone encoder + mlp + fc, one gridless program.
# Backbone weights + bias pack arrive via the normal VMEM prologue (small);
# head weights are manually DMA'd so the backbone compute hides under them.
# =============================================================================
def fused_kernel(x_ref, bw1_ref, bw2_ref, bw3_ref, bias_ref,
                 hw1_hbm, hw2_hbm, hw3_hbm,
                 o_ref,
                 hw1_vmem, hw2_vmem, hw3_vmem, feat_vmem, dma_sem):
    f32 = jnp.float32
    bf16 = jnp.bfloat16

    # ---- kick off head-weight DMAs; they overlap the backbone compute ------
    cp1 = pltpu.make_async_copy(hw1_hbm, hw1_vmem, dma_sem.at[0])
    cp2 = pltpu.make_async_copy(hw2_hbm, hw2_vmem, dma_sem.at[1])
    cp3 = pltpu.make_async_copy(hw3_hbm, hw3_vmem, dma_sem.at[2])
    cp1.start()
    cp2.start()
    cp3.start()

    # ---- unpack the lane-aligned bias pack (all offsets multiples of 128) --
    off = 0
    bb1 = bias_ref[:, off:off + H1];             off += H1
    bb2 = bias_ref[:, off:off + H2];             off += H2
    bb3 = bias_ref[:, off:off + BACKBONE_OUT];   off += BACKBONE_OUT
    hb1 = bias_ref[:, off:off + MLP_HIDDEN];     off += MLP_HIDDEN
    hb2 = bias_ref[:, off:off + BACKBONE_OUT];   off += BACKBONE_OUT
    hb3 = bias_ref[:, off:off + N_OUT_PAD]

    bw1 = bw1_ref[...]
    bw2 = bw2_ref[...]
    bw3 = bw3_ref[...]

    # ---- backbone: shared per-point MLP, chunked, running-max global pool --
    feat_vmem[...] = jnp.zeros_like(feat_vmem)        # padded rows >= BATCH stay 0
    for b in range(BATCH):                            # static unroll (2)
        acc = jnp.zeros((CHUNK, BACKBONE_OUT), f32)
        for c in range(CHUNKS_PER_CLOUD):             # static unroll (4)
            row0 = b * N_POINTS + c * CHUNK
            xb = x_ref[pl.ds(row0, CHUNK), :]         # (32, 8) f32
            h = jnp.dot(xb.astype(bf16), bw1,
                        preferred_element_type=f32) + bb1
            h = jnp.maximum(h, 0.0)                   # (32, 128)
            h = jnp.dot(h.astype(bf16), bw2,
                        preferred_element_type=f32) + bb2
            h = jnp.maximum(h, 0.0)                   # (32, 128)
            h = jnp.dot(h.astype(bf16), bw3,
                        preferred_element_type=f32) + bb3
            h = jnp.maximum(h, 0.0)                   # (32, 256)
            acc = jnp.maximum(acc, h)                 # VPU running max
        # final small 32-sublane reduce -> this cloud's global feature
        feat_vmem[pl.ds(b, 1), :] = jnp.max(acc, axis=0, keepdims=True)

    feat = feat_vmem[...]                             # (8, 256), rows 2..7 zero

    # ---- head: Linear(256,1024) -> ReLU -> Linear(1024,256); fc Linear -----
    cp1.wait()
    g = jnp.dot(feat.astype(bf16), hw1_vmem[...],
                preferred_element_type=f32) + hb1
    g = jnp.maximum(g, 0.0)                           # (8, 1024)
    cp2.wait()
    g = jnp.dot(g.astype(bf16), hw2_vmem[...],
                preferred_element_type=f32) + hb2     # (8, 256)
    cp3.wait()
    # lane-dense padded output: (8, 128); real logits are rows :B, lanes :10
    o_ref[...] = jnp.dot(g.astype(bf16), hw3_vmem[...],
                         preferred_element_type=f32) + hb3


# =============================================================================
# Wrapper
# =============================================================================
def pointnet2_regression_forward(xyz, params):
    """xyz: (B, N, C_IN) float32 point cloud (same data the PyTorch forward gets)."""
    B, N, C = xyz.shape
    bb = params["backbone"]
    hd = params["head"]

    # flatten to (B*N, C) and zero-pad the channel dim 6 -> 8
    x_flat = xyz.reshape(B * N, C)
    x_pad = jnp.pad(x_flat, ((0, 0), (0, C_PAD - C)))

    vmem = pltpu.MemorySpace.VMEM
    out_pad = pl.pallas_call(
        fused_kernel,
        out_shape=jax.ShapeDtypeStruct((B_PAD, N_OUT_PAD), jnp.float32),
        in_specs=(
            [pl.BlockSpec(memory_space=vmem)] * 5        # x, bw1..3, bias pack
            + [pl.BlockSpec(memory_space=pl.ANY)] * 3    # head weights stay in HBM
        ),
        out_specs=pl.BlockSpec(memory_space=vmem),
        scratch_shapes=[
            pltpu.VMEM((BACKBONE_OUT, MLP_HIDDEN), jnp.bfloat16),   # hw1 landing buf
            pltpu.VMEM((MLP_HIDDEN, BACKBONE_OUT), jnp.bfloat16),   # hw2 landing buf
            pltpu.VMEM((BACKBONE_OUT, N_OUT_PAD), jnp.bfloat16),    # hw3 landing buf
            pltpu.VMEM((B_PAD, BACKBONE_OUT), jnp.float32),         # padded feat
            pltpu.SemaphoreType.DMA((3,)),
        ],
    )(x_pad,
      bb["w1"], bb["w2"], bb["w3"], params["bias_pack"],
      hd["w1"], hd["w2"], hd["w3"])

    return out_pad[:B, :N_OUT]


# =============================================================================
# Deterministic parameter initialization (PyTorch Linear weights are (out, in);
# stored here already transposed to (in, out) for row-major matmul).
# Weights are bf16 (HBM-bandwidth win); all biases stay f32, packed into one
# lane-aligned (1, 1920) array.
# =============================================================================
def _linear(key, fan_in, fan_out):
    kw, kb = jax.random.split(key)
    bound = 1.0 / jnp.sqrt(jnp.float32(fan_in))
    w = jax.random.uniform(kw, (fan_in, fan_out), jnp.float32, -bound, bound)
    b = jax.random.uniform(kb, (1, fan_out), jnp.float32, -bound, bound)
    return w, b


def init_params(key):
    ks = jax.random.split(key, 6)
    bw1, bb1 = _linear(ks[0], C_IN, H1)
    bw2, bb2 = _linear(ks[1], H1, H2)
    bw3, bb3 = _linear(ks[2], H2, BACKBONE_OUT)
    hw1, hb1 = _linear(ks[3], BACKBONE_OUT, MLP_HIDDEN)   # mlp[0]
    hw2, hb2 = _linear(ks[4], MLP_HIDDEN, BACKBONE_OUT)   # mlp[2]
    hw3, hb3 = _linear(ks[5], BACKBONE_OUT, N_OUT)        # fc[0]

    # pad the first-layer contraction 6 -> 8 (zero rows) and the final output
    # 10 -> 128 (zero columns) so all kernel-side tiles are layout-clean.
    bw1 = jnp.pad(bw1, ((0, C_PAD - C_IN), (0, 0)))
    hw3 = jnp.pad(hw3, ((0, 0), (0, N_OUT_PAD - N_OUT)))
    hb3 = jnp.pad(hb3, ((0, 0), (0, N_OUT_PAD - N_OUT)))

    # one lane-aligned bias pack: widths 128,128,256,1024,256,128 (all %128==0)
    bias_pack = jnp.concatenate([bb1, bb2, bb3, hb1, hb2, hb3], axis=1)

    bf16 = jnp.bfloat16
    return {
        "backbone": {"w1": bw1.astype(bf16),
                     "w2": bw2.astype(bf16),
                     "w3": bw3.astype(bf16)},
        "head": {"w1": hw1.astype(bf16),
                 "w2": hw2.astype(bf16),
                 "w3": hw3.astype(bf16)},
        "bias_pack": bias_pack,
    }


if __name__ == "__main__":
    key = jax.random.PRNGKey(0)
    k_in, k_param = jax.random.split(key)
    xyz = jax.random.normal(k_in, (BATCH, N_POINTS, C_IN), dtype=jnp.float32)
    params = init_params(k_param)

    outs = jax.jit(pointnet2_regression_forward)(xyz, params)
    outs = jax.block_until_ready(outs)

    assert outs.shape == (BATCH, N_OUT), outs.shape
    assert outs.dtype == jnp.float32
    assert bool(jnp.all(jnp.isfinite(outs)))
    print("KERNEL_OK")
</pallas_src>

<mosaic_0001>
module attributes {stable_mosaic.version = 11 : i64} {
  func.func @fused_kernel(%arg0: memref<256x8xf32, #tpu.memory_space<vmem>>, %arg1: memref<8x128xbf16, #tpu.memory_space<vmem>>, %arg2: memref<128x128xbf16, #tpu.memory_space<vmem>>, %arg3: memref<128x256xbf16, #tpu.memory_space<vmem>>, %arg4: memref<1x1920xf32, #tpu.memory_space<vmem>>, %arg5: memref<256x1024xbf16, #tpu.memory_space<any>>, %arg6: memref<1024x256xbf16, #tpu.memory_space<any>>, %arg7: memref<256x128xbf16, #tpu.memory_space<any>>, %arg8: memref<8x128xf32, #tpu.memory_space<vmem>>, %arg9: memref<256x1024xbf16, #tpu.memory_space<vmem>>, %arg10: memref<1024x256xbf16, #tpu.memory_space<vmem>>, %arg11: memref<256x128xbf16, #tpu.memory_space<vmem>>, %arg12: memref<8x256xf32, #tpu.memory_space<vmem>>, %arg13: memref<3x!tpu.dma_semaphore, #tpu.memory_space<semaphore_mem>>) attributes {dimension_semantics = [], scalar_prefetch = 0 : i64, scratch_operands = 5 : i64, tpu.core_type = #tpu.core_type<tc>} {
    %c0_i32 = arith.constant 0 : i32
    %0 = tpu.memref_slice %arg13[%c0_i32] : memref<3x!tpu.dma_semaphore, #tpu.memory_space<semaphore_mem>> -> memref<1x!tpu.dma_semaphore, #tpu.memory_space<semaphore_mem>>
    %1 = tpu.memref_squeeze %0 : memref<1x!tpu.dma_semaphore, #tpu.memory_space<semaphore_mem>> -> memref<!tpu.dma_semaphore, #tpu.memory_space<semaphore_mem>>
    tpu.enqueue_dma source(%arg5 : memref<256x1024xbf16, #tpu.memory_space<any>>) target(%arg9 : memref<256x1024xbf16, #tpu.memory_space<vmem>>) target_semaphore(%1 : memref<!tpu.dma_semaphore, #tpu.memory_space<semaphore_mem>>)
    %c1_i32 = arith.constant 1 : i32
    %2 = tpu.memref_slice %arg13[%c1_i32] : memref<3x!tpu.dma_semaphore, #tpu.memory_space<semaphore_mem>> -> memref<1x!tpu.dma_semaphore, #tpu.memory_space<semaphore_mem>>
    %3 = tpu.memref_squeeze %2 : memref<1x!tpu.dma_semaphore, #tpu.memory_space<semaphore_mem>> -> memref<!tpu.dma_semaphore, #tpu.memory_space<semaphore_mem>>
    tpu.enqueue_dma source(%arg6 : memref<1024x256xbf16, #tpu.memory_space<any>>) target(%arg10 : memref<1024x256xbf16, #tpu.memory_space<vmem>>) target_semaphore(%3 : memref<!tpu.dma_semaphore, #tpu.memory_space<semaphore_mem>>)
    %c2_i32 = arith.constant 2 : i32
    %4 = tpu.memref_slice %arg13[%c2_i32] : memref<3x!tpu.dma_semaphore, #tpu.memory_space<semaphore_mem>> -> memref<1x!tpu.dma_semaphore, #tpu.memory_space<semaphore_mem>>
    %5 = tpu.memref_squeeze %4 : memref<1x!tpu.dma_semaphore, #tpu.memory_space<semaphore_mem>> -> memref<!tpu.dma_semaphore, #tpu.memory_space<semaphore_mem>>
    tpu.enqueue_dma source(%arg7 : memref<256x128xbf16, #tpu.memory_space<any>>) target(%arg11 : memref<256x128xbf16, #tpu.memory_space<vmem>>) target_semaphore(%5 : memref<!tpu.dma_semaphore, #tpu.memory_space<semaphore_mem>>)
    %c0 = arith.constant 0 : index
    %c0_0 = arith.constant 0 : index
    %6 = vector.load %arg4[%c0, %c0_0] : memref<1x1920xf32, #tpu.memory_space<vmem>>, vector<1x128xf32>
    %c0_1 = arith.constant 0 : index
    %c128 = arith.constant 128 : index
    %7 = vector.load %arg4[%c0_1, %c128] : memref<1x1920xf32, #tpu.memory_space<vmem>>, vector<1x128xf32>
    %c0_2 = arith.constant 0 : index
    %c256 = arith.constant 256 : index
    %8 = vector.load %arg4[%c0_2, %c256] : memref<1x1920xf32, #tpu.memory_space<vmem>>, vector<1x256xf32>
    %c0_3 = arith.constant 0 : index
    %c512 = arith.constant 512 : index
    %9 = vector.load %arg4[%c0_3, %c512] : memref<1x1920xf32, #tpu.memory_space<vmem>>, vector<1x1024xf32>
    %c0_4 = arith.constant 0 : index
    %c1536 = arith.constant 1536 : index
    %10 = vector.load %arg4[%c0_4, %c1536] : memref<1x1920xf32, #tpu.memory_space<vmem>>, vector<1x256xf32>
    %c0_5 = arith.constant 0 : index
    %c1792 = arith.constant 1792 : index
    %11 = vector.load %arg4[%c0_5, %c1792] : memref<1x1920xf32, #tpu.memory_space<vmem>>, vector<1x128xf32>
    %c0_6 = arith.constant 0 : index
    %c0_7 = arith.constant 0 : index
    %12 = vector.load %arg1[%c0_6, %c0_7] : memref<8x128xbf16, #tpu.memory_space<vmem>>, vector<8x128xbf16>
    %c0_8 = arith.constant 0 : index
    %c0_9 = arith.constant 0 : index
    %13 = vector.load %arg2[%c0_8, %c0_9] : memref<128x128xbf16, #tpu.memory_space<vmem>>, vector<128x128xbf16>
    %c0_10 = arith.constant 0 : index
    %c0_11 = arith.constant 0 : index
    %14 = vector.load %arg3[%c0_10, %c0_11] : memref<128x256xbf16, #tpu.memory_space<vmem>>, vector<128x256xbf16>
    %cst = arith.constant 0.000000e+00 : f32
    %15 = vector.broadcast %cst : f32 to vector<8x256xf32>
    %c0_12 = arith.constant 0 : index
    %c0_13 = arith.constant 0 : index
    %16 = vector.load %arg12[%c0_12, %c0_13] : memref<8x256xf32, #tpu.memory_space<vmem>>, vector<8x256xf32>
    tpu.vector_store %arg12[%c0_12, %c0_13], %15 {strides = array<i32>} : memref<8x256xf32, #tpu.memory_space<vmem>>, vector<8x256xf32>,
    %cst_14 = arith.constant 0.000000e+00 : f32
    %17 = vector.broadcast %cst_14 : f32 to vector<32x256xf32>
    %c0_15 = arith.constant 0 : index
    %c0_16 = arith.constant 0 : index
    %18 = vector.load %arg0[%c0_15, %c0_16] : memref<256x8xf32, #tpu.memory_space<vmem>>, vector<32x8xf32>
    %19 = arith.truncf %18 : vector<32x8xf32> to vector<32x8xbf16>
    %cst_17 = arith.constant dense<0.000000e+00> : vector<32x128xf32>
    %20 = tpu.matmul %19, %12, %cst_17 {dimension_numbers = #tpu.dot_dimension_numbers<[1], [0], [0], [1], [0, 0, 1, 1], [], []>} : vector<32x8xbf16>, vector<8x128xbf16>, vector<32x128xf32> -> vector<32x128xf32>
    %21 = vector.broadcast %6 : vector<1x128xf32> to vector<32x128xf32>
    %22 = arith.addf %20, %21 : vector<32x128xf32>
    %cst_18 = arith.constant 0.000000e+00 : f32
    %23 = vector.broadcast %cst_18 : f32 to vector<32x128xf32>
    %24 = arith.maximumf %22, %23 : vector<32x128xf32>
    %25 = arith.truncf %24 : vector<32x128xf32> to vector<32x128xbf16>
    %cst_19 = arith.constant dense<0.000000e+00> : vector<32x128xf32>
    %26 = tpu.matmul %25, %13, %cst_19 {dimension_numbers = #tpu.dot_dimension_numbers<[1], [0], [0], [1], [0, 0, 1, 1], [], []>} : vector<32x128xbf16>, vector<128x128xbf16>, vector<32x128xf32> -> vector<32x128xf32>
    %27 = vector.broadcast %7 : vector<1x128xf32> to vector<32x128xf32>
    %28 = arith.addf %26, %27 : vector<32x128xf32>
    %cst_20 = arith.constant 0.000000e+00 : f32
    %29 = vector.broadcast %cst_20 : f32 to vector<32x128xf32>
    %30 = arith.maximumf %28, %29 : vector<32x128xf32>
    %31 = arith.truncf %30 : vector<32x128xf32> to vector<32x128xbf16>
    %cst_21 = arith.constant dense<0.000000e+00> : vector<32x256xf32>
    %32 = tpu.matmul %31, %14, %cst_21 {dimension_numbers = #tpu.dot_dimension_numbers<[1], [0], [0], [1], [0, 0, 1, 1], [], []>} : vector<32x128xbf16>, vector<128x256xbf16>, vector<32x256xf32> -> vector<32x256xf32>
    %33 = vector.broadcast %8 : vector<1x256xf32> to vector<32x256xf32>
    %34 = arith.addf %32, %33 : vector<32x256xf32>
    %cst_22 = arith.constant 0.000000e+00 : f32
    %35 = vector.broadcast %cst_22 : f32 to vector<32x256xf32>
    %36 = arith.maximumf %34, %35 : vector<32x256xf32>
    %37 = arith.maximumf %17, %36 : vector<32x256xf32>
    %c32 = arith.constant 32 : index
    %c0_23 = arith.constant 0 : index
    %38 = vector.load %arg0[%c32, %c0_23] : memref<256x8xf32, #tpu.memory_space<vmem>>, vector<32x8xf32>
    %39 = arith.truncf %38 : vector<32x8xf32> to vector<32x8xbf16>
    %cst_24 = arith.constant dense<0.000000e+00> : vector<32x128xf32>
    %40 = tpu.matmul %39, %12, %cst_24 {dimension_numbers = #tpu.dot_dimension_numbers<[1], [0], [0], [1], [0, 0, 1, 1], [], []>} : vector<32x8xbf16>, vector<8x128xbf16>, vector<32x128xf32> -> vector<32x128xf32>
    %41 = vector.broadcast %6 : vector<1x128xf32> to vector<32x128xf32>
    %42 = arith.addf %40, %41 : vector<32x128xf32>
    %cst_25 = arith.constant 0.000000e+00 : f32
    %43 = vector.broadcast %cst_25 : f32 to vector<32x128xf32>
    %44 = arith.maximumf %42, %43 : vector<32x128xf32>
    %45 = arith.truncf %44 : vector<32x128xf32> to vector<32x128xbf16>
    %cst_26 = arith.constant dense<0.000000e+00> : vector<32x128xf32>
    %46 = tpu.matmul %45, %13, %cst_26 {dimension_numbers = #tpu.dot_dimension_numbers<[1], [0], [0], [1], [0, 0, 1, 1], [], []>} : vector<32x128xbf16>, vector<128x128xbf16>, vector<32x128xf32> -> vector<32x128xf32>
    %47 = vector.broadcast %7 : vector<1x128xf32> to vector<32x128xf32>
    %48 = arith.addf %46, %47 : vector<32x128xf32>
    %cst_27 = arith.constant 0.000000e+00 : f32
    %49 = vector.broadcast %cst_27 : f32 to vector<32x128xf32>
    %50 = arith.maximumf %48, %49 : vector<32x128xf32>
    %51 = arith.truncf %50 : vector<32x128xf32> to vector<32x128xbf16>
    %cst_28 = arith.constant dense<0.000000e+00> : vector<32x256xf32>
    %52 = tpu.matmul %51, %14, %cst_28 {dimension_numbers = #tpu.dot_dimension_numbers<[1], [0], [0], [1], [0, 0, 1, 1], [], []>} : vector<32x128xbf16>, vector<128x256xbf16>, vector<32x256xf32> -> vector<32x256xf32>
    %53 = vector.broadcast %8 : vector<1x256xf32> to vector<32x256xf32>
    %54 = arith.addf %52, %53 : vector<32x256xf32>
    %cst_29 = arith.constant 0.000000e+00 : f32
    %55 = vector.broadcast %cst_29 : f32 to vector<32x256xf32>
    %56 = arith.maximumf %54, %55 : vector<32x256xf32>
    %57 = arith.maximumf %37, %56 : vector<32x256xf32>
    %c64 = arith.constant 64 : index
    %c0_30 = arith.constant 0 : index
    %58 = vector.load %arg0[%c64, %c0_30] : memref<256x8xf32, #tpu.memory_space<vmem>>, vector<32x8xf32>
    %59 = arith.truncf %58 : vector<32x8xf32> to vector<32x8xbf16>
    %cst_31 = arith.constant dense<0.000000e+00> : vector<32x128xf32>
    %60 = tpu.matmul %59, %12, %cst_31 {dimension_numbers = #tpu.dot_dimension_numbers<[1], [0], [0], [1], [0, 0, 1, 1], [], []>} : vector<32x8xbf16>, vector<8x128xbf16>, vector<32x128xf32> -> vector<32x128xf32>
    %61 = vector.broadcast %6 : vector<1x128xf32> to vector<32x128xf32>
    %62 = arith.addf %60, %61 : vector<32x128xf32>
    %cst_32 = arith.constant 0.000000e+00 : f32
    %63 = vector.broadcast %cst_32 : f32 to vector<32x128xf32>
    %64 = arith.maximumf %62, %63 : vector<32x128xf32>
    %65 = arith.truncf %64 : vector<32x128xf32> to vector<32x128xbf16>
    %cst_33 = arith.constant dense<0.000000e+00> : vector<32x128xf32>
    %66 = tpu.matmul %65, %13, %cst_33 {dimension_numbers = #tpu.dot_dimension_numbers<[1], [0], [0], [1], [0, 0, 1, 1], [], []>} : vector<32x128xbf16>, vector<128x128xbf16>, vector<32x128xf32> -> vector<32x128xf32>
    %67 = vector.broadcast %7 : vector<1x128xf32> to vector<32x128xf32>
    %68 = arith.addf %66, %67 : vector<32x128xf32>
    %cst_34 = arith.constant 0.000000e+00 : f32
    %69 = vector.broadcast %cst_34 : f32 to vector<32x128xf32>
    %70 = arith.maximumf %68, %69 : vector<32x128xf32>
    %71 = arith.truncf %70 : vector<32x128xf32> to vector<32x128xbf16>
    %cst_35 = arith.constant dense<0.000000e+00> : vector<32x256xf32>
    %72 = tpu.matmul %71, %14, %cst_35 {dimension_numbers = #tpu.dot_dimension_numbers<[1], [0], [0], [1], [0, 0, 1, 1], [], []>} : vector<32x128xbf16>, vector<128x256xbf16>, vector<32x256xf32> -> vector<32x256xf32>
    %73 = vector.broadcast %8 : vector<1x256xf32> to vector<32x256xf32>
    %74 = arith.addf %72, %73 : vector<32x256xf32>
    %cst_36 = arith.constant 0.000000e+00 : f32
    %75 = vector.broadcast %cst_36 : f32 to vector<32x256xf32>
    %76 = arith.maximumf %74, %75 : vector<32x256xf32>
    %77 = arith.maximumf %57, %76 : vector<32x256xf32>
    %c96 = arith.constant 96 : index
    %c0_37 = arith.constant 0 : index
    %78 = vector.load %arg0[%c96, %c0_37] : memref<256x8xf32, #tpu.memory_space<vmem>>, vector<32x8xf32>
    %79 = arith.truncf %78 : vector<32x8xf32> to vector<32x8xbf16>
    %cst_38 = arith.constant dense<0.000000e+00> : vector<32x128xf32>
    %80 = tpu.matmul %79, %12, %cst_38 {dimension_numbers = #tpu.dot_dimension_numbers<[1], [0], [0], [1], [0, 0, 1, 1], [], []>} : vector<32x8xbf16>, vector<8x128xbf16>, vector<32x128xf32> -> vector<32x128xf32>
    %81 = vector.broadcast %6 : vector<1x128xf32> to vector<32x128xf32>
    %82 = arith.addf %80, %81 : vector<32x128xf32>
    %cst_39 = arith.constant 0.000000e+00 : f32
    %83 = vector.broadcast %cst_39 : f32 to vector<32x128xf32>
    %84 = arith.maximumf %82, %83 : vector<32x128xf32>
    %85 = arith.truncf %84 : vector<32x128xf32> to vector<32x128xbf16>
    %cst_40 = arith.constant dense<0.000000e+00> : vector<32x128xf32>
    %86 = tpu.matmul %85, %13, %cst_40 {dimension_numbers = #tpu.dot_dimension_numbers<[1], [0], [0], [1], [0, 0, 1, 1], [], []>} : vector<32x128xbf16>, vector<128x128xbf16>, vector<32x128xf32> -> vector<32x128xf32>
    %87 = vector.broadcast %7 : vector<1x128xf32> to vector<32x128xf32>
    %88 = arith.addf %86, %87 : vector<32x128xf32>
    %cst_41 = arith.constant 0.000000e+00 : f32
    %89 = vector.broadcast %cst_41 : f32 to vector<32x128xf32>
    %90 = arith.maximumf %88, %89 : vector<32x128xf32>
    %91 = arith.truncf %90 : vector<32x128xf32> to vector<32x128xbf16>
    %cst_42 = arith.constant dense<0.000000e+00> : vector<32x256xf32>
    %92 = tpu.matmul %91, %14, %cst_42 {dimension_numbers = #tpu.dot_dimension_numbers<[1], [0], [0], [1], [0, 0, 1, 1], [], []>} : vector<32x128xbf16>, vector<128x256xbf16>, vector<32x256xf32> -> vector<32x256xf32>
    %93 = vector.broadcast %8 : vector<1x256xf32> to vector<32x256xf32>
    %94 = arith.addf %92, %93 : vector<32x256xf32>
    %cst_43 = arith.constant 0.000000e+00 : f32
    %95 = vector.broadcast %cst_43 : f32 to vector<32x256xf32>
    %96 = arith.maximumf %94, %95 : vector<32x256xf32>
    %97 = arith.maximumf %77, %96 : vector<32x256xf32>
    %cst_44 = arith.constant dense<0xFF800000> : vector<256xf32>
    %98 = vector.multi_reduction <maximumf>, %97, %cst_44 [0] : vector<32x256xf32> to vector<256xf32>
    %99 = vector.shape_cast %98 : vector<256xf32> to vector<1x256xf32>
    %c0_45 = arith.constant 0 : index
    %c0_46 = arith.constant 0 : index
    %100 = vector.load %arg12[%c0_45, %c0_46] : memref<8x256xf32, #tpu.memory_space<vmem>>, vector<1x256xf32>
    tpu.vector_store %arg12[%c0_45, %c0_46], %99 {strides = array<i32>} : memref<8x256xf32, #tpu.memory_space<vmem>>, vector<1x256xf32>,
    %cst_47 = arith.constant 0.000000e+00 : f32
    %101 = vector.broadcast %cst_47 : f32 to vector<32x256xf32>
    %c128_48 = arith.constant 128 : index
    %c0_49 = arith.constant 0 : index
    %102 = vector.load %arg0[%c128_48, %c0_49] : memref<256x8xf32, #tpu.memory_space<vmem>>, vector<32x8xf32>
    %103 = arith.truncf %102 : vector<32x8xf32> to vector<32x8xbf16>
    %cst_50 = arith.constant dense<0.000000e+00> : vector<32x128xf32>
    %104 = tpu.matmul %103, %12, %cst_50 {dimension_numbers = #tpu.dot_dimension_numbers<[1], [0], [0], [1], [0, 0, 1, 1], [], []>} : vector<32x8xbf16>, vector<8x128xbf16>, vector<32x128xf32> -> vector<32x128xf32>
    %105 = vector.broadcast %6 : vector<1x128xf32> to vector<32x128xf32>
    %106 = arith.addf %104, %105 : vector<32x128xf32>
    %cst_51 = arith.constant 0.000000e+00 : f32
    %107 = vector.broadcast %cst_51 : f32 to vector<32x128xf32>
    %108 = arith.maximumf %106, %107 : vector<32x128xf32>
    %109 = arith.truncf %108 : vector<32x128xf32> to vector<32x128xbf16>
    %cst_52 = arith.constant dense<0.000000e+00> : vector<32x128xf32>
    %110 = tpu.matmul %109, %13, %cst_52 {dimension_numbers = #tpu.dot_dimension_numbers<[1], [0], [0], [1], [0, 0, 1, 1], [], []>} : vector<32x128xbf16>, vector<128x128xbf16>, vector<32x128xf32> -> vector<32x128xf32>
    %111 = vector.broadcast %7 : vector<1x128xf32> to vector<32x128xf32>
    %112 = arith.addf %110, %111 : vector<32x128xf32>
    %cst_53 = arith.constant 0.000000e+00 : f32
    %113 = vector.broadcast %cst_53 : f32 to vector<32x128xf32>
    %114 = arith.maximumf %112, %113 : vector<32x128xf32>
    %115 = arith.truncf %114 : vector<32x128xf32> to vector<32x128xbf16>
    %cst_54 = arith.constant dense<0.000000e+00> : vector<32x256xf32>
    %116 = tpu.matmul %115, %14, %cst_54 {dimension_numbers = #tpu.dot_dimension_numbers<[1], [0], [0], [1], [0, 0, 1, 1], [], []>} : vector<32x128xbf16>, vector<128x256xbf16>, vector<32x256xf32> -> vector<32x256xf32>
    %117 = vector.broadcast %8 : vector<1x256xf32> to vector<32x256xf32>
    %118 = arith.addf %116, %117 : vector<32x256xf32>
    %cst_55 = arith.constant 0.000000e+00 : f32
    %119 = vector.broadcast %cst_55 : f32 to vector<32x256xf32>
    %120 = arith.maximumf %118, %119 : vector<32x256xf32>
    %121 = arith.maximumf %101, %120 : vector<32x256xf32>
    %c160 = arith.constant 160 : index
    %c0_56 = arith.constant 0 : index
    %122 = vector.load %arg0[%c160, %c0_56] : memref<256x8xf32, #tpu.memory_space<vmem>>, vector<32x8xf32>
    %123 = arith.truncf %122 : vector<32x8xf32> to vector<32x8xbf16>
    %cst_57 = arith.constant dense<0.000000e+00> : vector<32x128xf32>
    %124 = tpu.matmul %123, %12, %cst_57 {dimension_numbers = #tpu.dot_dimension_numbers<[1], [0], [0], [1], [0, 0, 1, 1], [], []>} : vector<32x8xbf16>, vector<8x128xbf16>, vector<32x128xf32> -> vector<32x128xf32>
    %125 = vector.broadcast %6 : vector<1x128xf32> to vector<32x128xf32>
    %126 = arith.addf %124, %125 : vector<32x128xf32>
    %cst_58 = arith.constant 0.000000e+00 : f32
    %127 = vector.broadcast %cst_58 : f32 to vector<32x128xf32>
    %128 = arith.maximumf %126, %127 : vector<32x128xf32>
    %129 = arith.truncf %128 : vector<32x128xf32> to vector<32x128xbf16>
    %cst_59 = arith.constant dense<0.000000e+00> : vector<32x128xf32>
    %130 = tpu.matmul %129, %13, %cst_59 {dimension_numbers = #tpu.dot_dimension_numbers<[1], [0], [0], [1], [0, 0, 1, 1], [], []>} : vector<32x128xbf16>, vector<128x128xbf16>, vector<32x128xf32> -> vector<32x128xf32>
    %131 = vector.broadcast %7 : vector<1x128xf32> to vector<32x128xf32>
    %132 = arith.addf %130, %131 : vector<32x128xf32>
    %cst_60 = arith.constant 0.000000e+00 : f32
    %133 = vector.broadcast %cst_60 : f32 to vector<32x128xf32>
    %134 = arith.maximumf %132, %133 : vector<32x128xf32>
    %135 = arith.truncf %134 : vector<32x128xf32> to vector<32x128xbf16>
    %cst_61 = arith.constant dense<0.000000e+00> : vector<32x256xf32>
    %136 = tpu.matmul %135, %14, %cst_61 {dimension_numbers = #tpu.dot_dimension_numbers<[1], [0], [0], [1], [0, 0, 1, 1], [], []>} : vector<32x128xbf16>, vector<128x256xbf16>, vector<32x256xf32> -> vector<32x256xf32>
    %137 = vector.broadcast %8 : vector<1x256xf32> to vector<32x256xf32>
    %138 = arith.addf %136, %137 : vector<32x256xf32>
    %cst_62 = arith.constant 0.000000e+00 : f32
    %139 = vector.broadcast %cst_62 : f32 to vector<32x256xf32>
    %140 = arith.maximumf %138, %139 : vector<32x256xf32>
    %141 = arith.maximumf %121, %140 : vector<32x256xf32>
    %c192 = arith.constant 192 : index
    %c0_63 = arith.constant 0 : index
    %142 = vector.load %arg0[%c192, %c0_63] : memref<256x8xf32, #tpu.memory_space<vmem>>, vector<32x8xf32>
    %143 = arith.truncf %142 : vector<32x8xf32> to vector<32x8xbf16>
    %cst_64 = arith.constant dense<0.000000e+00> : vector<32x128xf32>
    %144 = tpu.matmul %143, %12, %cst_64 {dimension_numbers = #tpu.dot_dimension_numbers<[1], [0], [0], [1], [0, 0, 1, 1], [], []>} : vector<32x8xbf16>, vector<8x128xbf16>, vector<32x128xf32> -> vector<32x128xf32>
    %145 = vector.broadcast %6 : vector<1x128xf32> to vector<32x128xf32>
    %146 = arith.addf %144, %145 : vector<32x128xf32>
    %cst_65 = arith.constant 0.000000e+00 : f32
    %147 = vector.broadcast %cst_65 : f32 to vector<32x128xf32>
    %148 = arith.maximumf %146, %147 : vector<32x128xf32>
    %149 = arith.truncf %148 : vector<32x128xf32> to vector<32x128xbf16>
    %cst_66 = arith.constant dense<0.000000e+00> : vector<32x128xf32>
    %150 = tpu.matmul %149, %13, %cst_66 {dimension_numbers = #tpu.dot_dimension_numbers<[1], [0], [0], [1], [0, 0, 1, 1], [], []>} : vector<32x128xbf16>, vector<128x128xbf16>, vector<32x128xf32> -> vector<32x128xf32>
    %151 = vector.broadcast %7 : vector<1x128xf32> to vector<32x128xf32>
    %152 = arith.addf %150, %151 : vector<32x128xf32>
    %cst_67 = arith.constant 0.000000e+00 : f32
    %153 = vector.broadcast %cst_67 : f32 to vector<32x128xf32>
    %154 = arith.maximumf %152, %153 : vector<32x128xf32>
    %155 = arith.truncf %154 : vector<32x128xf32> to vector<32x128xbf16>
    %cst_68 = arith.constant dense<0.000000e+00> : vector<32x256xf32>
    %156 = tpu.matmul %155, %14, %cst_68 {dimension_numbers = #tpu.dot_dimension_numbers<[1], [0], [0], [1], [0, 0, 1, 1], [], []>} : vector<32x128xbf16>, vector<128x256xbf16>, vector<32x256xf32> -> vector<32x256xf32>
    %157 = vector.broadcast %8 : vector<1x256xf32> to vector<32x256xf32>
    %158 = arith.addf %156, %157 : vector<32x256xf32>
    %cst_69 = arith.constant 0.000000e+00 : f32
    %159 = vector.broadcast %cst_69 : f32 to vector<32x256xf32>
    %160 = arith.maximumf %158, %159 : vector<32x256xf32>
    %161 = arith.maximumf %141, %160 : vector<32x256xf32>
    %c224 = arith.constant 224 : index
    %c0_70 = arith.constant 0 : index
    %162 = vector.load %arg0[%c224, %c0_70] : memref<256x8xf32, #tpu.memory_space<vmem>>, vector<32x8xf32>
    %163 = arith.truncf %162 : vector<32x8xf32> to vector<32x8xbf16>
    %cst_71 = arith.constant dense<0.000000e+00> : vector<32x128xf32>
    %164 = tpu.matmul %163, %12, %cst_71 {dimension_numbers = #tpu.dot_dimension_numbers<[1], [0], [0], [1], [0, 0, 1, 1], [], []>} : vector<32x8xbf16>, vector<8x128xbf16>, vector<32x128xf32> -> vector<32x128xf32>
    %165 = vector.broadcast %6 : vector<1x128xf32> to vector<32x128xf32>
    %166 = arith.addf %164, %165 : vector<32x128xf32>
    %cst_72 = arith.constant 0.000000e+00 : f32
    %167 = vector.broadcast %cst_72 : f32 to vector<32x128xf32>
    %168 = arith.maximumf %166, %167 : vector<32x128xf32>
    %169 = arith.truncf %168 : vector<32x128xf32> to vector<32x128xbf16>
    %cst_73 = arith.constant dense<0.000000e+00> : vector<32x128xf32>
    %170 = tpu.matmul %169, %13, %cst_73 {dimension_numbers = #tpu.dot_dimension_numbers<[1], [0], [0], [1], [0, 0, 1, 1], [], []>} : vector<32x128xbf16>, vector<128x128xbf16>, vector<32x128xf32> -> vector<32x128xf32>
    %171 = vector.broadcast %7 : vector<1x128xf32> to vector<32x128xf32>
    %172 = arith.addf %170, %171 : vector<32x128xf32>
    %cst_74 = arith.constant 0.000000e+00 : f32
    %173 = vector.broadcast %cst_74 : f32 to vector<32x128xf32>
    %174 = arith.maximumf %172, %173 : vector<32x128xf32>
    %175 = arith.truncf %174 : vector<32x128xf32> to vector<32x128xbf16>
    %cst_75 = arith.constant dense<0.000000e+00> : vector<32x256xf32>
    %176 = tpu.matmul %175, %14, %cst_75 {dimension_numbers = #tpu.dot_dimension_numbers<[1], [0], [0], [1], [0, 0, 1, 1], [], []>} : vector<32x128xbf16>, vector<128x256xbf16>, vector<32x256xf32> -> vector<32x256xf32>
    %177 = vector.broadcast %8 : vector<1x256xf32> to vector<32x256xf32>
    %178 = arith.addf %176, %177 : vector<32x256xf32>
    %cst_76 = arith.constant 0.000000e+00 : f32
    %179 = vector.broadcast %cst_76 : f32 to vector<32x256xf32>
    %180 = arith.maximumf %178, %179 : vector<32x256xf32>
    %181 = arith.maximumf %161, %180 : vector<32x256xf32>
    %cst_77 = arith.constant dense<0xFF800000> : vector<256xf32>
    %182 = vector.multi_reduction <maximumf>, %181, %cst_77 [0] : vector<32x256xf32> to vector<256xf32>
    %183 = vector.shape_cast %182 : vector<256xf32> to vector<1x256xf32>
    %c1 = arith.constant 1 : index
    %c0_78 = arith.constant 0 : index
    %184 = vector.load %arg12[%c1, %c0_78] : memref<8x256xf32, #tpu.memory_space<vmem>>, vector<1x256xf32>
    tpu.vector_store %arg12[%c1, %c0_78], %183 {strides = array<i32>} : memref<8x256xf32, #tpu.memory_space<vmem>>, vector<1x256xf32>,
    %c0_79 = arith.constant 0 : index
    %c0_80 = arith.constant 0 : index
    %185 = vector.load %arg12[%c0_79, %c0_80] : memref<8x256xf32, #tpu.memory_space<vmem>>, vector<8x256xf32>
    %c0_i32_81 = arith.constant 0 : i32
    %186 = tpu.memref_slice %arg13[%c0_i32_81] : memref<3x!tpu.dma_semaphore, #tpu.memory_space<semaphore_mem>> -> memref<1x!tpu.dma_semaphore, #tpu.memory_space<semaphore_mem>>
    %187 = tpu.memref_squeeze %186 : memref<1x!tpu.dma_semaphore, #tpu.memory_space<semaphore_mem>> -> memref<!tpu.dma_semaphore, #tpu.memory_space<semaphore_mem>>
    tpu.wait_dma2 semaphore(%187 : memref<!tpu.dma_semaphore, #tpu.memory_space<semaphore_mem>>) src(%arg5 : memref<256x1024xbf16, #tpu.memory_space<any>>) dst(%arg9 : memref<256x1024xbf16, #tpu.memory_space<vmem>>)
    %188 = arith.truncf %185 : vector<8x256xf32> to vector<8x256xbf16>
    %c0_82 = arith.constant 0 : index
    %c0_83 = arith.constant 0 : index
    %189 = vector.load %arg9[%c0_82, %c0_83] : memref<256x1024xbf16, #tpu.memory_space<vmem>>, vector<256x1024xbf16>
    %cst_84 = arith.constant dense<0.000000e+00> : vector<8x1024xf32>
    %190 = tpu.matmul %188, %189, %cst_84 {dimension_numbers = #tpu.dot_dimension_numbers<[1], [0], [0], [1], [0, 0, 1, 1], [], []>} : vector<8x256xbf16>, vector<256x1024xbf16>, vector<8x1024xf32> -> vector<8x1024xf32>
    %191 = vector.broadcast %9 : vector<1x1024xf32> to vector<8x1024xf32>
    %192 = arith.addf %190, %191 : vector<8x1024xf32>
    %cst_85 = arith.constant 0.000000e+00 : f32
    %193 = vector.broadcast %cst_85 : f32 to vector<8x1024xf32>
    %194 = arith.maximumf %192, %193 : vector<8x1024xf32>
    %c1_i32_86 = arith.constant 1 : i32
    %195 = tpu.memref_slice %arg13[%c1_i32_86] : memref<3x!tpu.dma_semaphore, #tpu.memory_space<semaphore_mem>> -> memref<1x!tpu.dma_semaphore, #tpu.memory_space<semaphore_mem>>
    %196 = tpu.memref_squeeze %195 : memref<1x!tpu.dma_semaphore, #tpu.memory_space<semaphore_mem>> -> memref<!tpu.dma_semaphore, #tpu.memory_space<semaphore_mem>>
    tpu.wait_dma2 semaphore(%196 : memref<!tpu.dma_semaphore, #tpu.memory_space<semaphore_mem>>) src(%arg6 : memref<1024x256xbf16, #tpu.memory_space<any>>) dst(%arg10 : memref<1024x256xbf16, #tpu.memory_space<vmem>>)
    %197 = arith.truncf %194 : vector<8x1024xf32> to vector<8x1024xbf16>
    %c0_87 = arith.constant 0 : index
    %c0_88 = arith.constant 0 : index
    %198 = vector.load %arg10[%c0_87, %c0_88] : memref<1024x256xbf16, #tpu.memory_space<vmem>>, vector<1024x256xbf16>
    %cst_89 = arith.constant dense<0.000000e+00> : vector<8x256xf32>
    %199 = tpu.matmul %197, %198, %cst_89 {dimension_numbers = #tpu.dot_dimension_numbers<[1], [0], [0], [1], [0, 0, 1, 1], [], []>} : vector<8x1024xbf16>, vector<1024x256xbf16>, vector<8x256xf32> -> vector<8x256xf32>
    %200 = vector.broadcast %10 : vector<1x256xf32> to vector<8x256xf32>
    %201 = arith.addf %199, %200 : vector<8x256xf32>
    %c2_i32_90 = arith.constant 2 : i32
    %202 = tpu.memref_slice %arg13[%c2_i32_90] : memref<3x!tpu.dma_semaphore, #tpu.memory_space<semaphore_mem>> -> memref<1x!tpu.dma_semaphore, #tpu.memory_space<semaphore_mem>>
    %203 = tpu.memref_squeeze %202 : memref<1x!tpu.dma_semaphore, #tpu.memory_space<semaphore_mem>> -> memref<!tpu.dma_semaphore, #tpu.memory_space<semaphore_mem>>
    tpu.wait_dma2 semaphore(%203 : memref<!tpu.dma_semaphore, #tpu.memory_space<semaphore_mem>>) src(%arg7 : memref<256x128xbf16, #tpu.memory_space<any>>) dst(%arg11 : memref<256x128xbf16, #tpu.memory_space<vmem>>)
    %204 = arith.truncf %201 : vector<8x256xf32> to vector<8x256xbf16>
    %c0_91 = arith.constant 0 : index
    %c0_92 = arith.constant 0 : index
    %205 = vector.load %arg11[%c0_91, %c0_92] : memref<256x128xbf16, #tpu.memory_space<vmem>>, vector<256x128xbf16>
    %cst_93 = arith.constant dense<0.000000e+00> : vector<8x128xf32>
    %206 = tpu.matmul %204, %205, %cst_93 {dimension_numbers = #tpu.dot_dimension_numbers<[1], [0], [0], [1], [0, 0, 1, 1], [], []>} : vector<8x256xbf16>, vector<256x128xbf16>, vector<8x128xf32> -> vector<8x128xf32>
    %207 = vector.broadcast %11 : vector<1x128xf32> to vector<8x128xf32>
    %208 = arith.addf %206, %207 : vector<8x128xf32>
    %c0_94 = arith.constant 0 : index
    %c0_95 = arith.constant 0 : index
    %209 = vector.load %arg8[%c0_94, %c0_95] : memref<8x128xf32, #tpu.memory_space<vmem>>, vector<8x128xf32>
    tpu.vector_store %arg8[%c0_94, %c0_95], %208 {strides = array<i32>} : memref<8x128xf32, #tpu.memory_space<vmem>>, vector<8x128xf32>,
    return
  }
}

</mosaic_0001>

<bundles_post_ra>
// kernel: pointnet2_regression_forward.1
= control target key start
LH: loop header
LB: loop body
LE: loop exit
PB: predicated region body
PF: predicated region fallthrough
CT: control target
= control target key end

     0   :  { %s5020_s30 = smov [#allocation2]   ;;  %s5021_s22 = smov [#allocation3]   ;;  %s5915_s0 = inlined_call_operand.vmem [shape: f32[256,8], index: 0, kind: input, shape index: {}]   ;;  %s5916_s1 = inlined_call_operand.vmem [shape: bf16[8,128], index: 1, kind: input, shape index: {}]   ;;  %s5917_s2 = inlined_call_operand.vmem [shape: bf16[128,128], index: 2, kind: input, shape index: {}]   ;;  %s5918_s3 = inlined_call_operand.vmem [shape: bf16[128,256], index: 3, kind: input, shape index: {}]   ;;  %s5919_s4 = inlined_call_operand.vmem [shape: f32[1,1920], index: 4, kind: input, shape index: {}]   ;;  %s5920_s5 = inlined_call_operand.hbm [shape: bf16[256,1024], index: 5, kind: input, shape index: {}]   ;;  %s5921_s8 = inlined_call_operand.vmem [shape: f32[8,128], index: 8, kind: output, shape index: {}]   ;;  %s5922_s7 = inlined_call_operand.vmem [shape: bf16[256,128], index: 7, kind: input, shape index: {}]   ;;  %s5923_s6 = inlined_call_operand.hbm [shape: bf16[1024,256], index: 6, kind: input, shape index: {}]  }
   0x1   :  { %s31_s29 = sshll.u32 %s5920_s5, 4  ;;  %s33_s9 = sshll.u32 %s5020_s30, 4  ;;  %v62_v0 = vld [vmem:[%s5922_s7] sm:$0xff]  ;;  %v64_v1 = vld [vmem:[%s5922_s7 + $0x8] sm:$0xff]  ;;  %v66_v2 = vld [vmem:[%s5922_s7 + $0x10] sm:$0xff]  ;;  %s32_s29 = int_to_ptr.hbm [resolvable:$true] %s31_s29  ;;  %s34_s9 = int_to_ptr.vmem [resolvable:$true] %s33_s9 }
   0x2   :  { %63 = vst [vmem:[#allocation4 + $0x30] sm:$0xff] %v62_v0  ;;  %v68_v3 = vld [vmem:[%s5922_s7 + $0x18] sm:$0xff]  ;;  %36 = dma.hbm_to_vmem [thread:$0]  %s32_s29, 16384, %s34_s9, [#allocation6]  ;;  %v70_v4 = vld [vmem:[%s5922_s7 + $0x20] sm:$0xff]  ;;  %v72_v5 = vld [vmem:[%s5922_s7 + $0x28] sm:$0xff] }
   0x3   :  { %65 = vst [vmem:[#allocation4] sm:$0xff] %v64_v1  ;;  %s45_s21 = sshll.u32 %s5923_s6, 4  ;;  %s47_s23 = sshll.u32 %s5021_s22, 4  ;;  %v74_v6 = vld [vmem:[%s5922_s7 + $0x30] sm:$0xff]  ;;  %v76_v7 = vld [vmem:[%s5922_s7 + $0x38] sm:$0xff]  ;;  %v78_v8 = vld [vmem:[%s5922_s7 + $0x40] sm:$0xff]  ;;  %s46_s21 = int_to_ptr.hbm [resolvable:$true] %s45_s21  ;;  %s48_s23 = int_to_ptr.vmem [resolvable:$true] %s47_s23 }
   0x4   :  { %67 = vst [vmem:[#allocation4 + $0x58] sm:$0xff] %v66_v2  ;;  %50 = dma.hbm_to_vmem [thread:$0]  %s46_s21, 16384, %s48_s23, [#allocation6 + $0x1]  ;;  %v80_v9 = vld [vmem:[%s5922_s7 + $0x48] sm:$0xff]  ;;  %v82_v10 = vld [vmem:[%s5922_s7 + $0x50] sm:$0xff]  ;;  %v84_v11 = vld [vmem:[%s5922_s7 + $0x58] sm:$0xff] }
   0x5   :  { %69 = vst [vmem:[#allocation4 + $0x18] sm:$0xff] %v68_v3  ;;  %v86_v12 = vld [vmem:[%s5922_s7 + $0x60] sm:$0xff]  ;;  %v88_v13 = vld [vmem:[%s5922_s7 + $0x68] sm:$0xff]  ;;  %v90_v14 = vld [vmem:[%s5922_s7 + $0x70] sm:$0xff] }
   0x6   :  { %71 = vst [vmem:[#allocation4 + $0x50] sm:$0xff] %v70_v4  ;;  %v92_v15 = vld [vmem:[%s5922_s7 + $0x78] sm:$0xff] }
   0x7   :  { %73 = vst [vmem:[#allocation4 + $0x68] sm:$0xff] %v72_v5 }
   0x8   :  { %75 = vst [vmem:[#allocation4 + $0x8] sm:$0xff] %v74_v6 }
   0x9   :  { %77 = vst [vmem:[#allocation4 + $0x48] sm:$0xff] %v76_v7 }
   0xa   :  { %79 = vst [vmem:[#allocation4 + $0x40] sm:$0xff] %v78_v8 }
   0xb   :  { %81 = vst [vmem:[#allocation4 + $0x20] sm:$0xff] %v80_v9 }
   0xc   :  { %83 = vst [vmem:[#allocation4 + $0x10] sm:$0xff] %v82_v10 }
   0xd   :  { %85 = vst [vmem:[#allocation4 + $0x38] sm:$0xff] %v84_v11 }
   0xe   :  { %87 = vst [vmem:[#allocation4 + $0x60] sm:$0xff] %v86_v12 }
   0xf   :  { %89 = vst [vmem:[#allocation4 + $0x70] sm:$0xff] %v88_v13 }
  0x10   :  { %91 = vst [vmem:[#allocation4 + $0x78] sm:$0xff] %v90_v14 }
  0x11   :  { %93 = vst [vmem:[#allocation4 + $0x28] sm:$0xff] %v92_v15 }
  0x12   :  { %99 = vsyncadd [#allocation6 + $0x2], 2048  ;;  %v5125_v16 = vld [vmem:[%s5919_s4 + $0x4] sm:$0xff]  ;;  %v5130_v17 = vld [vmem:[%s5919_s4 + $0xc] sm:$0x3]  ;;  %vm157_vm0 = vcmask 1043456  }
  0x13   :  { %v5135_v18 = vld [vmem:[%s5919_s4 + $0xe] sm:$0x1]  ;;  %v106_v19 = vld [vmem:[%s5916_s1] sm:$0xf]  ;;  %vm150_vm1 = vcmask 64512   ;;  %v143_v24 = vld [vmem:[%s5915_s0 + $0x10] sm:$0xff] }
  0x14   :  { %v141_v20 = vld [vmem:[%s5915_s0] sm:$0xff]  ;;  %v5143_v21 = vsel %vm157_vm0, %v106_v19, 0  ;;  %v142_v22 = vld [vmem:[%s5915_s0 + $0x8] sm:$0xff]  ;;  %v144_v25 = vld [vmem:[%s5915_s0 + $0x18] sm:$0xff]  ;;  %vm770_vm2 = vcmask 1040384  }
  0x15   :  { %168 = vmatpush.bf16.msra.mxu0 %v5143_v21  ;;  %v145_v23 = vpack.c.bf16 %v142_v22, %v141_v20  ;;  %v146_v26 = vpack.c.bf16 %v144_v25, %v143_v24  ;;  %v401_v27 = vld [vmem:[%s5915_s0 + $0x20] sm:$0xff]  ;;  %v402_v28 = vld [vmem:[%s5915_s0 + $0x28] sm:$0xff]  ;;  %v403_v30 = vld [vmem:[%s5915_s0 + $0x30] sm:$0xff] }
  0x16   :  { %v405_v29 = vpack.c.bf16 %v402_v28, %v401_v27  ;;  %v404_v31 = vld [vmem:[%s5915_s0 + $0x38] sm:$0xff]  ;;  %v517_v33 = vld [vmem:[%s5915_s0 + $0x40] sm:$0xff]  ;;  %v518_v34 = vld [vmem:[%s5915_s0 + $0x48] sm:$0xff] }
  0x17   :  { %v406_v32 = vpack.c.bf16 %v404_v31, %v403_v30  ;;  %v521_v35 = vpack.c.bf16 %v518_v34, %v517_v33  ;;  %v5184_v36 = vld [vmem:[%s5917_s2 + $0x38] sm:$0xff]  ;;  %v519_v37 = vld [vmem:[%s5915_s0 + $0x50] sm:$0xff]  ;;  %v5204_v41 = vld [vmem:[%s5917_s2 + $0x28] sm:$0xff] }
  0x18   :  { %3462 = vmatmul.msk.bf16.vlgmr.msra.gmra.mxu0 %vm150_vm1, %v145_v23  ;;  %237 = vmatpush.bf16.msra.mxu1 %v5184_v36  ;;  %v520_v38 = vld [vmem:[%s5915_s0 + $0x58] sm:$0xff]  ;;  %v5197_v40 = vld [vmem:[%s5917_s2 + $0x30] sm:$0xff]  ;;  %v5210_v42 = vld [vmem:[%s5917_s2 + $0x20] sm:$0xff] }
  0x19   :  { %420 = vmatpush.bf16.msrb.mxu0 %v5143_v21  ;;  %v522_v39 = vpack.c.bf16 %v520_v38, %v519_v37  ;;  %v633_v43 = vld [vmem:[%s5915_s0 + $0x60] sm:$0xff]  ;;  %v634_v44 = vld [vmem:[%s5915_s0 + $0x68] sm:$0xff]  ;;  %v5222_v45 = vld [vmem:[%s5917_s2 + $0x18] sm:$0xff] }
  0x1a   :  { %v637_v46 = vpack.c.bf16 %v634_v44, %v633_v43  ;;  %v5228_v47 = vld [vmem:[%s5917_s2 + $0x10] sm:$0xff]  ;;  %v5236_v48 = vld [vmem:[%s5917_s2 + $0x8] sm:$0xff]  ;;  %v5242_v49 = vld [vmem:[%s5917_s2] sm:$0xff] }
  0x1b   :  { %v635_v50 = vld [vmem:[%s5915_s0 + $0x70] sm:$0xff]  ;;  %v636_v51 = vld [vmem:[%s5915_s0 + $0x78] sm:$0xff]  ;;  %v779_v53 = vld [vmem:[%s5915_s0 + $0x80] sm:$0xff] }
  0x1c   :  { %238 = vmatpush.bf16.msra.mxu1 %v5197_v40  ;;  %v638_v52 = vpack.c.bf16 %v636_v51, %v635_v50  ;;  %v780_v54 = vld [vmem:[%s5915_s0 + $0x88] sm:$0xff]  ;;  %v5267_v57 = vld [vmem:[%s5919_s4] ss:$0 sm:$0xff]  ;;  %v781_v63 = vld [vmem:[%s5915_s0 + $0x90] sm:$0xff] }
  0x1d   :  { %536 = vmatpush.bf16.msra.mxu0 %v5143_v21  ;;  %v783_v55 = vpack.c.bf16 %v780_v54, %v779_v53  ;;  %v782_v0 = vld [vmem:[%s5915_s0 + $0x98] sm:$0xff]  ;;  %v895_v9 = vld [vmem:[%s5915_s0 + $0xa0] sm:$0xff]  ;;  %v896_v10 = vld [vmem:[%s5915_s0 + $0xa8] sm:$0xff] }
  0x1e   :  { %v784_v2 = vpack.c.bf16 %v782_v0, %v781_v63  ;;  %v899_v12 = vpack.c.bf16 %v896_v10, %v895_v9  ;;  %v897_v23 = vld [vmem:[%s5915_s0 + $0xb0] sm:$0xff]  ;;  %v898_v24 = vld [vmem:[%s5915_s0 + $0xb8] sm:$0xff]  ;;  %v1012_v33 = vld [vmem:[%s5915_s0 + $0xc8] sm:$0xff] }
  0x1f   :  { %v900_v25 = vpack.c.bf16 %v898_v24, %v897_v23  ;;  %v1013_v50 = vld [vmem:[%s5915_s0 + $0xd0] sm:$0xff]  ;;  %v1014_v51 = vld [vmem:[%s5915_s0 + $0xd8] sm:$0xff]  ;;  %v3548_v10 = vld [vmem:[%s5918_s3 + $0x68] sm:$0xf0] }
  0x20   :  { %239 = vmatpush.bf16.msra.mxu1 %v5204_v41  ;;  %v1016_v53 = vpack.c.bf16 %v1014_v51, %v1013_v50  ;;  %v3556_v63 = vld [vmem:[%s5918_s3 + $0x78] sm:$0xf0]  ;;  %v3530_v24 = vld [vmem:[%s5918_s3 + $0x40] sm:$0xf] }
  0x21   :  { %v3514_v51 = vld [vmem:[%s5918_s3 + $0x20] sm:$0xf] }
  0x24   :  { %240 = vmatpush.bf16.msra.mxu1 %v5210_v42 }
  0x28   :  { %3463 = vmatmul.msk.bf16.gmra.mxu0 %vm150_vm1, %v146_v26  ;;  %241 = vmatpush.bf16.msra.mxu1 %v5222_v45 }
  0x2c   :  { %242 = vmatpush.bf16.msra.mxu1 %v5228_v47 }
  0x30   :  { %243 = vmatpush.bf16.msra.mxu1 %v5236_v48 }
  0x34   :  { %244 = vmatpush.bf16.msra.mxu1 %v5242_v49 }
  0x38   :  { %3560 = vmatmul.msk.bf16.vlgmr.msrb.gmra.mxu0 %vm150_vm1, %v405_v29  ;;  %438 = vmatpush.bf16.msrb.mxu1 %v5184_v36 }
  0x39   :  { %652 = vmatpush.bf16.msrb.mxu0 %v5143_v21 }
  0x3c   :  { %439 = vmatpush.bf16.msrb.mxu1 %v5197_v40 }
  0x40   :  { %440 = vmatpush.bf16.msrb.mxu1 %v5204_v41 }
  0x44   :  { %441 = vmatpush.bf16.msrb.mxu1 %v5210_v42 }
  0x48   :  { %3561 = vmatmul.msk.bf16.gmra.mxu0 %vm150_vm1, %v406_v32  ;;  %442 = vmatpush.bf16.msrb.mxu1 %v5222_v45  ;;  %v1011_v32 = vld [vmem:[%s5915_s0 + $0xc0] sm:$0xff] }
  0x4c   :  { %443 = vmatpush.bf16.msrb.mxu1 %v5228_v47 }
  0x50   :  { %444 = vmatpush.bf16.msrb.mxu1 %v5236_v48 }
  0x54   :  { %445 = vmatpush.bf16.msrb.mxu1 %v5242_v49 }
  0x58   :  { %3562 = vmatmul.msk.bf16.vlgmr.msra.gmra.mxu0 %vm150_vm1, %v521_v35  ;;  %v1015_v35 = vpack.c.bf16 %v1012_v33, %v1011_v32  ;;  %v3522_v32 = vld [vmem:[%s5918_s3 + $0x30] sm:$0xf]  ;;  %v4680_v33 = vld [vmem:[%s5918_s3 + $0x34] sm:$0xf0] }
  0x59   :  { %798 = vmatpush.bf16.msra.mxu0 %v5143_v21 }
  0x68   :  { %3563 = vmatmul.msk.bf16.gmra.mxu0 %vm150_vm1, %v522_v39 }
  0x78   :  { %3564 = vmatmul.msk.bf16.vlgmr.msrb.gmra.mxu0 %vm150_vm1, %v637_v46 }
  0x79   :  { %914 = vmatpush.bf16.msrb.mxu0 %v5143_v21 }
  0x88   :  { %3565 = vmatmul.msk.bf16.gmra.mxu0 %vm150_vm1, %v638_v52 }
  0x95   :  { %v170_v56 = vpop.f32.mrf.mxu0 }
  0x96   :  { %v171_v58 = vadd.f32 %v5267_v57, %v170_v56 }
  0x98   :  { %3566 = vmatmul.msk.bf16.vlgmr.msra.gmra.mxu0 %vm150_vm1, %v783_v55  ;;  %v180_v61 = vmax.f32 %v171_v58, 0.0 }
  0x99   :  { %1030 = vmatpush.bf16.msra.mxu0 %v5143_v21 }
  0x9d   :  { %v172_v59 = vpop.f32.mrf.mxu0 }
  0x9e   :  { %v173_v60 = vadd.f32 %v5267_v57, %v172_v59  ;;  %v3554_v59 = vld [vmem:[%s5918_s3 + $0x70] sm:$0xf] }
  0xa0   :  { %v181_v62 = vmax.f32 %v173_v60, 0.0  ;;  %v4688_v60 = vld [vmem:[%s5918_s3 + $0x74] sm:$0xf0] }
  0xa2   :  { %v184_v1 = vpack.c.bf16 %v181_v62, %v180_v61  ;;  %v4687_v61 = vld [vmem:[%s5918_s3 + $0x74] sm:$0xf]  ;;  %v5349_v62 = vor.u32 %v4688_v60, %v3554_v59  ;;  %v3506_v60 = vld [vmem:[%s5918_s3 + $0x10] sm:$0xf] }
  0xa4   :  { %245 = vmatmul.bf16.vlgmr.msra.gmra.mxu1 %v184_v1  ;;  %347 = vmatpush.bf16.msra.mxu2 %v5349_v62 }
  0xa5   :  { %v175_v3 = vpop.f32.mrf.mxu0  ;;  %554 = vmatpush.bf16.msra.mxu1 %v5184_v36 }
  0xa6   :  { %v176_v4 = vadd.f32 %v5267_v57, %v175_v3  ;;  %v1127_v3 = vld [vmem:[%s5915_s0 + $0xe0] sm:$0xff] }
  0xa8   :  { %3567 = vmatmul.msk.bf16.gmra.mxu0 %vm150_vm1, %v784_v2  ;;  %v182_v7 = vmax.f32 %v176_v4, 0.0  ;;  %v5354_v2 = vor.u32 %v4687_v61, %v3556_v63  ;;  %v1128_v4 = vld [vmem:[%s5915_s0 + $0xe8] sm:$0xff]  ;;  %v4676_v61 = vld [vmem:[%s5918_s3 + $0x14] sm:$0xf0]  ;;  %v4675_v63 = vld [vmem:[%s5918_s3 + $0x14] sm:$0xf] }
  0xa9   :  { %555 = vmatpush.bf16.msra.mxu1 %v5197_v40 }
  0xaa   :  { %366 = vmatpush.bf16.msra.mxu3 %v5354_v2 }
  0xad   :  { %v177_v5 = vpop.f32.mrf.mxu0  ;;  %556 = vmatpush.bf16.msra.mxu1 %v5204_v41 }
  0xae   :  { %v178_v6 = vadd.f32 %v5267_v57, %v177_v5 }
  0xb0   :  { %v183_v8 = vmax.f32 %v178_v6, 0.0  ;;  %v3546_v6 = vld [vmem:[%s5918_s3 + $0x60] sm:$0xf] }
  0xb1   :  { %557 = vmatpush.bf16.msra.mxu1 %v5210_v42 }
  0xb2   :  { %v185_v11 = vpack.c.bf16 %v183_v8, %v182_v7  ;;  %v4686_v7 = vld [vmem:[%s5918_s3 + $0x64] sm:$0xf0]  ;;  %v4685_v8 = vld [vmem:[%s5918_s3 + $0x64] sm:$0xf] }
  0xb3   :  { %v5374_v9 = vor.u32 %v4686_v7, %v3546_v6  ;;  %v4673_v6 = vld [vmem:[%s5918_s3 + $0x4] sm:$0xf] }
  0xb4   :  { %250 = vmatmul.bf16.gmra.mxu1 %v185_v11  ;;  %v1131_v11 = vpack.c.bf16 %v1128_v4, %v1127_v3  ;;  %v3498_v4 = vld [vmem:[%s5918_s3] sm:$0xf] }
  0xb5   :  { %v422_v13 = vpop.f32.mrf.mxu0  ;;  %558 = vmatpush.bf16.msra.mxu1 %v5222_v45  ;;  %348 = vmatpush.bf16.msra.mxu2 %v5374_v9 }
  0xb6   :  { %v423_v14 = vadd.f32 %v5267_v57, %v422_v13 }
  0xb8   :  { %3568 = vmatmul.msk.bf16.vlgmr.msrb.gmra.mxu0 %vm150_vm1, %v899_v12  ;;  %v432_v20 = vmax.f32 %v423_v14, 0.0  ;;  %v5379_v12 = vor.u32 %v4685_v8, %v3548_v10  ;;  %v3538_v14 = vld [vmem:[%s5918_s3 + $0x50] sm:$0xf]  ;;  %v3500_v8 = vld [vmem:[%s5918_s3 + $0x8] sm:$0xf0] }
  0xb9   :  { %559 = vmatpush.bf16.msra.mxu1 %v5228_v47  ;;  %1146 = vmatpush.bf16.msrb.mxu0 %v5143_v21 }
  0xba   :  { %367 = vmatpush.bf16.msra.mxu3 %v5379_v12 }
  0xbd   :  { %v424_v15 = vpop.f32.mrf.mxu0  ;;  %560 = vmatpush.bf16.msra.mxu1 %v5236_v48 }
  0xbe   :  { %v425_v19 = vadd.f32 %v5267_v57, %v424_v15  ;;  %v4684_v15 = vld [vmem:[%s5918_s3 + $0x54] sm:$0xf0] }
  0xc0   :  { %v433_v22 = vmax.f32 %v425_v19, 0.0  ;;  %v4683_v19 = vld [vmem:[%s5918_s3 + $0x54] sm:$0xf] }
  0xc1   :  { %561 = vmatpush.bf16.msra.mxu1 %v5242_v49 }
  0xc2   :  { %v436_v21 = vpack.c.bf16 %v433_v22, %v432_v20  ;;  %v5393_v20 = vor.u32 %v4684_v15, %v3538_v14  ;;  %v3540_v22 = vld [vmem:[%s5918_s3 + $0x58] sm:$0xf0] }
  0xc3   :  { %v5399_v23 = vor.u32 %v4683_v19, %v3540_v22 }
  0xc4   :  { %446 = vmatmul.bf16.vlgmr.msrb.gmra.mxu1 %v436_v21  ;;  %v4682_v21 = vld [vmem:[%s5918_s3 + $0x44] sm:$0xf0]  ;;  %349 = vmatpush.bf16.msra.mxu2 %v5393_v20 }
  0xc5   :  { %v427_v26 = vpop.f32.mrf.mxu0  ;;  %670 = vmatpush.bf16.msrb.mxu1 %v5184_v36  ;;  %368 = vmatpush.bf16.msra.mxu3 %v5399_v23 }
  0xc6   :  { %v428_v27 = vadd.f32 %v5267_v57, %v427_v26  ;;  %v4681_v26 = vld [vmem:[%s5918_s3 + $0x44] sm:$0xf] }
  0xc8   :  { %3569 = vmatmul.msk.bf16.gmra.mxu0 %vm150_vm1, %v900_v25  ;;  %v434_v30 = vmax.f32 %v428_v27, 0.0  ;;  %v5409_v25 = vor.u32 %v4682_v21, %v3530_v24  ;;  %v3532_v27 = vld [vmem:[%s5918_s3 + $0x48] sm:$0xf0] }
  0xc9   :  { %671 = vmatpush.bf16.msrb.mxu1 %v5197_v40 }
  0xca   :  { %350 = vmatpush.bf16.msra.mxu2 %v5409_v25 }
  0xcd   :  { %v429_v28 = vpop.f32.mrf.mxu0  ;;  %672 = vmatpush.bf16.msrb.mxu1 %v5204_v41 }
  0xce   :  { %v430_v29 = vadd.f32 %v5267_v57, %v429_v28  ;;  %v5418_v28 = vor.u32 %v4681_v26, %v3532_v27 }
  0xd0   :  { %v435_v31 = vmax.f32 %v430_v29, 0.0  ;;  %369 = vmatpush.bf16.msra.mxu3 %v5418_v28 }
  0xd1   :  { %673 = vmatpush.bf16.msrb.mxu1 %v5210_v42 }
  0xd2   :  { %v437_v34 = vpack.c.bf16 %v435_v31, %v434_v30 }
  0xd4   :  { %451 = vmatmul.bf16.gmra.mxu1 %v437_v34  ;;  %v4679_v34 = vld [vmem:[%s5918_s3 + $0x34] sm:$0xf] }
  0xd5   :  { %v538_v37 = vpop.f32.mrf.mxu0  ;;  %674 = vmatpush.bf16.msrb.mxu1 %v5222_v45 }
  0xd6   :  { %v539_v38 = vadd.f32 %v5267_v57, %v538_v37  ;;  %v3524_v37 = vld [vmem:[%s5918_s3 + $0x38] sm:$0xf0] }
  0xd8   :  { %3570 = vmatmul.msk.bf16.vlgmr.msra.gmra.mxu0 %vm150_vm1, %v1015_v35  ;;  %v548_v44 = vmax.f32 %v539_v38, 0.0  ;;  %v5434_v35 = vor.u32 %v4680_v33, %v3522_v32  ;;  %v5532_v33 = vld [vmem:[%s5919_s4 + $0x1] ss:$0 sm:$0xff] }
  0xd9   :  { %675 = vmatpush.bf16.msrb.mxu1 %v5228_v47 }
  0xda   :  { %351 = vmatpush.bf16.msra.mxu2 %v5434_v35 }
  0xdd   :  { %v540_v39 = vpop.f32.mrf.mxu0  ;;  %676 = vmatpush.bf16.msrb.mxu1 %v5236_v48 }
  0xde   :  { %v541_v43 = vadd.f32 %v5267_v57, %v540_v39 }
  0xe0   :  { %v549_v46 = vmax.f32 %v541_v43, 0.0  ;;  %v5439_v43 = vor.u32 %v4679_v34, %v3524_v37 }
  0xe1   :  { %677 = vmatpush.bf16.msrb.mxu1 %v5242_v49 }
  0xe2   :  { %v552_v52 = vpack.c.bf16 %v549_v46, %v548_v44  ;;  %v1129_v44 = vld [vmem:[%s5915_s0 + $0xf0] sm:$0xff]  ;;  %v1130_v46 = vld [vmem:[%s5915_s0 + $0xf8] sm:$0xff]  ;;  %370 = vmatpush.bf16.msra.mxu3 %v5439_v43 }
  0xe4   :  { %562 = vmatmul.bf16.vlgmr.msra.gmra.mxu1 %v552_v52  ;;  %v4678_v52 = vld [vmem:[%s5918_s3 + $0x24] sm:$0xf0] }
  0xe5   :  { %v543_v54 = vpop.f32.mrf.mxu0  ;;  %816 = vmatpush.bf16.msra.mxu1 %v5184_v36 }
  0xe6   :  { %v544_v55 = vadd.f32 %v5267_v57, %v543_v54  ;;  %v5459_v54 = vor.u32 %v4678_v52, %v3514_v51 }
  0xe8   :  { %3571 = vmatmul.msk.bf16.gmra.mxu0 %vm150_vm1, %v1016_v53  ;;  %v550_v0 = vmax.f32 %v544_v55, 0.0  ;;  %v4677_v53 = vld [vmem:[%s5918_s3 + $0x24] sm:$0xf]  ;;  %v3516_v55 = vld [vmem:[%s5918_s3 + $0x28] sm:$0xf0]  ;;  %352 = vmatpush.bf16.msra.mxu2 %v5459_v54 }
  0xe9   :  { %817 = vmatpush.bf16.msra.mxu1 %v5197_v40 }
  0xed   :  { %v545_v56 = vpop.f32.mrf.mxu0  ;;  %818 = vmatpush.bf16.msra.mxu1 %v5204_v41 }
  0xee   :  { %v546_v58 = vadd.f32 %v5267_v57, %v545_v56  ;;  %v1132_v56 = vpack.c.bf16 %v1130_v46, %v1129_v44 }
  0xf0   :  { %v551_v1 = vmax.f32 %v546_v58, 0.0  ;;  %v5464_v58 = vor.u32 %v4677_v53, %v3516_v55 }
  0xf1   :  { %819 = vmatpush.bf16.msra.mxu1 %v5210_v42 }
  0xf2   :  { %v553_v5 = vpack.c.bf16 %v551_v1, %v550_v0  ;;  %371 = vmatpush.bf16.msra.mxu3 %v5464_v58  ;;  %v5478_v0 = vor.u32 %v4676_v61, %v3506_v60  ;;  %v3508_v1 = vld [vmem:[%s5918_s3 + $0x18] sm:$0xf0] }
  0xf3   :  { %v5484_v3 = vor.u32 %v4675_v63, %v3508_v1 }
  0xf4   :  { %567 = vmatmul.bf16.gmra.mxu1 %v553_v5  ;;  %353 = vmatpush.bf16.msra.mxu2 %v5478_v0  ;;  %v4674_v5 = vld [vmem:[%s5918_s3 + $0x4] sm:$0xf0] }
  0xf5   :  { %v654_v13 = vpop.f32.mrf.mxu0  ;;  %820 = vmatpush.bf16.msra.mxu1 %v5222_v45  ;;  %v5498_v7 = vor.u32 %v4674_v5, %v3498_v4 }
  0xf6   :  { %v655_v29 = vadd.f32 %v5267_v57, %v654_v13  ;;  %372 = vmatpush.bf16.msra.mxu3 %v5484_v3 }
  0xf8   :  { %3572 = vmatmul.msk.bf16.vlgmr.msrb.gmra.mxu0 %vm150_vm1, %v1131_v11  ;;  %v664_v38 = vmax.f32 %v655_v29, 0.0  ;;  %v5504_v11 = vor.u32 %v4673_v6, %v3500_v8  ;;  %354 = vmatpush.bf16.msra.mxu2 %v5498_v7 }
  0xf9   :  { %821 = vmatpush.bf16.msra.mxu1 %v5228_v47 }
  0xfa   :  { %373 = vmatpush.bf16.msra.mxu3 %v5504_v11 }
  0xfc   :  { %463 = vmatpush.bf16.msrb.mxu2 %v5349_v62 }
  0xfd   :  { %v656_v30 = vpop.f32.mrf.mxu0  ;;  %822 = vmatpush.bf16.msra.mxu1 %v5236_v48 }
  0xfe   :  { %v657_v31 = vadd.f32 %v5267_v57, %v656_v30  ;;  %482 = vmatpush.bf16.msrb.mxu3 %v5354_v2 }
 0x100   :  { %v665_v39 = vmax.f32 %v657_v31, 0.0  ;;  %464 = vmatpush.bf16.msrb.mxu2 %v5374_v9 }
 0x101   :  { %823 = vmatpush.bf16.msra.mxu1 %v5242_v49 }
 0x102   :  { %v668_v50 = vpack.c.bf16 %v665_v39, %v664_v38  ;;  %483 = vmatpush.bf16.msrb.mxu3 %v5379_v12 }
 0x104   :  { %678 = vmatmul.bf16.vlgmr.msrb.gmra.mxu1 %v668_v50  ;;  %465 = vmatpush.bf16.msrb.mxu2 %v5393_v20 }
 0x105   :  { %v659_v59 = vpop.f32.mrf.mxu0  ;;  %932 = vmatpush.bf16.msrb.mxu1 %v5184_v36 }
 0x106   :  { %v660_v10 = vadd.f32 %v5267_v57, %v659_v59  ;;  %484 = vmatpush.bf16.msrb.mxu3 %v5399_v23 }
 0x108   :  { %3573 = vmatmul.msk.bf16.gmra.mxu0 %vm150_vm1, %v1132_v56  ;;  %v666_v15 = vmax.f32 %v660_v10, 0.0  ;;  %466 = vmatpush.bf16.msrb.mxu2 %v5409_v25 }
 0x109   :  { %933 = vmatpush.bf16.msrb.mxu1 %v5197_v40 }
 0x10a   :  { %485 = vmatpush.bf16.msrb.mxu3 %v5418_v28 }
 0x10c   :  { %467 = vmatpush.bf16.msrb.mxu2 %v5434_v35 }
 0x10d   :  { %v661_v13 = vpop.f32.mrf.mxu0  ;;  %934 = vmatpush.bf16.msrb.mxu1 %v5204_v41 }
 0x10e   :  { %v662_v14 = vadd.f32 %v5267_v57, %v661_v13  ;;  %486 = vmatpush.bf16.msrb.mxu3 %v5439_v43 }
 0x110   :  { %v667_v19 = vmax.f32 %v662_v14, 0.0  ;;  %468 = vmatpush.bf16.msrb.mxu2 %v5459_v54 }
 0x111   :  { %935 = vmatpush.bf16.msrb.mxu1 %v5210_v42 }
 0x112   :  { %v669_v22 = vpack.c.bf16 %v667_v19, %v666_v15  ;;  %487 = vmatpush.bf16.msrb.mxu3 %v5464_v58 }
 0x114   :  { %683 = vmatmul.bf16.gmra.mxu1 %v669_v22  ;;  %469 = vmatpush.bf16.msrb.mxu2 %v5478_v0 }
 0x115   :  { %v800_v24 = vpop.f32.mrf.mxu0  ;;  %936 = vmatpush.bf16.msrb.mxu1 %v5222_v45 }
 0x116   :  { %v801_v21 = vadd.f32 %v5267_v57, %v800_v24  ;;  %488 = vmatpush.bf16.msrb.mxu3 %v5484_v3 }
 0x118   :  { %v810_v29 = vmax.f32 %v801_v21, 0.0  ;;  %470 = vmatpush.bf16.msrb.mxu2 %v5498_v7 }
 0x119   :  { %937 = vmatpush.bf16.msrb.mxu1 %v5228_v47 }
 0x11a   :  { %489 = vmatpush.bf16.msrb.mxu3 %v5504_v11 }
 0x11d   :  { %v802_v26 = vpop.f32.mrf.mxu0  ;;  %938 = vmatpush.bf16.msrb.mxu1 %v5236_v48 }
 0x11e   :  { %v803_v27 = vadd.f32 %v5267_v57, %v802_v26 }
 0x120   :  { %v811_v30 = vmax.f32 %v803_v27, 0.0 }
 0x121   :  { %v246_v31 = vpop.f32.mrf.mxu1  ;;  %939 = vmatpush.bf16.msrb.mxu1 %v5242_v49 }
 0x122   :  { %v814_v32 = vpack.c.bf16 %v811_v30, %v810_v29  ;;  %v247_v37 = vadd.f32 %v5532_v33, %v246_v31 }
 0x124   :  { %824 = vmatmul.bf16.vlgmr.msra.gmra.mxu1 %v814_v32  ;;  %v256_v44 = vmax.f32 %v247_v37, 0.0 }
 0x125   :  { %v805_v34 = vpop.f32.mrf.mxu0  ;;  %1048 = vmatpush.bf16.msra.mxu1 %v5184_v36 }
 0x126   :  { %v806_v46 = vadd.f32 %v5267_v57, %v805_v34 }
 0x128   :  { %v812_v55 = vmax.f32 %v806_v46, 0.0 }
 0x129   :  { %v248_v38 = vpop.f32.mrf.mxu1  ;;  %1049 = vmatpush.bf16.msra.mxu1 %v5197_v40 }
 0x12a   :  { %v249_v39 = vadd.f32 %v5532_v33, %v248_v38 }
 0x12c   :  { %v257_v50 = vmax.f32 %v249_v39, 0.0 }
 0x12d   :  { %v807_v51 = vpop.f32.mrf.mxu0  ;;  %1050 = vmatpush.bf16.msra.mxu1 %v5204_v41 }
 0x12e   :  { %v808_v52 = vadd.f32 %v5267_v57, %v807_v51  ;;  %v260_v53 = vpack.c.bf16 %v257_v50, %v256_v44 }
 0x130   :  { %v813_v56 = vmax.f32 %v808_v52, 0.0  ;;  %355 = vmatmul.bf16.vlgmr.msra.gmra.mxu2 %v260_v53  ;;  %374 = vmatmul.bf16.vlgmr.msra.gmra.mxu3 %v260_v53 }
 0x131   :  { %v251_v59 = vpop.f32.mrf.mxu1  ;;  %598 = vmatpush.bf16.msra.mxu3 %v5354_v2  ;;  %1051 = vmatpush.bf16.msra.mxu1 %v5210_v42 }
 0x132   :  { %v815_v60 = vpack.c.bf16 %v813_v56, %v812_v55  ;;  %579 = vmatpush.bf16.msra.mxu2 %v5349_v62  ;;  %v252_v63 = vadd.f32 %v5532_v33, %v251_v59 }
 0x134   :  { %829 = vmatmul.bf16.gmra.mxu1 %v815_v60  ;;  %v258_v5 = vmax.f32 %v252_v63, 0.0 }
 0x135   :  { %v916_v61 = vpop.f32.mrf.mxu0  ;;  %599 = vmatpush.bf16.msra.mxu3 %v5379_v12  ;;  %1052 = vmatpush.bf16.msra.mxu1 %v5222_v45 }
 0x136   :  { %580 = vmatpush.bf16.msra.mxu2 %v5374_v9  ;;  %v917_v6 = vadd.f32 %v5267_v57, %v916_v61 }
 0x138   :  { %v926_v15 = vmax.f32 %v917_v6, 0.0 }
 0x139   :  { %v253_v1 = vpop.f32.mrf.mxu1  ;;  %600 = vmatpush.bf16.msra.mxu3 %v5399_v23  ;;  %1053 = vmatpush.bf16.msra.mxu1 %v5228_v47 }
 0x13a   :  { %v254_v4 = vadd.f32 %v5532_v33, %v253_v1  ;;  %581 = vmatpush.bf16.msra.mxu2 %v5393_v20 }
 0x13c   :  { %v259_v8 = vmax.f32 %v254_v4, 0.0 }
 0x13d   :  { %v918_v10 = vpop.f32.mrf.mxu0  ;;  %601 = vmatpush.bf16.msra.mxu3 %v5418_v28  ;;  %1054 = vmatpush.bf16.msra.mxu1 %v5236_v48 }
 0x13e   :  { %v919_v13 = vadd.f32 %v5267_v57, %v918_v10  ;;  %v261_v14 = vpack.c.bf16 %v259_v8, %v258_v5  ;;  %582 = vmatpush.bf16.msra.mxu2 %v5409_v25 }
 0x140   :  { %v927_v19 = vmax.f32 %v919_v13, 0.0  ;;  %360 = vmatmul.bf16.gmra.mxu2 %v261_v14  ;;  %379 = vmatmul.bf16.gmra.mxu3 %v261_v14 }
 0x141   :  { %v447_v22 = vpop.f32.mrf.mxu1  ;;  %602 = vmatpush.bf16.msra.mxu3 %v5439_v43  ;;  %1055 = vmatpush.bf16.msra.mxu1 %v5242_v49 }
 0x142   :  { %v930_v24 = vpack.c.bf16 %v927_v19, %v926_v15  ;;  %583 = vmatpush.bf16.msra.mxu2 %v5434_v35  ;;  %v448_v26 = vadd.f32 %v5532_v33, %v447_v22 }
 0x144   :  { %940 = vmatmul.bf16.vlgmr.msrb.gmra.mxu1 %v930_v24  ;;  %v457_v30 = vmax.f32 %v448_v26, 0.0 }
 0x145   :  { %v921_v21 = vpop.f32.mrf.mxu0  ;;  %603 = vmatpush.bf16.msra.mxu3 %v5464_v58  ;;  %1164 = vmatpush.bf16.msrb.mxu1 %v5184_v36 }
 0x146   :  { %584 = vmatpush.bf16.msra.mxu2 %v5459_v54  ;;  %v922_v31 = vadd.f32 %v5267_v57, %v921_v21 }
 0x148   :  { %v928_v38 = vmax.f32 %v922_v31, 0.0 }
 0x149   :  { %v449_v27 = vpop.f32.mrf.mxu1  ;;  %604 = vmatpush.bf16.msra.mxu3 %v5484_v3  ;;  %1165 = vmatpush.bf16.msrb.mxu1 %v5197_v40 }
 0x14a   :  { %v450_v29 = vadd.f32 %v5532_v33, %v449_v27  ;;  %585 = vmatpush.bf16.msra.mxu2 %v5478_v0 }
 0x14c   :  { %v458_v32 = vmax.f32 %v450_v29, 0.0 }
 0x14d   :  { %v923_v34 = vpop.f32.mrf.mxu0  ;;  %605 = vmatpush.bf16.msra.mxu3 %v5504_v11  ;;  %1166 = vmatpush.bf16.msrb.mxu1 %v5204_v41 }
 0x14e   :  { %v924_v36 = vadd.f32 %v5267_v57, %v923_v34  ;;  %v461_v37 = vpack.c.bf16 %v458_v32, %v457_v30  ;;  %586 = vmatpush.bf16.msra.mxu2 %v5498_v7 }
 0x150   :  { %v929_v40 = vmax.f32 %v924_v36, 0.0  ;;  %471 = vmatmul.bf16.vlgmr.msrb.gmra.mxu2 %v461_v37  ;;  %490 = vmatmul.bf16.vlgmr.msrb.gmra.mxu3 %v461_v37 }
 0x151   :  { %v452_v39 = vpop.f32.mrf.mxu1  ;;  %714 = vmatpush.bf16.msrb.mxu3 %v5354_v2  ;;  %1167 = vmatpush.bf16.msrb.mxu1 %v5210_v42 }
 0x152   :  { %v931_v44 = vpack.c.bf16 %v929_v40, %v928_v38  ;;  %695 = vmatpush.bf16.msrb.mxu2 %v5349_v62  ;;  %v453_v41 = vadd.f32 %v5532_v33, %v452_v39 }
 0x154   :  { %945 = vmatmul.bf16.gmra.mxu1 %v931_v44  ;;  %v459_v51 = vmax.f32 %v453_v41, 0.0 }
 0x155   :  { %v1032_v46 = vpop.f32.mrf.mxu0  ;;  %715 = vmatpush.bf16.msrb.mxu3 %v5379_v12  ;;  %1168 = vmatpush.bf16.msrb.mxu1 %v5222_v45 }
 0x156   :  { %696 = vmatpush.bf16.msrb.mxu2 %v5374_v9  ;;  %v1033_v52 = vadd.f32 %v5267_v57, %v1032_v46 }
 0x158   :  { %v1042_v59 = vmax.f32 %v1033_v52, 0.0 }
 0x159   :  { %v454_v50 = vpop.f32.mrf.mxu1  ;;  %716 = vmatpush.bf16.msrb.mxu3 %v5399_v23  ;;  %1169 = vmatpush.bf16.msrb.mxu1 %v5228_v47 }
 0x15a   :  { %v455_v42 = vadd.f32 %v5532_v33, %v454_v50  ;;  %697 = vmatpush.bf16.msrb.mxu2 %v5393_v20 }
 0x15c   :  { %v460_v53 = vmax.f32 %v455_v42, 0.0 }
 0x15d   :  { %v1034_v55 = vpop.f32.mrf.mxu0  ;;  %717 = vmatpush.bf16.msrb.mxu3 %v5418_v28  ;;  %1170 = vmatpush.bf16.msrb.mxu1 %v5236_v48 }
 0x15e   :  { %v1035_v45 = vadd.f32 %v5267_v57, %v1034_v55  ;;  %v462_v56 = vpack.c.bf16 %v460_v53, %v459_v51  ;;  %698 = vmatpush.bf16.msrb.mxu2 %v5409_v25 }
 0x160   :  { %v1043_v47 = vmax.f32 %v1035_v45, 0.0  ;;  %476 = vmatmul.bf16.gmra.mxu2 %v462_v56  ;;  %495 = vmatmul.bf16.gmra.mxu3 %v462_v56 }
 0x161   :  { %v563_v60 = vpop.f32.mrf.mxu1  ;;  %718 = vmatpush.bf16.msrb.mxu3 %v5439_v43  ;;  %1171 = vmatpush.bf16.msrb.mxu1 %v5242_v49 }
 0x162   :  { %v1046_v61 = vpack.c.bf16 %v1043_v47, %v1042_v59  ;;  %699 = vmatpush.bf16.msrb.mxu2 %v5434_v35  ;;  %v564_v48 = vadd.f32 %v5532_v33, %v563_v60 }
 0x164   :  { %1056 = vmatmul.bf16.vlgmr.msra.gmra.mxu1 %v1046_v61  ;;  %v573_v5 = vmax.f32 %v564_v48, 0.0 }
 0x165   :  { %v1037_v63 = vpop.f32.mrf.mxu0  ;;  %719 = vmatpush.bf16.msrb.mxu3 %v5464_v58 }
 0x166   :  { %700 = vmatpush.bf16.msrb.mxu2 %v5459_v54  ;;  %v1038_v49 = vadd.f32 %v5267_v57, %v1037_v63 }
 0x168   :  { %v1044_v14 = vmax.f32 %v1038_v49, 0.0 }
 0x169   :  { %v565_v1 = vpop.f32.mrf.mxu1  ;;  %720 = vmatpush.bf16.msrb.mxu3 %v5484_v3 }
 0x16a   :  { %v566_v4 = vadd.f32 %v5532_v33, %v565_v1  ;;  %701 = vmatpush.bf16.msrb.mxu2 %v5478_v0 }
 0x16c   :  { %v574_v6 = vmax.f32 %v566_v4, 0.0 }
 0x16d   :  { %v1039_v8 = vpop.f32.mrf.mxu0  ;;  %721 = vmatpush.bf16.msrb.mxu3 %v5504_v11 }
 0x16e   :  { %v577_v10 = vpack.c.bf16 %v574_v6, %v573_v5  ;;  %v1040_v13 = vadd.f32 %v5267_v57, %v1039_v8  ;;  %702 = vmatpush.bf16.msrb.mxu2 %v5498_v7 }
 0x170   :  { %v1045_v15 = vmax.f32 %v1040_v13, 0.0  ;;  %587 = vmatmul.bf16.vlgmr.msra.gmra.mxu2 %v577_v10  ;;  %606 = vmatmul.bf16.vlgmr.msra.gmra.mxu3 %v577_v10 }
 0x171   :  { %v568_v19 = vpop.f32.mrf.mxu1  ;;  %860 = vmatpush.bf16.msra.mxu3 %v5354_v2 }
 0x172   :  { %841 = vmatpush.bf16.msra.mxu2 %v5349_v62  ;;  %v1047_v22 = vpack.c.bf16 %v1045_v15, %v1044_v14  ;;  %v569_v21 = vadd.f32 %v5532_v33, %v568_v19  ;;  %v102_v15 = vld [vmem:[%s5919_s4 + $0x2] sm:$0x3] }
 0x174   :  { %1061 = vmatmul.bf16.gmra.mxu1 %v1047_v22  ;;  %v575_v29 = vmax.f32 %v569_v21, 0.0  ;;  %v5655_v22 = vperm.slane %v102_v15, 0 }
 0x175   :  { %v1148_v24 = vpop.f32.mrf.mxu0  ;;  %861 = vmatpush.bf16.msra.mxu3 %v5379_v12 }
 0x176   :  { %842 = vmatpush.bf16.msra.mxu2 %v5374_v9  ;;  %v1149_v30 = vadd.f32 %v5267_v57, %v1148_v24 }
 0x178   :  { %v1158_v37 = vmax.f32 %v1149_v30, 0.0 }
 0x179   :  { %v570_v26 = vpop.f32.mrf.mxu1  ;;  %862 = vmatpush.bf16.msra.mxu3 %v5399_v23 }
 0x17a   :  { %843 = vmatpush.bf16.msra.mxu2 %v5393_v20  ;;  %v571_v27 = vadd.f32 %v5532_v33, %v570_v26  ;;  %v5657_v26 = vperm.slane %v102_v15, 1 }
 0x17c   :  { %v576_v31 = vmax.f32 %v571_v27, 0.0 }
 0x17d   :  { %v1150_v32 = vpop.f32.mrf.mxu0  ;;  %863 = vmatpush.bf16.msra.mxu3 %v5418_v28 }
 0x17e   :  { %844 = vmatpush.bf16.msra.mxu2 %v5409_v25  ;;  %v1151_v34 = vadd.f32 %v5267_v57, %v1150_v32  ;;  %v578_v36 = vpack.c.bf16 %v576_v31, %v575_v29 }
 0x180   :  { %v1159_v38 = vmax.f32 %v1151_v34, 0.0  ;;  %592 = vmatmul.bf16.gmra.mxu2 %v578_v36  ;;  %611 = vmatmul.bf16.gmra.mxu3 %v578_v36 }
 0x181   :  { %v679_v40 = vpop.f32.mrf.mxu1  ;;  %864 = vmatpush.bf16.msra.mxu3 %v5439_v43 }
 0x182   :  { %845 = vmatpush.bf16.msra.mxu2 %v5434_v35  ;;  %v1162_v39 = vpack.c.bf16 %v1159_v38, %v1158_v37  ;;  %v680_v46 = vadd.f32 %v5532_v33, %v679_v40 }
 0x184   :  { %1172 = vmatmul.bf16.vlgmr.msrb.gmra.mxu1 %v1162_v39  ;;  %v689_v42 = vmax.f32 %v680_v46, 0.0 }
 0x185   :  { %v1153_v44 = vpop.f32.mrf.mxu0  ;;  %865 = vmatpush.bf16.msra.mxu3 %v5464_v58 }
 0x186   :  { %846 = vmatpush.bf16.msra.mxu2 %v5459_v54  ;;  %v1154_v51 = vadd.f32 %v5267_v57, %v1153_v44 }
 0x188   :  { %v1160_v56 = vmax.f32 %v1154_v51, 0.0 }
 0x189   :  { %v681_v41 = vpop.f32.mrf.mxu1  ;;  %866 = vmatpush.bf16.msra.mxu3 %v5484_v3 }
 0x18a   :  { %847 = vmatpush.bf16.msra.mxu2 %v5478_v0  ;;  %v682_v50 = vadd.f32 %v5532_v33, %v681_v41 }
 0x18c   :  { %v690_v52 = vmax.f32 %v682_v50, 0.0 }
 0x18d   :  { %v1155_v53 = vpop.f32.mrf.mxu0  ;;  %867 = vmatpush.bf16.msra.mxu3 %v5504_v11 }
 0x18e   :  { %848 = vmatpush.bf16.msra.mxu2 %v5498_v7  ;;  %v693_v55 = vpack.c.bf16 %v690_v52, %v689_v42  ;;  %v1156_v45 = vadd.f32 %v5267_v57, %v1155_v53 }
 0x190   :  { %v1161_v59 = vmax.f32 %v1156_v45, 0.0  ;;  %703 = vmatmul.bf16.vlgmr.msrb.gmra.mxu2 %v693_v55  ;;  %722 = vmatmul.bf16.vlgmr.msrb.gmra.mxu3 %v693_v55 }
 0x191   :  { %v684_v47 = vpop.f32.mrf.mxu1  ;;  %976 = vmatpush.bf16.msrb.mxu3 %v5354_v2 }
 0x192   :  { %957 = vmatpush.bf16.msrb.mxu2 %v5349_v62  ;;  %v1163_v60 = vpack.c.bf16 %v1161_v59, %v1160_v56  ;;  %v685_v61 = vadd.f32 %v5532_v33, %v684_v47 }
 0x194   :  { %1177 = vmatmul.bf16.gmra.mxu1 %v1163_v60  ;;  %v691_v48 = vmax.f32 %v685_v61, 0.0 }
 0x195   :  { %977 = vmatpush.bf16.msrb.mxu3 %v5379_v12 }
 0x196   :  { %958 = vmatpush.bf16.msrb.mxu2 %v5374_v9 }
 0x199   :  { %v686_v63 = vpop.f32.mrf.mxu1  ;;  %978 = vmatpush.bf16.msrb.mxu3 %v5399_v23 }
 0x19a   :  { %959 = vmatpush.bf16.msrb.mxu2 %v5393_v20  ;;  %v687_v57 = vadd.f32 %v5532_v33, %v686_v63 }
 0x19c   :  { %v692_v1 = vmax.f32 %v687_v57, 0.0 }
 0x19d   :  { %979 = vmatpush.bf16.msrb.mxu3 %v5418_v28 }
 0x19e   :  { %960 = vmatpush.bf16.msrb.mxu2 %v5409_v25  ;;  %v694_v4 = vpack.c.bf16 %v692_v1, %v691_v48 }
 0x1a0   :  { %708 = vmatmul.bf16.gmra.mxu2 %v694_v4  ;;  %727 = vmatmul.bf16.gmra.mxu3 %v694_v4 }
 0x1a1   :  { %v825_v5 = vpop.f32.mrf.mxu1  ;;  %980 = vmatpush.bf16.msrb.mxu3 %v5439_v43 }
 0x1a2   :  { %961 = vmatpush.bf16.msrb.mxu2 %v5434_v35  ;;  %v826_v49 = vadd.f32 %v5532_v33, %v825_v5 }
 0x1a4   :  { %v835_v10 = vmax.f32 %v826_v49, 0.0 }
 0x1a5   :  { %981 = vmatpush.bf16.msrb.mxu3 %v5464_v58 }
 0x1a6   :  { %962 = vmatpush.bf16.msrb.mxu2 %v5459_v54 }
 0x1a9   :  { %v827_v6 = vpop.f32.mrf.mxu1  ;;  %982 = vmatpush.bf16.msrb.mxu3 %v5484_v3 }
 0x1aa   :  { %963 = vmatpush.bf16.msrb.mxu2 %v5478_v0  ;;  %v828_v8 = vadd.f32 %v5532_v33, %v827_v6 }
 0x1ac   :  { %v836_v13 = vmax.f32 %v828_v8, 0.0 }
 0x1ad   :  { %983 = vmatpush.bf16.msrb.mxu3 %v5504_v11 }
 0x1ae   :  { %964 = vmatpush.bf16.msrb.mxu2 %v5498_v7  ;;  %v839_v14 = vpack.c.bf16 %v836_v13, %v835_v10 }
 0x1b0   :  { %849 = vmatmul.bf16.vlgmr.msra.gmra.mxu2 %v839_v14  ;;  %868 = vmatmul.bf16.vlgmr.msra.gmra.mxu3 %v839_v14 }
 0x1b1   :  { %v830_v19 = vpop.f32.mrf.mxu1  ;;  %1092 = vmatpush.bf16.msra.mxu3 %v5354_v2 }
 0x1b2   :  { %1073 = vmatpush.bf16.msra.mxu2 %v5349_v62  ;;  %v831_v27 = vadd.f32 %v5532_v33, %v830_v19 }
 0x1b3   :  { %v356_v24 = vpop.f32.mrf.mxu2  ;;  %v375_v21 = vpop.f32.mrf.mxu3 }
 0x1b4   :  { %v357_v29 = vadd.f32 %v356_v24, %v5655_v22  ;;  %v376_v30 = vadd.f32 %v375_v21, %v5657_v26  ;;  %v837_v34 = vmax.f32 %v831_v27, 0.0 }
 0x1b5   :  { %1093 = vmatpush.bf16.msra.mxu3 %v5379_v12 }
 0x1b6   :  { %1074 = vmatpush.bf16.msra.mxu2 %v5374_v9  ;;  %v385_v36 = vmax.f32 %v357_v29, 0.0  ;;  %v386_v40 = vmax.f32 %v376_v30, 0.0 }
 0x1b8   :  { %v393_v51 = vmax.f32 %v385_v36, 0.0  ;;  %v394_v52 = vmax.f32 %v386_v40, 0.0 }
 0x1b9   :  { %v832_v31 = vpop.f32.mrf.mxu1  ;;  %1094 = vmatpush.bf16.msra.mxu3 %v5399_v23 }
 0x1ba   :  { %1075 = vmatpush.bf16.msra.mxu2 %v5393_v20  ;;  %v833_v32 = vadd.f32 %v5532_v33, %v832_v31 }
 0x1bb   :  { %v358_v37 = vpop.f32.mrf.mxu2  ;;  %v377_v38 = vpop.f32.mrf.mxu3 }
 0x1bc   :  { %v838_v39 = vmax.f32 %v833_v32, 0.0  ;;  %v359_v44 = vadd.f32 %v358_v37, %v5655_v22  ;;  %v378_v46 = vadd.f32 %v377_v38, %v5657_v26 }
 0x1bd   :  { %1095 = vmatpush.bf16.msra.mxu3 %v5418_v28 }
 0x1be   :  { %1076 = vmatpush.bf16.msra.mxu2 %v5409_v25  ;;  %v387_v41 = vmax.f32 %v359_v44, 0.0  ;;  %v388_v50 = vmax.f32 %v378_v46, 0.0  ;;  %v840_v42 = vpack.c.bf16 %v838_v39, %v837_v34 }
 0x1c0   :  { %v395_v53 = vmax.f32 %v387_v41, 0.0  ;;  %v396_v55 = vmax.f32 %v388_v50, 0.0  ;;  %854 = vmatmul.bf16.gmra.mxu2 %v840_v42  ;;  %873 = vmatmul.bf16.gmra.mxu3 %v840_v42 }
 0x1c1   :  { %v941_v45 = vpop.f32.mrf.mxu1  ;;  %1096 = vmatpush.bf16.msra.mxu3 %v5439_v43 }
 0x1c2   :  { %1077 = vmatpush.bf16.msra.mxu2 %v5434_v35  ;;  %v509_v56 = vmax.f32 %v393_v51, %v395_v53  ;;  %v510_v59 = vmax.f32 %v394_v52, %v396_v55  ;;  %v942_v1 = vadd.f32 %v5532_v33, %v941_v45 }
 0x1c3   :  { %v361_v47 = vpop.f32.mrf.mxu2  ;;  %v380_v60 = vpop.f32.mrf.mxu3 }
 0x1c4   :  { %v362_v61 = vadd.f32 %v361_v47, %v5655_v22  ;;  %v381_v63 = vadd.f32 %v380_v60, %v5657_v26  ;;  %v951_v15 = vmax.f32 %v942_v1, 0.0 }
 0x1c5   :  { %1097 = vmatpush.bf16.msra.mxu3 %v5464_v58 }
 0x1c6   :  { %1078 = vmatpush.bf16.msra.mxu2 %v5459_v54  ;;  %v389_v57 = vmax.f32 %v362_v61, 0.0  ;;  %v390_v48 = vmax.f32 %v381_v63, 0.0 }
 0x1c8   :  { %v397_v4 = vmax.f32 %v389_v57, 0.0  ;;  %v398_v5 = vmax.f32 %v390_v48, 0.0 }
 0x1c9   :  { %v943_v49 = vpop.f32.mrf.mxu1  ;;  %1098 = vmatpush.bf16.msra.mxu3 %v5484_v3 }
 0x1ca   :  { %1079 = vmatpush.bf16.msra.mxu2 %v5478_v0  ;;  %v511_v6 = vmax.f32 %v397_v4, %v509_v56  ;;  %v512_v8 = vmax.f32 %v398_v5, %v510_v59  ;;  %v944_v10 = vadd.f32 %v5532_v33, %v943_v49 }
 0x1cb   :  { %v363_v13 = vpop.f32.mrf.mxu2  ;;  %v382_v14 = vpop.f32.mrf.mxu3 }
 0x1cc   :  { %v952_v19 = vmax.f32 %v944_v10, 0.0  ;;  %v364_v24 = vadd.f32 %v363_v13, %v5655_v22  ;;  %v383_v21 = vadd.f32 %v382_v14, %v5657_v26 }
 0x1cd   :  { %1099 = vmatpush.bf16.msra.mxu3 %v5504_v11 }
 0x1ce   :  { %1080 = vmatpush.bf16.msra.mxu2 %v5498_v7  ;;  %v955_v27 = vpack.c.bf16 %v952_v19, %v951_v15  ;;  %v391_v29 = vmax.f32 %v364_v24, 0.0  ;;  %v392_v30 = vmax.f32 %v383_v21, 0.0 }
 0x1d0   :  { %v399_v31 = vmax.f32 %v391_v29, 0.0  ;;  %v400_v32 = vmax.f32 %v392_v30, 0.0  ;;  %965 = vmatmul.bf16.vlgmr.msrb.gmra.mxu2 %v955_v27  ;;  %984 = vmatmul.bf16.vlgmr.msrb.gmra.mxu3 %v955_v27 }
 0x1d1   :  { %v946_v34 = vpop.f32.mrf.mxu1  ;;  %1208 = vmatpush.bf16.msrb.mxu3 %v5354_v2 }
 0x1d2   :  { %1189 = vmatpush.bf16.msrb.mxu2 %v5349_v62  ;;  %v513_v36 = vmax.f32 %v399_v31, %v511_v6  ;;  %v514_v37 = vmax.f32 %v400_v32, %v512_v8  ;;  %v947_v50 = vadd.f32 %v5532_v33, %v946_v34 }
 0x1d3   :  { %v472_v38 = vpop.f32.mrf.mxu2  ;;  %v491_v40 = vpop.f32.mrf.mxu3 }
 0x1d4   :  { %v473_v39 = vadd.f32 %v472_v38, %v5655_v22  ;;  %v492_v44 = vadd.f32 %v491_v40, %v5657_v26 }
 0x1d5   :  { %1209 = vmatpush.bf16.msrb.mxu3 %v5379_v12  ;;  %v953_v12 = vmax.f32 %v947_v50, 0.0 }
 0x1d6   :  { %1190 = vmatpush.bf16.msrb.mxu2 %v5374_v9  ;;  %v501_v46 = vmax.f32 %v473_v39, 0.0  ;;  %v502_v41 = vmax.f32 %v492_v44, 0.0 }
 0x1d8   :  { %v5692_v42 = vmax.f32 %v501_v46, %v513_v36  ;;  %v5694_v2 = vmax.f32 %v502_v41, %v514_v37 }
 0x1d9   :  { %v948_v62 = vpop.f32.mrf.mxu1  ;;  %1210 = vmatpush.bf16.msrb.mxu3 %v5399_v23 }
 0x1da   :  { %1191 = vmatpush.bf16.msrb.mxu2 %v5393_v20  ;;  %v949_v51 = vadd.f32 %v5532_v33, %v948_v62 }
 0x1db   :  { %v474_v52 = vpop.f32.mrf.mxu2  ;;  %v493_v53 = vpop.f32.mrf.mxu3 }
 0x1dc   :  { %v954_v55 = vmax.f32 %v949_v51, 0.0  ;;  %v475_v21 = vadd.f32 %v474_v52, %v5655_v22  ;;  %v494_v29 = vadd.f32 %v493_v53, %v5657_v26 }
 0x1dd   :  { %1211 = vmatpush.bf16.msrb.mxu3 %v5418_v28 }
 0x1de   :  { %1192 = vmatpush.bf16.msrb.mxu2 %v5409_v25  ;;  %v956_v9 = vpack.c.bf16 %v954_v55, %v953_v12  ;;  %v503_v34 = vmax.f32 %v475_v21, 0.0  ;;  %v504_v37 = vmax.f32 %v494_v29, 0.0 }
 0x1e0   :  { %970 = vmatmul.bf16.gmra.mxu2 %v956_v9  ;;  %989 = vmatmul.bf16.gmra.mxu3 %v956_v9  ;;  %v625_v44 = vmax.f32 %v503_v34, %v5692_v42  ;;  %v626_v52 = vmax.f32 %v504_v37, %v5694_v2 }
 0x1e1   :  { %v1057_v45 = vpop.f32.mrf.mxu1  ;;  %1212 = vmatpush.bf16.msrb.mxu3 %v5439_v43 }
 0x1e2   :  { %1193 = vmatpush.bf16.msrb.mxu2 %v5434_v35  ;;  %v1058_v56 = vadd.f32 %v5532_v33, %v1057_v45 }
 0x1e3   :  { %v477_v23 = vpop.f32.mrf.mxu2  ;;  %v496_v20 = vpop.f32.mrf.mxu3 }
 0x1e4   :  { %v1067_v43 = vmax.f32 %v1058_v56, 0.0  ;;  %v478_v30 = vadd.f32 %v477_v23, %v5655_v22  ;;  %v497_v36 = vadd.f32 %v496_v20, %v5657_v26 }
 0x1e5   :  { %1213 = vmatpush.bf16.msrb.mxu3 %v5464_v58 }
 0x1e6   :  { %1194 = vmatpush.bf16.msrb.mxu2 %v5459_v54  ;;  %v505_v38 = vmax.f32 %v478_v30, 0.0  ;;  %v506_v46 = vmax.f32 %v497_v36, 0.0 }
 0x1e8   :  { %v627_v53 = vmax.f32 %v505_v38, %v625_v44  ;;  %v628_v56 = vmax.f32 %v506_v46, %v626_v52 }
 0x1e9   :  { %v1059_v59 = vpop.f32.mrf.mxu1  ;;  %1214 = vmatpush.bf16.msrb.mxu3 %v5484_v3 }
 0x1ea   :  { %1195 = vmatpush.bf16.msrb.mxu2 %v5478_v0  ;;  %v1060_v25 = vadd.f32 %v5532_v33, %v1059_v59 }
 0x1eb   :  { %v479_v28 = vpop.f32.mrf.mxu2  ;;  %v498_v47 = vpop.f32.mrf.mxu3 }
 0x1ec   :  { %v1068_v60 = vmax.f32 %v1060_v25, 0.0  ;;  %v480_v40 = vadd.f32 %v479_v28, %v5655_v22  ;;  %v499_v39 = vadd.f32 %v498_v47, %v5657_v26 }
 0x1ed   :  { %1215 = vmatpush.bf16.msrb.mxu3 %v5504_v11 }
 0x1ee   :  { %1196 = vmatpush.bf16.msrb.mxu2 %v5498_v7  ;;  %v1071_v35 = vpack.c.bf16 %v1068_v60, %v1067_v43  ;;  %v507_v55 = vmax.f32 %v480_v40, 0.0  ;;  %v508_v9 = vmax.f32 %v499_v39, 0.0  ;;  %v5022_v60 = vmov 0.0  }
 0x1ef   :  { %139 = vst [vmem:[#allocation5] sm:$0xff] %v5022_v60 }
 0x1f0   :  { %1081 = vmatmul.bf16.vlgmr.msra.gmra.mxu2 %v1071_v35  ;;  %1100 = vmatmul.bf16.vlgmr.msra.gmra.mxu3 %v1071_v35  ;;  %140 = vst [vmem:[#allocation5 + $0x8] sm:$0xff] %v5022_v60  ;;  %v629_v35 = vmax.f32 %v507_v55, %v627_v53 }
 0x1f1   :  { %v1062_v54 = vpop.f32.mrf.mxu1 }
 0x1f2   :  { %v1063_v3 = vadd.f32 %v5532_v33, %v1062_v54  ;;  %v630_v54 = vmax.f32 %v508_v9, %v628_v56 }
 0x1f3   :  { %v588_v58 = vpop.f32.mrf.mxu2  ;;  %v607_v61 = vpop.f32.mrf.mxu3 }
 0x1f4   :  { %v1069_v1 = vmax.f32 %v1063_v3, 0.0  ;;  %v589_v50 = vadd.f32 %v588_v58, %v5655_v22  ;;  %v608_v62 = vadd.f32 %v607_v61, %v5657_v26 }
 0x1f6   :  { %v617_v28 = vmax.f32 %v589_v50, 0.0  ;;  %v618_v47 = vmax.f32 %v608_v62, 0.0 }
 0x1f9   :  { %v1064_v63 = vpop.f32.mrf.mxu1 }
 0x1fa   :  { %v1065_v0 = vadd.f32 %v5532_v33, %v1064_v63 }
 0x1fb   :  { %v590_v57 = vpop.f32.mrf.mxu2  ;;  %v609_v48 = vpop.f32.mrf.mxu3 }
 0x1fc   :  { %v1070_v4 = vmax.f32 %v1065_v0, 0.0  ;;  %v591_v45 = vadd.f32 %v590_v57, %v5655_v22  ;;  %v610_v23 = vadd.f32 %v609_v48, %v5657_v26  ;;  %v631_v0 = vmax.f32 %v617_v28, %v629_v35 }
 0x1fd   :  { %v632_v57 = vmax.f32 %v618_v47, %v630_v54 }
 0x1fe   :  { %v1072_v5 = vpack.c.bf16 %v1070_v4, %v1069_v1  ;;  %v619_v58 = vmax.f32 %v591_v45, 0.0  ;;  %v620_v61 = vmax.f32 %v610_v23, 0.0 }
 0x200   :  { %1086 = vmatmul.bf16.gmra.mxu2 %v1072_v5  ;;  %1105 = vmatmul.bf16.gmra.mxu3 %v1072_v5 }
 0x201   :  { %v1173_v11 = vpop.f32.mrf.mxu1 }
 0x202   :  { %v1174_v6 = vadd.f32 %v5532_v33, %v1173_v11  ;;  %v741_v11 = vmax.f32 %v619_v58, %v631_v0 }
 0x203   :  { %v593_v7 = vpop.f32.mrf.mxu2  ;;  %v612_v49 = vpop.f32.mrf.mxu3 }
 0x204   :  { %v1183_v15 = vmax.f32 %v1174_v6, 0.0  ;;  %v594_v43 = vadd.f32 %v593_v7, %v5655_v22  ;;  %v613_v2 = vadd.f32 %v612_v49, %v5657_v26  ;;  %v742_v7 = vmax.f32 %v620_v61, %v632_v57 }
 0x206   :  { %v621_v48 = vmax.f32 %v594_v43, 0.0  ;;  %v622_v1 = vmax.f32 %v613_v2, 0.0 }
 0x209   :  { %v1175_v8 = vpop.f32.mrf.mxu1 }
 0x20a   :  { %v1176_v10 = vadd.f32 %v5532_v33, %v1175_v8 }
 0x20b   :  { %v595_v13 = vpop.f32.mrf.mxu2  ;;  %v614_v14 = vpop.f32.mrf.mxu3 }
 0x20c   :  { %v1184_v19 = vmax.f32 %v1176_v10, 0.0  ;;  %v596_v3 = vadd.f32 %v595_v13, %v5655_v22  ;;  %v615_v63 = vadd.f32 %v614_v14, %v5657_v26 }
 0x20e   :  { %v1187_v24 = vpack.c.bf16 %v1184_v19, %v1183_v15  ;;  %v623_v8 = vmax.f32 %v596_v3, 0.0  ;;  %v624_v10 = vmax.f32 %v615_v63, 0.0  ;;  %v743_v15 = vmax.f32 %v621_v48, %v741_v11 }
 0x20f   :  { %v744_v19 = vmax.f32 %v622_v1, %v742_v7 }
 0x210   :  { %1197 = vmatmul.bf16.vlgmr.msrb.gmra.mxu2 %v1187_v24  ;;  %1216 = vmatmul.bf16.vlgmr.msrb.gmra.mxu3 %v1187_v24  ;;  %v745_v30 = vmax.f32 %v623_v8, %v743_v15 }
 0x211   :  { %v1178_v27 = vpop.f32.mrf.mxu1 }
 0x212   :  { %v1179_v41 = vadd.f32 %v5532_v33, %v1178_v27 }
 0x213   :  { %v704_v31 = vpop.f32.mrf.mxu2  ;;  %v723_v32 = vpop.f32.mrf.mxu3 }
 0x214   :  { %v1185_v59 = vmax.f32 %v1179_v41, 0.0  ;;  %v705_v4 = vadd.f32 %v704_v31, %v5655_v22  ;;  %v724_v5 = vadd.f32 %v723_v32, %v5657_v26  ;;  %v746_v31 = vmax.f32 %v624_v10, %v744_v19 }
 0x216   :  { %v733_v24 = vmax.f32 %v705_v4, 0.0  ;;  %v734_v21 = vmax.f32 %v724_v5, 0.0 }
 0x218   :  { %v749_v36 = vmax.f32 %v733_v24, %v745_v30  ;;  %v758_v37 = vmax.f32 %v734_v21, %v746_v31 }
 0x219   :  { %v1180_v51 = vpop.f32.mrf.mxu1 }
 0x21a   :  { %v1181_v12 = vadd.f32 %v5532_v33, %v1180_v51 }
 0x21b   :  { %v706_v42 = vpop.f32.mrf.mxu2  ;;  %v725_v20 = vpop.f32.mrf.mxu3 }
 0x21c   :  { %v1186_v25 = vmax.f32 %v1181_v12, 0.0  ;;  %v707_v13 = vadd.f32 %v706_v42, %v5655_v22  ;;  %v726_v14 = vadd.f32 %v725_v20, %v5657_v26 }
 0x21e   :  { %v1188_v33 = vpack.c.bf16 %v1186_v25, %v1185_v59  ;;  %v735_v32 = vmax.f32 %v707_v13, 0.0  ;;  %v736_v34 = vmax.f32 %v726_v14, 0.0 }
 0x220   :  { %1202 = vmatmul.bf16.gmra.mxu2 %v1188_v33  ;;  %1221 = vmatmul.bf16.gmra.mxu3 %v1188_v33  ;;  %v747_v46 = vmax.f32 %v735_v32, %v749_v36  ;;  %v748_v41 = vmax.f32 %v736_v34, %v758_v37  ;;  %v773_v33 = vlaneseq }
 0x222   :  { %vm5741_vm3 = vcmp.lt.s32.totalorder %v773_v33, 256 }
 0x223   :  { %v709_v49 = vpop.f32.mrf.mxu2  ;;  %v728_v6 = vpop.f32.mrf.mxu3 }
 0x224   :  { %v710_v27 = vadd.f32 %v709_v49, %v5655_v22  ;;  %v729_v29 = vadd.f32 %v728_v6, %v5657_v26 }
 0x226   :  { %v737_v38 = vmax.f32 %v710_v27, 0.0  ;;  %v738_v40 = vmax.f32 %v729_v29, 0.0 }
 0x228   :  { %v750_v51 = vmax.f32 %v737_v38, %v747_v46  ;;  %v759_v52 = vmax.f32 %v738_v40, %v748_v41 }
 0x22b   :  { %v711_v39 = vpop.f32.mrf.mxu2  ;;  %v730_v44 = vpop.f32.mrf.mxu3 }
 0x22c   :  { %v712_v50 = vadd.f32 %v711_v39, %v5655_v22  ;;  %v731_v62 = vadd.f32 %v730_v44, %v5657_v26 }
 0x22e   :  { %v739_v53 = vmax.f32 %v712_v50, 0.0  ;;  %v740_v12 = vmax.f32 %v731_v62, 0.0 }
 0x230   :  { %v751_v55 = vmax.f32 %v739_v53, %v750_v51  ;;  %v760_v9 = vmax.f32 %v740_v12, %v759_v52 }
 0x232   :  { %v752_v45 = vrot.slane %v751_v55, 4  ;;  %v761_v23 = vrot.slane %v760_v9, 4 }
 0x233   :  { %v850_v42 = vpop.f32.mrf.mxu2  ;;  %v869_v20 = vpop.f32.mrf.mxu3 }
 0x234   :  { %v753_v56 = vmax.f32 %v751_v55, %v752_v45  ;;  %v762_v59 = vmax.f32 %v760_v9, %v761_v23  ;;  %v851_v5 = vadd.f32 %v850_v42, %v5655_v22  ;;  %v870_v11 = vadd.f32 %v869_v20, %v5657_v26 }
 0x236   :  { %v754_v25 = vrot.slane %v753_v56, 2  ;;  %v763_v28 = vrot.slane %v762_v59, 2  ;;  %v879_v7 = vmax.f32 %v851_v5, 0.0  ;;  %v880_v49 = vmax.f32 %v870_v11, 0.0 }
 0x238   :  { %v755_v47 = vmax.f32 %v753_v56, %v754_v25  ;;  %v764_v43 = vmax.f32 %v762_v59, %v763_v28  ;;  %v887_v19 = vmax.f32 %v879_v7, 0.0  ;;  %v888_v24 = vmax.f32 %v880_v49, 0.0 }
 0x23a   :  { %v756_v2 = vrot.slane %v755_v47, 1  ;;  %v765_v60 = vrot.slane %v764_v43, 1 }
 0x23b   :  { %v852_v35 = vpop.f32.mrf.mxu2  ;;  %v871_v54 = vpop.f32.mrf.mxu3 }
 0x23c   :  { %v766_v58 = vmax.f32 %v764_v43, %v765_v60  ;;  %v757_v61 = vmax.f32 %v755_v47, %v756_v2  ;;  %v853_v14 = vadd.f32 %v852_v35, %v5655_v22  ;;  %v872_v15 = vadd.f32 %v871_v54, %v5657_v26 }
 0x23e   :  { %v769_v3 = vrot.slane %v766_v58, 7  ;;  %v881_v31 = vmax.f32 %v853_v14, 0.0  ;;  %v882_v32 = vmax.f32 %v872_v15, 0.0 }
 0x240   :  { %v771_v0 = vsel %vm770_vm2, %v757_v61, %v769_v3  ;;  %v889_v40 = vmax.f32 %v881_v31, 0.0  ;;  %v890_v39 = vmax.f32 %v882_v32, 0.0 }
 0x241   :  { %777 = vst.msk [vmem:[#allocation5] ss:$8 sm:$0x3] %vm5741_vm3, %v771_v0 }
 0x243   :  { %v855_v57 = vpop.f32.mrf.mxu2  ;;  %v874_v48 = vpop.f32.mrf.mxu3 }
 0x244   :  { %v856_v44 = vadd.f32 %v855_v57, %v5655_v22  ;;  %v875_v46 = vadd.f32 %v874_v48, %v5657_v26 }
 0x246   :  { %v883_v52 = vmax.f32 %v856_v44, 0.0  ;;  %v884_v53 = vmax.f32 %v875_v46, 0.0 }
 0x248   :  { %v891_v23 = vmax.f32 %v883_v52, 0.0  ;;  %v892_v42 = vmax.f32 %v884_v53, 0.0 }
 0x24b   :  { %v857_v1 = vpop.f32.mrf.mxu2  ;;  %v876_v4 = vpop.f32.mrf.mxu3 }
 0x253   :  { %v966_v6 = vpop.f32.mrf.mxu2  ;;  %v985_v8 = vpop.f32.mrf.mxu3 }
 0x254   :  { %v967_v10 = vadd.f32 %v966_v6, %v5655_v22  ;;  %v986_v13 = vadd.f32 %v985_v8, %v5657_v26  ;;  %v858_v6 = vadd.f32 %v857_v1, %v5655_v22  ;;  %v877_v8 = vadd.f32 %v876_v4, %v5657_v26 }
 0x256   :  { %v995_v21 = vmax.f32 %v967_v10, 0.0  ;;  %v996_v27 = vmax.f32 %v986_v13, 0.0 }
 0x258   :  { %v1003_v29 = vmax.f32 %v887_v19, %v995_v21  ;;  %v1004_v30 = vmax.f32 %v888_v24, %v996_v27  ;;  %v885_v21 = vmax.f32 %v858_v6, 0.0  ;;  %v886_v27 = vmax.f32 %v877_v8, 0.0 }
 0x25b   :  { %v968_v34 = vpop.f32.mrf.mxu2  ;;  %v987_v36 = vpop.f32.mrf.mxu3 }
 0x25c   :  { %v969_v37 = vadd.f32 %v968_v34, %v5655_v22  ;;  %v988_v38 = vadd.f32 %v987_v36, %v5657_v26 }
 0x25e   :  { %v997_v41 = vmax.f32 %v969_v37, 0.0  ;;  %v998_v50 = vmax.f32 %v988_v38, 0.0 }
 0x260   :  { %v5758_v62 = vmax.f32 %v889_v40, %v997_v41  ;;  %v5760_v51 = vmax.f32 %v890_v39, %v998_v50 }
 0x263   :  { %v971_v12 = vpop.f32.mrf.mxu2  ;;  %v990_v55 = vpop.f32.mrf.mxu3 }
 0x264   :  { %v972_v9 = vadd.f32 %v971_v12, %v5655_v22  ;;  %v991_v45 = vadd.f32 %v990_v55, %v5657_v26 }
 0x266   :  { %v999_v20 = vmax.f32 %v972_v9, 0.0  ;;  %v1000_v56 = vmax.f32 %v991_v45, 0.0 }
 0x268   :  { %v1007_v59 = vmax.f32 %v891_v23, %v999_v20  ;;  %v1008_v25 = vmax.f32 %v892_v42, %v1000_v56 }
 0x26b   :  { %v973_v28 = vpop.f32.mrf.mxu2  ;;  %v992_v47 = vpop.f32.mrf.mxu3 }
 0x26c   :  { %v974_v31 = vadd.f32 %v973_v28, %v5655_v22  ;;  %v993_v32 = vadd.f32 %v992_v47, %v5657_v26  ;;  %v893_v28 = vmax.f32 %v885_v21, 0.0  ;;  %v894_v47 = vmax.f32 %v886_v27, 0.0 }
 0x26e   :  { %v1001_v9 = vmax.f32 %v974_v31, 0.0  ;;  %v1002_v45 = vmax.f32 %v993_v32, 0.0 }
 0x273   :  { %v1082_v43 = vpop.f32.mrf.mxu2  ;;  %v1101_v2 = vpop.f32.mrf.mxu3 }
 0x274   :  { %v1083_v5 = vadd.f32 %v1082_v43, %v5655_v22  ;;  %v1102_v11 = vadd.f32 %v1101_v2, %v5657_v26 }
 0x276   :  { %v1111_v14 = vmax.f32 %v1083_v5, 0.0  ;;  %v1112_v15 = vmax.f32 %v1102_v11, 0.0 }
 0x278   :  { %v1119_v38 = vmax.f32 %v1003_v29, %v1111_v14  ;;  %v1120_v4 = vmax.f32 %v1004_v30, %v1112_v15 }
 0x27b   :  { %v1084_v60 = vpop.f32.mrf.mxu2  ;;  %v1103_v33 = vpop.f32.mrf.mxu3 }
 0x27c   :  { %v1085_v44 = vadd.f32 %v1084_v60, %v5655_v22  ;;  %v1104_v46 = vadd.f32 %v1103_v33, %v5657_v26 }
 0x283   :  { %v1087_v35 = vpop.f32.mrf.mxu2  ;;  %v1106_v54 = vpop.f32.mrf.mxu3 }
 0x284   :  { %v1088_v7 = vadd.f32 %v1087_v35, %v5655_v22  ;;  %v1107_v49 = vadd.f32 %v1106_v54, %v5657_v26  ;;  %v1009_v35 = vmax.f32 %v893_v28, %v1001_v9  ;;  %v1010_v54 = vmax.f32 %v894_v47, %v1002_v45 }
 0x286   :  { %v1115_v19 = vmax.f32 %v1088_v7, 0.0  ;;  %v1116_v24 = vmax.f32 %v1107_v49, 0.0 }
 0x288   :  { %v1123_v41 = vmax.f32 %v1007_v59, %v1115_v19  ;;  %v1124_v50 = vmax.f32 %v1008_v25, %v1116_v24  ;;  %v1113_v59 = vmax.f32 %v1085_v44, 0.0  ;;  %v1114_v25 = vmax.f32 %v1104_v46, 0.0 }
 0x28a   :  { %v1121_v5 = vmax.f32 %v5758_v62, %v1113_v59  ;;  %v1122_v11 = vmax.f32 %v5760_v51, %v1114_v25 }
 0x28b   :  { %v1089_v58 = vpop.f32.mrf.mxu2  ;;  %v1108_v61 = vpop.f32.mrf.mxu3 }
 0x28c   :  { %v1090_v52 = vadd.f32 %v1089_v58, %v5655_v22  ;;  %v1109_v53 = vadd.f32 %v1108_v61, %v5657_v26 }
 0x28e   :  { %v1117_v43 = vmax.f32 %v1090_v52, 0.0  ;;  %v1118_v2 = vmax.f32 %v1109_v53, 0.0 }
 0x290   :  { %v1125_v7 = vmax.f32 %v1009_v35, %v1117_v43  ;;  %v1126_v49 = vmax.f32 %v1010_v54, %v1118_v2 }
 0x293   :  { %v1198_v3 = vpop.f32.mrf.mxu2  ;;  %v1217_v0 = vpop.f32.mrf.mxu3 }
 0x294   :  { %v1199_v10 = vadd.f32 %v1198_v3, %v5655_v22  ;;  %v1218_v13 = vadd.f32 %v1217_v0, %v5657_v26 }
 0x296   :  { %v1227_v34 = vmax.f32 %v1199_v10, 0.0  ;;  %v1228_v36 = vmax.f32 %v1218_v13, 0.0 }
 0x298   :  { %v1235_v29 = vmax.f32 %v1119_v38, %v1227_v34  ;;  %v1236_v30 = vmax.f32 %v1120_v4, %v1228_v36 }
 0x29b   :  { %v1200_v57 = vpop.f32.mrf.mxu2  ;;  %v1219_v48 = vpop.f32.mrf.mxu3 }
 0x29c   :  { %v1201_v23 = vadd.f32 %v1200_v57, %v5655_v22  ;;  %v1220_v42 = vadd.f32 %v1219_v48, %v5657_v26 }
 0x29e   :  { %v1229_v3 = vmax.f32 %v1201_v23, 0.0  ;;  %v1230_v0 = vmax.f32 %v1220_v42, 0.0 }
 0x2a0   :  { %v1237_v10 = vmax.f32 %v1121_v5, %v1229_v3  ;;  %v1238_v13 = vmax.f32 %v1122_v11, %v1230_v0 }
 0x2a3   :  { %v1203_v37 = vpop.f32.mrf.mxu2  ;;  %v1222_v1 = vpop.f32.mrf.mxu3 }
 0x2a4   :  { %v1204_v40 = vadd.f32 %v1203_v37, %v5655_v22  ;;  %v1223_v39 = vadd.f32 %v1222_v1, %v5657_v26 }
 0x2a6   :  { %v1231_v12 = vmax.f32 %v1204_v40, 0.0  ;;  %v1232_v55 = vmax.f32 %v1223_v39, 0.0 }
 0x2a8   :  { %v1239_v20 = vmax.f32 %v1123_v41, %v1231_v12  ;;  %v1240_v56 = vmax.f32 %v1124_v50, %v1232_v55 }
 0x2aa   :  { %v1243_v60 = vmax.f32 %v1235_v29, %v1239_v20  ;;  %v1252_v33 = vmax.f32 %v1236_v30, %v1240_v56 }
 0x2ab   :  { %v1205_v58 = vpop.f32.mrf.mxu2  ;;  %v1224_v61 = vpop.f32.mrf.mxu3 }
 0x2ac   :  { %v1206_v57 = vadd.f32 %v1205_v58, %v5655_v22  ;;  %v1225_v48 = vadd.f32 %v1224_v61, %v5657_v26 }
 0x2ae   :  { %v1233_v6 = vmax.f32 %v1206_v57, 0.0  ;;  %v1234_v8 = vmax.f32 %v1225_v48, 0.0 }
 0x2b0   :  { %v1241_v14 = vmax.f32 %v1125_v7, %v1233_v6  ;;  %v1242_v15 = vmax.f32 %v1126_v49, %v1234_v8 }
 0x2b2   :  { %v1244_v19 = vmax.f32 %v1237_v10, %v1241_v14  ;;  %v1253_v24 = vmax.f32 %v1238_v13, %v1242_v15 }
 0x2b4   :  { %v1245_v21 = vmax.f32 %v1243_v60, %v1244_v19  ;;  %v1254_v27 = vmax.f32 %v1252_v33, %v1253_v24 }
 0x2b6   :  { %v1246_v31 = vrot.slane %v1245_v21, 4  ;;  %v1255_v22 = vrot.slane %v1254_v27, 4 }
 0x2b8   :  { %v1247_v32 = vmax.f32 %v1245_v21, %v1246_v31  ;;  %v1256_v26 = vmax.f32 %v1254_v27, %v1255_v22 }
 0x2ba   :  { %v1248_v34 = vrot.slane %v1247_v32, 2  ;;  %v1257_v62 = vrot.slane %v1256_v26, 2 }
 0x2bc   :  { %v1249_v36 = vmax.f32 %v1247_v32, %v1248_v34  ;;  %v1258_v51 = vmax.f32 %v1256_v26, %v1257_v62 }
 0x2be   :  { %v1250_v37 = vrot.slane %v1249_v36, 1  ;;  %v1259_v1 = vrot.slane %v1258_v51, 1 }
 0x2c0   :  { %v1260_v38 = vmax.f32 %v1258_v51, %v1259_v1  ;;  %v1251_v4 = vmax.f32 %v1249_v36, %v1250_v37 }
 0x2c2   :  { %v1263_v40 = vrot.slane %v1260_v38, 7 }
 0x2c4   :  { %v1264_v39 = vsel %vm770_vm2, %v1251_v4, %v1263_v40 }
 0x2c5   :  { %1267 = vst.msk [vmem:[#allocation5 + $0x1] ss:$8 sm:$0x3] %vm5741_vm3, %v1264_v39 }
 0x2cc   :  { %v5789_v44 = vld [vmem:[#allocation5] sm:$0xff]  ;;  %v5791_v46 = vld [vmem:[#allocation5 + $0x8] sm:$0xff] }
 0x2cd   :  { %5014 = dma.done.wait [#allocation6], 16384 }
 0x2ce   :  { %5015 = vsyncadd [#allocation6], 4294950912  ;;  %v3800_v41 = vld [vmem:[#allocation2 + $0x1c0] sm:$0xf]  ;;  %v4745_v55 = vld [vmem:[#allocation2 + $0x1c4] sm:$0xf] }
 0x2cf   :  { %v4749_v50 = vld [vmem:[#allocation2 + $0x1dc] sm:$0xf0]  ;;  %v3802_v9 = vld [vmem:[#allocation2 + $0x1e0] sm:$0xf0] }
 0x2d0   :  { %v4056_v52 = vld [vmem:[#allocation2 + $0x3c0] sm:$0xf]  ;;  %v3801_v53 = vor.u32 %v4749_v50, %v3800_v41  ;;  %v3805_v29 = vor.u32 %v4745_v55, %v3802_v9  ;;  %v4809_v30 = vld [vmem:[#allocation2 + $0x3c4] sm:$0xf] }
 0x2d1   :  { %v4813_v12 = vld [vmem:[#allocation2 + $0x3dc] sm:$0xf0]  ;;  %v4058_v23 = vld [vmem:[#allocation2 + $0x3e0] sm:$0xf0] }
 0x2d2   :  { %v4057_v45 = vor.u32 %v4813_v12, %v4056_v52  ;;  %v3768_v42 = vld [vmem:[#allocation2 + $0x180] sm:$0xf]  ;;  %2062 = vmatpush.bf16.msra.mxu0 %v3801_v53  ;;  %v4061_v63 = vor.u32 %v4809_v30, %v4058_v23  ;;  %2088 = vmatpush.bf16.msra.mxu2 %v3805_v29  ;;  %v4737_v25 = vld [vmem:[#allocation2 + $0x184] sm:$0xf] }
 0x2d3   :  { %v4741_v20 = vld [vmem:[#allocation2 + $0x19c] sm:$0xf0]  ;;  %v3770_v43 = vld [vmem:[#allocation2 + $0x1a0] sm:$0xf0] }
 0x2d4   :  { %v4024_v56 = vld [vmem:[#allocation2 + $0x380] sm:$0xf]  ;;  %2075 = vmatpush.bf16.msra.mxu1 %v4057_v45  ;;  %v3769_v47 = vor.u32 %v4741_v20, %v3768_v42  ;;  %v4801_v2 = vld [vmem:[#allocation2 + $0x384] sm:$0xf]  ;;  %2101 = vmatpush.bf16.msra.mxu3 %v4061_v63  ;;  %v3773_v60 = vor.u32 %v4737_v25, %v3770_v43 }
 0x2d5   :  { %v4805_v28 = vld [vmem:[#allocation2 + $0x39c] sm:$0xf0]  ;;  %v4026_v33 = vld [vmem:[#allocation2 + $0x3a0] sm:$0xf0] }
 0x2d6   :  { %v4025_v59 = vor.u32 %v4805_v28, %v4024_v56  ;;  %v3736_v35 = vld [vmem:[#allocation2 + $0x140] sm:$0xf]  ;;  %v4029_v58 = vor.u32 %v4801_v2, %v4026_v33  ;;  %v4729_v0 = vld [vmem:[#allocation2 + $0x144] sm:$0xf]  ;;  %2063 = vmatpush.bf16.msra.mxu0 %v3769_v47  ;;  %2089 = vmatpush.bf16.msra.mxu2 %v3773_v60 }
 0x2d7   :  { %v4733_v54 = vld [vmem:[#allocation2 + $0x15c] sm:$0xf0]  ;;  %v3738_v48 = vld [vmem:[#allocation2 + $0x160] sm:$0xf0] }
 0x2d8   :  { %v3992_v61 = vld [vmem:[#allocation2 + $0x340] sm:$0xf]  ;;  %v3737_v57 = vor.u32 %v4733_v54, %v3736_v35  ;;  %v4793_v5 = vld [vmem:[#allocation2 + $0x344] sm:$0xf]  ;;  %2076 = vmatpush.bf16.msra.mxu1 %v4025_v59  ;;  %v3741_v49 = vor.u32 %v4729_v0, %v3738_v48  ;;  %2102 = vmatpush.bf16.msra.mxu3 %v4029_v58 }
 0x2d9   :  { %v4797_v3 = vld [vmem:[#allocation2 + $0x35c] sm:$0xf0]  ;;  %v3994_v11 = vld [vmem:[#allocation2 + $0x360] sm:$0xf0] }
 0x2da   :  { %v3993_v7 = vor.u32 %v4797_v3, %v3992_v61  ;;  %v3704_v6 = vld [vmem:[#allocation2 + $0x100] sm:$0xf]  ;;  %v3997_v13 = vor.u32 %v4793_v5, %v3994_v11  ;;  %v4721_v15 = vld [vmem:[#allocation2 + $0x104] sm:$0xf]  ;;  %2064 = vmatpush.bf16.msra.mxu0 %v3737_v57  ;;  %2090 = vmatpush.bf16.msra.mxu2 %v3741_v49  ;;  %v4750_v49 = vld [vmem:[#allocation2 + $0x1e4] sm:$0xf0] }
 0x2db   :  { %v4725_v8 = vld [vmem:[#allocation2 + $0x11c] sm:$0xf0]  ;;  %v3706_v19 = vld [vmem:[#allocation2 + $0x120] sm:$0xf0] }
 0x2dc   :  { %v3960_v10 = vld [vmem:[#allocation2 + $0x300] sm:$0xf]  ;;  %v4785_v24 = vld [vmem:[#allocation2 + $0x304] sm:$0xf]  ;;  %v3705_v27 = vor.u32 %v4725_v8, %v3704_v6  ;;  %2077 = vmatpush.bf16.msra.mxu1 %v3993_v7  ;;  %v3709_v22 = vor.u32 %v4721_v15, %v3706_v19  ;;  %2103 = vmatpush.bf16.msra.mxu3 %v3997_v13  ;;  %v3808_v7 = vld [vmem:[#allocation2 + $0x1c8] sm:$0xf] }
 0x2dd   :  { %v4789_v14 = vld [vmem:[#allocation2 + $0x31c] sm:$0xf0]  ;;  %v3962_v21 = vld [vmem:[#allocation2 + $0x320] sm:$0xf0]  ;;  %v4064_v6 = vld [vmem:[#allocation2 + $0x3c8] sm:$0xf] }
 0x2de   :  { %v3961_v31 = vor.u32 %v4789_v14, %v3960_v10  ;;  %v3672_v32 = vld [vmem:[#allocation2 + $0xc0] sm:$0xf]  ;;  %v3965_v62 = vor.u32 %v4785_v24, %v3962_v21  ;;  %v4713_v51 = vld [vmem:[#allocation2 + $0xc4] sm:$0xf]  ;;  %2065 = vmatpush.bf16.msra.mxu0 %v3705_v27  ;;  %2091 = vmatpush.bf16.msra.mxu2 %v3709_v22  ;;  %v4814_v10 = vld [vmem:[#allocation2 + $0x3e4] sm:$0xf0] }
 0x2df   :  { %v4717_v26 = vld [vmem:[#allocation2 + $0xdc] sm:$0xf0]  ;;  %v3674_v37 = vld [vmem:[#allocation2 + $0xe0] sm:$0xf0]  ;;  %v4746_v13 = vld [vmem:[#allocation2 + $0x1cc] sm:$0xf]  ;;  %v4065_v22 = vor.u32 %v4814_v10, %v4064_v6 }
 0x2e0   :  { %v3928_v34 = vld [vmem:[#allocation2 + $0x2c0] sm:$0xf]  ;;  %v4777_v1 = vld [vmem:[#allocation2 + $0x2c4] sm:$0xf]  ;;  %v3673_v4 = vor.u32 %v4717_v26, %v3672_v32  ;;  %2078 = vmatpush.bf16.msra.mxu1 %v3961_v31  ;;  %v3677_v39 = vor.u32 %v4713_v51, %v3674_v37  ;;  %2104 = vmatpush.bf16.msra.mxu3 %v3965_v62  ;;  %v3810_v14 = vld [vmem:[#allocation2 + $0x1e8] sm:$0xf0]  ;;  %v3809_v31 = vor.u32 %v4750_v49, %v3808_v7 }
 0x2e1   :  { %v4781_v36 = vld [vmem:[#allocation2 + $0x2dc] sm:$0xf0]  ;;  %v3930_v38 = vld [vmem:[#allocation2 + $0x2e0] sm:$0xf0]  ;;  %v4810_v24 = vld [vmem:[#allocation2 + $0x3cc] sm:$0xf]  ;;  %v3813_v32 = vor.u32 %v4746_v13, %v3810_v14 }
 0x2e2   :  { %v3929_v40 = vor.u32 %v4781_v36, %v3928_v34  ;;  %v3640_v41 = vld [vmem:[#allocation2 + $0x80] sm:$0xf]  ;;  %v3933_v53 = vor.u32 %v4777_v1, %v3930_v38  ;;  %v4705_v55 = vld [vmem:[#allocation2 + $0x84] sm:$0xf]  ;;  %2066 = vmatpush.bf16.msra.mxu0 %v3673_v4  ;;  %2092 = vmatpush.bf16.msra.mxu2 %v3677_v39  ;;  %v4066_v21 = vld [vmem:[#allocation2 + $0x3e8] sm:$0xf0]  ;;  %v5795_v38 = vpack.c.bf16 %v5789_v44, %v5789_v44 }
 0x2e3   :  { %v4709_v50 = vld [vmem:[#allocation2 + $0x9c] sm:$0xf0]  ;;  %v3642_v9 = vld [vmem:[#allocation2 + $0xa0] sm:$0xf0]  ;;  %v3776_v26 = vld [vmem:[#allocation2 + $0x188] sm:$0xf]  ;;  %v4069_v36 = vor.u32 %v4810_v24, %v4066_v21  ;;  %v5799_v39 = vpack.c.bf16 %v5791_v46, %v5791_v46 }
 0x2e4   :  { %v3896_v52 = vld [vmem:[#allocation2 + $0x280] sm:$0xf]  ;;  %v4769_v45 = vld [vmem:[#allocation2 + $0x284] sm:$0xf]  ;;  %v3641_v30 = vor.u32 %v4709_v50, %v3640_v41  ;;  %2079 = vmatpush.bf16.msra.mxu1 %v3929_v40  ;;  %v3645_v42 = vor.u32 %v4705_v55, %v3642_v9  ;;  %2105 = vmatpush.bf16.msra.mxu3 %v3933_v53  ;;  %v4742_v34 = vld [vmem:[#allocation2 + $0x1a4] sm:$0xf0] }
 0x2e5   :  { %v4773_v12 = vld [vmem:[#allocation2 + $0x29c] sm:$0xf0]  ;;  %v3898_v29 = vld [vmem:[#allocation2 + $0x2a0] sm:$0xf0]  ;;  %v4032_v62 = vld [vmem:[#allocation2 + $0x388] sm:$0xf]  ;;  %v3777_v41 = vor.u32 %v4742_v34, %v3776_v26 }
 0x2e6   :  { %v3897_v23 = vor.u32 %v4773_v12, %v3896_v52  ;;  %v3608_v63 = vld [vmem:[#allocation2 + $0x40] sm:$0xf]  ;;  %v3901_v28 = vor.u32 %v4769_v45, %v3898_v29  ;;  %v4697_v59 = vld [vmem:[#allocation2 + $0x44] sm:$0xf]  ;;  %2067 = vmatpush.bf16.msra.mxu0 %v3641_v30  ;;  %2093 = vmatpush.bf16.msra.mxu2 %v3645_v42  ;;  %v4806_v51 = vld [vmem:[#allocation2 + $0x3a4] sm:$0xf0] }
 0x2e7   :  { %v4701_v20 = vld [vmem:[#allocation2 + $0x5c] sm:$0xf0]  ;;  %v3610_v25 = vld [vmem:[#allocation2 + $0x60] sm:$0xf0]  ;;  %v4738_v37 = vld [vmem:[#allocation2 + $0x18c] sm:$0xf]  ;;  %v4033_v50 = vor.u32 %v4806_v51, %v4032_v62 }
 0x2e8   :  { %v3864_v56 = vld [vmem:[#allocation2 + $0x240] sm:$0xf]  ;;  %v4761_v43 = vld [vmem:[#allocation2 + $0x244] sm:$0xf]  ;;  %v3609_v60 = vor.u32 %v4701_v20, %v3608_v63  ;;  %2080 = vmatpush.bf16.msra.mxu1 %v3897_v23  ;;  %v3613_v58 = vor.u32 %v4697_v59, %v3610_v25  ;;  %2106 = vmatpush.bf16.msra.mxu3 %v3901_v28  ;;  %v3778_v1 = vld [vmem:[#allocation2 + $0x1a8] sm:$0xf0] }
 0x2e9   :  { %v4765_v47 = vld [vmem:[#allocation2 + $0x25c] sm:$0xf0]  ;;  %v3866_v2 = vld [vmem:[#allocation2 + $0x260] sm:$0xf0]  ;;  %v4802_v4 = vld [vmem:[#allocation2 + $0x38c] sm:$0xf]  ;;  %v3781_v52 = vor.u32 %v4738_v37, %v3778_v1 }
 0x2ea   :  { %v3576_v33 = vld [vmem:[#allocation2] sm:$0xf]  ;;  %v3865_v54 = vor.u32 %v4765_v47, %v3864_v56  ;;  %v4689_v0 = vld [vmem:[#allocation2 + $0x4] sm:$0xf]  ;;  %v3869_v57 = vor.u32 %v4761_v43, %v3866_v2  ;;  %2068 = vmatpush.bf16.msra.mxu0 %v3609_v60  ;;  %2094 = vmatpush.bf16.msra.mxu2 %v3613_v58  ;;  %v4034_v40 = vld [vmem:[#allocation2 + $0x3a8] sm:$0xf0] }
 0x2eb   :  { %v4693_v35 = vld [vmem:[#allocation2 + $0x1c] sm:$0xf0]  ;;  %v3578_v48 = vld [vmem:[#allocation2 + $0x20] sm:$0xf0]  ;;  %v3744_v53 = vld [vmem:[#allocation2 + $0x148] sm:$0xf]  ;;  %v4037_v44 = vor.u32 %v4802_v4, %v4034_v40 }
 0x2ec   :  { %v3832_v61 = vld [vmem:[#allocation2 + $0x200] sm:$0xf]  ;;  %v4753_v5 = vld [vmem:[#allocation2 + $0x204] sm:$0xf]  ;;  %v3577_v8 = vor.u32 %v4693_v35, %v3576_v33  ;;  %2081 = vmatpush.bf16.msra.mxu1 %v3865_v54  ;;  %v3581_v19 = vor.u32 %v4689_v0, %v3578_v48  ;;  %2107 = vmatpush.bf16.msra.mxu3 %v3869_v57  ;;  %v4734_v12 = vld [vmem:[#allocation2 + $0x164] sm:$0xf0] }
 0x2ed   :  { %v4757_v3 = vld [vmem:[#allocation2 + $0x21c] sm:$0xf0]  ;;  %v3834_v11 = vld [vmem:[#allocation2 + $0x220] sm:$0xf0]  ;;  %v4000_v55 = vld [vmem:[#allocation2 + $0x348] sm:$0xf]  ;;  %v3745_v23 = vor.u32 %v4734_v12, %v3744_v53 }
 0x2ee   :  { %v3833_v15 = vor.u32 %v4757_v3, %v3832_v61  ;;  %v3837_v27 = vor.u32 %v4753_v5, %v3834_v11  ;;  %2069 = vmatpush.bf16.msra.mxu0 %v3577_v8  ;;  %2095 = vmatpush.bf16.msra.mxu2 %v3581_v19  ;;  %v4798_v9 = vld [vmem:[#allocation2 + $0x364] sm:$0xf0]  ;;  %v4730_v45 = vld [vmem:[#allocation2 + $0x14c] sm:$0xf] }
 0x2ef   :  { %v3746_v29 = vld [vmem:[#allocation2 + $0x168] sm:$0xf0]  ;;  %v4001_v42 = vor.u32 %v4798_v9, %v4000_v55  ;;  %v3712_v20 = vld [vmem:[#allocation2 + $0x108] sm:$0xf] }
 0x2f0   :  { %2082 = vmatpush.bf16.msra.mxu1 %v3833_v15  ;;  %2108 = vmatpush.bf16.msra.mxu3 %v3837_v27  ;;  %v4794_v30 = vld [vmem:[#allocation2 + $0x34c] sm:$0xf]  ;;  %v3749_v63 = vor.u32 %v4730_v45, %v3746_v29  ;;  %v4726_v56 = vld [vmem:[#allocation2 + $0x124] sm:$0xf0] }
 0x2f1   :  { %2096 = vmatmul.bf16.vlgmr.msra.gmra.mxu2 %v5795_v38  ;;  %v4002_v46 = vld [vmem:[#allocation2 + $0x368] sm:$0xf0]  ;;  %2070 = vmatmul.bf16.vlgmr.msra.gmra.mxu0 %v5795_v38  ;;  %v3968_v28 = vld [vmem:[#allocation2 + $0x308] sm:$0xf]  ;;  %v3713_v33 = vor.u32 %v4726_v56, %v3712_v20  ;;  %v4072_v20 = vld [vmem:[#allocation2 + $0x3d0] sm:$0xf] }
 0x2f2   :  { %2114 = vmatpush.bf16.msrb.mxu0 %v3809_v31  ;;  %2140 = vmatpush.bf16.msrb.mxu2 %v3813_v32  ;;  %v4005_v47 = vor.u32 %v4794_v30, %v4002_v46  ;;  %v4790_v59 = vld [vmem:[#allocation2 + $0x324] sm:$0xf0]  ;;  %v4722_v25 = vld [vmem:[#allocation2 + $0x10c] sm:$0xf] }
 0x2f3   :  { %2109 = vmatmul.bf16.vlgmr.msra.gmra.mxu3 %v5799_v39  ;;  %2083 = vmatmul.bf16.vlgmr.msra.gmra.mxu1 %v5799_v39  ;;  %v3714_v43 = vld [vmem:[#allocation2 + $0x128] sm:$0xf0]  ;;  %v3969_v35 = vor.u32 %v4790_v59, %v3968_v28  ;;  %v3680_v58 = vld [vmem:[#allocation2 + $0xc8] sm:$0xf]  ;;  %v4815_v28 = vld [vmem:[#allocation2 + $0x3ec] sm:$0xf0] }
 0x2f4   :  { %2127 = vmatpush.bf16.msrb.mxu1 %v4065_v22  ;;  %2153 = vmatpush.bf16.msrb.mxu3 %v4069_v36  ;;  %v4786_v2 = vld [vmem:[#allocation2 + $0x30c] sm:$0xf]  ;;  %v3717_v54 = vor.u32 %v4722_v25, %v3714_v43  ;;  %v4718_v61 = vld [vmem:[#allocation2 + $0xe4] sm:$0xf0]  ;;  %v3818_v59 = vld [vmem:[#allocation2 + $0x1f0] sm:$0xf0] }
 0x2f5   :  { %v3970_v60 = vld [vmem:[#allocation2 + $0x328] sm:$0xf0]  ;;  %v3936_v3 = vld [vmem:[#allocation2 + $0x2c8] sm:$0xf]  ;;  %v3681_v49 = vor.u32 %v4718_v61, %v3680_v58  ;;  %v3784_v61 = vld [vmem:[#allocation2 + $0x190] sm:$0xf] }
 0x2f6   :  { %2115 = vmatpush.bf16.msrb.mxu0 %v3777_v41  ;;  %2141 = vmatpush.bf16.msrb.mxu2 %v3781_v52  ;;  %v3973_v0 = vor.u32 %v4786_v2, %v3970_v60  ;;  %v4782_v57 = vld [vmem:[#allocation2 + $0x2e4] sm:$0xf0]  ;;  %v4714_v48 = vld [vmem:[#allocation2 + $0xcc] sm:$0xf]  ;;  %v4811_v2 = vld [vmem:[#allocation2 + $0x3d4] sm:$0xf] }
 0x2f7   :  { %v3682_v5 = vld [vmem:[#allocation2 + $0xe8] sm:$0xf0]  ;;  %v3937_v6 = vor.u32 %v4782_v57, %v3936_v3  ;;  %v3648_v10 = vld [vmem:[#allocation2 + $0x88] sm:$0xf]  ;;  %v4074_v60 = vld [vmem:[#allocation2 + $0x3f0] sm:$0xf0] }
 0x2f8   :  { %2128 = vmatpush.bf16.msrb.mxu1 %v4033_v50  ;;  %2154 = vmatpush.bf16.msrb.mxu3 %v4037_v44  ;;  %v4778_v11 = vld [vmem:[#allocation2 + $0x2cc] sm:$0xf]  ;;  %v3685_v8 = vor.u32 %v4714_v48, %v3682_v5  ;;  %v4710_v13 = vld [vmem:[#allocation2 + $0xa4] sm:$0xf0]  ;;  %v4743_v3 = vld [vmem:[#allocation2 + $0x1ac] sm:$0xf0]  ;;  %v4077_v57 = vor.u32 %v4811_v2, %v4074_v60 }
 0x2f9   :  { %v3938_v7 = vld [vmem:[#allocation2 + $0x2e8] sm:$0xf0]  ;;  %v3904_v14 = vld [vmem:[#allocation2 + $0x288] sm:$0xf]  ;;  %v3649_v22 = vor.u32 %v4710_v13, %v3648_v10  ;;  %v4807_v48 = vld [vmem:[#allocation2 + $0x3ac] sm:$0xf0] }
 0x2fa   :  { %2116 = vmatpush.bf16.msrb.mxu0 %v3745_v23  ;;  %2142 = vmatpush.bf16.msrb.mxu2 %v3749_v63  ;;  %v3941_v15 = vor.u32 %v4778_v11, %v3938_v7  ;;  %v4774_v19 = vld [vmem:[#allocation2 + $0x2a4] sm:$0xf0]  ;;  %v4706_v24 = vld [vmem:[#allocation2 + $0x8c] sm:$0xf]  ;;  %v4751_v63 = vld [vmem:[#allocation2 + $0x1ec] sm:$0xf0] }
 0x2fb   :  { %v3650_v21 = vld [vmem:[#allocation2 + $0xa8] sm:$0xf0]  ;;  %v3905_v32 = vor.u32 %v4774_v19, %v3904_v14  ;;  %v3616_v34 = vld [vmem:[#allocation2 + $0x48] sm:$0xf]  ;;  %v4739_v5 = vld [vmem:[#allocation2 + $0x194] sm:$0xf] }
 0x2fc   :  { %2129 = vmatpush.bf16.msrb.mxu1 %v4001_v42  ;;  %2155 = vmatpush.bf16.msrb.mxu3 %v4005_v47  ;;  %v4770_v27 = vld [vmem:[#allocation2 + $0x28c] sm:$0xf]  ;;  %v3653_v26 = vor.u32 %v4706_v24, %v3650_v21  ;;  %v4702_v62 = vld [vmem:[#allocation2 + $0x64] sm:$0xf0]  ;;  %v3816_v42 = vld [vmem:[#allocation2 + $0x1d0] sm:$0xf] }
 0x2fd   :  { %v3906_v31 = vld [vmem:[#allocation2 + $0x2a8] sm:$0xf0]  ;;  %v3872_v36 = vld [vmem:[#allocation2 + $0x248] sm:$0xf]  ;;  %v3617_v50 = vor.u32 %v4702_v62, %v3616_v34  ;;  %v4747_v47 = vld [vmem:[#allocation2 + $0x1d4] sm:$0xf] }
 0x2fe   :  { %2117 = vmatpush.bf16.msrb.mxu0 %v3713_v33  ;;  %2143 = vmatpush.bf16.msrb.mxu2 %v3717_v54  ;;  %v3909_v51 = vor.u32 %v4770_v27, %v3906_v31  ;;  %v4766_v37 = vld [vmem:[#allocation2 + $0x264] sm:$0xf0]  ;;  %v4698_v1 = vld [vmem:[#allocation2 + $0x4c] sm:$0xf]  ;;  %v4073_v54 = vor.u32 %v4815_v28, %v4072_v20  ;;  %v3821_v58 = vor.u32 %v4747_v47, %v3818_v59  ;;  %v3786_v11 = vld [vmem:[#allocation2 + $0x1b0] sm:$0xf0] }
 0x2ff   :  { %v3618_v4 = vld [vmem:[#allocation2 + $0x68] sm:$0xf0]  ;;  %v3584_v52 = vld [vmem:[#allocation2 + $0x8] sm:$0xf]  ;;  %v3873_v12 = vor.u32 %v4766_v37, %v3872_v36  ;;  %v4803_v7 = vld [vmem:[#allocation2 + $0x394] sm:$0xf]  ;;  %v3789_v10 = vor.u32 %v4739_v5, %v3786_v11 }
 0x300   :  { %2130 = vmatpush.bf16.msrb.mxu1 %v3969_v35  ;;  %2156 = vmatpush.bf16.msrb.mxu3 %v3973_v0  ;;  %v4762_v40 = vld [vmem:[#allocation2 + $0x24c] sm:$0xf]  ;;  %v4694_v53 = vld [vmem:[#allocation2 + $0x24] sm:$0xf0]  ;;  %v3621_v55 = vor.u32 %v4698_v1, %v3618_v4  ;;  %v3817_v35 = vor.u32 %v4751_v63, %v3816_v42  ;;  %v4040_v0 = vld [vmem:[#allocation2 + $0x390] sm:$0xf] }
 0x301   :  { %v3874_v41 = vld [vmem:[#allocation2 + $0x268] sm:$0xf0]  ;;  %v3840_v44 = vld [vmem:[#allocation2 + $0x208] sm:$0xf]  ;;  %v3585_v56 = vor.u32 %v4694_v53, %v3584_v52  ;;  %v3752_v13 = vld [vmem:[#allocation2 + $0x150] sm:$0xf] }
 0x302   :  { %2118 = vmatpush.bf16.msrb.mxu0 %v3681_v49  ;;  %2144 = vmatpush.bf16.msrb.mxu2 %v3685_v8  ;;  %v4758_v9 = vld [vmem:[#allocation2 + $0x224] sm:$0xf0]  ;;  %v4690_v45 = vld [vmem:[#allocation2 + $0xc] sm:$0xf]  ;;  %v3877_v29 = vor.u32 %v4762_v40, %v3874_v41  ;;  %v4042_v49 = vld [vmem:[#allocation2 + $0x3b0] sm:$0xf0]  ;;  %v4041_v8 = vor.u32 %v4807_v48, %v4040_v0 }
 0x303   :  { %v3586_v30 = vld [vmem:[#allocation2 + $0x28] sm:$0xf0]  ;;  %v3841_v25 = vor.u32 %v4758_v9, %v3840_v44  ;;  %v4735_v14 = vld [vmem:[#allocation2 + $0x16c] sm:$0xf0]  ;;  %v4045_v19 = vor.u32 %v4803_v7, %v4042_v49  ;;  %v4731_v21 = vld [vmem:[#allocation2 + $0x154] sm:$0xf] }
 0x304   :  { %2131 = vmatpush.bf16.msrb.mxu1 %v3937_v6  ;;  %2157 = vmatpush.bf16.msrb.mxu3 %v3941_v15  ;;  %v4754_v46 = vld [vmem:[#allocation2 + $0x20c] sm:$0xf]  ;;  %v3589_v43 = vor.u32 %v4690_v45, %v3586_v30  ;;  %v3785_v6 = vor.u32 %v4743_v3, %v3784_v61  ;;  %v4008_v15 = vld [vmem:[#allocation2 + $0x350] sm:$0xf]  ;;  %v3754_v27 = vld [vmem:[#allocation2 + $0x170] sm:$0xf0] }
 0x305   :  { %v3842_v23 = vld [vmem:[#allocation2 + $0x228] sm:$0xf0]  ;;  %v4799_v24 = vld [vmem:[#allocation2 + $0x36c] sm:$0xf0]  ;;  %v4795_v31 = vld [vmem:[#allocation2 + $0x354] sm:$0xf]  ;;  %v3757_v34 = vor.u32 %v4731_v21, %v3754_v27 }
 0x306   :  { %2119 = vmatpush.bf16.msrb.mxu0 %v3649_v22  ;;  %2145 = vmatpush.bf16.msrb.mxu2 %v3653_v26  ;;  %v3845_v33 = vor.u32 %v4754_v46, %v3842_v23  ;;  %v4010_v22 = vld [vmem:[#allocation2 + $0x370] sm:$0xf0]  ;;  %v4009_v26 = vor.u32 %v4799_v24, %v4008_v15  ;;  %v3720_v62 = vld [vmem:[#allocation2 + $0x110] sm:$0xf] }
 0x307   :  { %v4727_v36 = vld [vmem:[#allocation2 + $0x12c] sm:$0xf0]  ;;  %v4013_v37 = vor.u32 %v4795_v31, %v4010_v22  ;;  %v4723_v4 = vld [vmem:[#allocation2 + $0x114] sm:$0xf] }
 0x308   :  { %2132 = vmatpush.bf16.msrb.mxu1 %v3905_v32  ;;  %2158 = vmatpush.bf16.msrb.mxu3 %v3909_v51  ;;  %v3753_v32 = vor.u32 %v4735_v14, %v3752_v13  ;;  %v3976_v51 = vld [vmem:[#allocation2 + $0x310] sm:$0xf]  ;;  %v3722_v40 = vld [vmem:[#allocation2 + $0x130] sm:$0xf0]  ;;  %v3721_v52 = vor.u32 %v4727_v36, %v3720_v62  ;;  %v4080_v62 = vld [vmem:[#allocation2 + $0x3d8] sm:$0xf] }
 0x309   :  { %v4791_v1 = vld [vmem:[#allocation2 + $0x32c] sm:$0xf0]  ;;  %v4787_v41 = vld [vmem:[#allocation2 + $0x314] sm:$0xf] }
 0x30a   :  { %2120 = vmatpush.bf16.msrb.mxu0 %v3617_v50  ;;  %2146 = vmatpush.bf16.msrb.mxu2 %v3621_v55  ;;  %v3978_v50 = vld [vmem:[#allocation2 + $0x330] sm:$0xf0]  ;;  %v3977_v53 = vor.u32 %v4791_v1, %v3976_v51  ;;  %v3688_v55 = vld [vmem:[#allocation2 + $0xd0] sm:$0xf]  ;;  %v4816_v51 = vld [vmem:[#allocation2 + $0x3f4] sm:$0xf0] }
 0x30b   :  { %v4719_v44 = vld [vmem:[#allocation2 + $0xec] sm:$0xf0]  ;;  %v3981_v45 = vor.u32 %v4787_v41, %v3978_v50  ;;  %v4715_v30 = vld [vmem:[#allocation2 + $0xd4] sm:$0xf]  ;;  %v3826_v1 = vld [vmem:[#allocation2 + $0x1f8] sm:$0xf0] }
 0x30c   :  { %2133 = vmatpush.bf16.msrb.mxu1 %v3873_v12  ;;  %2159 = vmatpush.bf16.msrb.mxu3 %v3877_v29  ;;  %v3725_v12 = vor.u32 %v4723_v4, %v3722_v40  ;;  %v3944_v9 = vld [vmem:[#allocation2 + $0x2d0] sm:$0xf]  ;;  %v3690_v46 = vld [vmem:[#allocation2 + $0xf0] sm:$0xf0]  ;;  %v3689_v63 = vor.u32 %v4719_v44, %v3688_v55  ;;  %v4812_v41 = vld [vmem:[#allocation2 + $0x3dc] sm:$0xf] }
 0x30d   :  { %v4783_v29 = vld [vmem:[#allocation2 + $0x2ec] sm:$0xf0]  ;;  %v4779_v23 = vld [vmem:[#allocation2 + $0x2d4] sm:$0xf]  ;;  %v4082_v50 = vld [vmem:[#allocation2 + $0x3f8] sm:$0xf0] }
 0x30e   :  { %2121 = vmatpush.bf16.msrb.mxu0 %v3585_v56  ;;  %2147 = vmatpush.bf16.msrb.mxu2 %v3589_v43  ;;  %v3946_v42 = vld [vmem:[#allocation2 + $0x2f0] sm:$0xf0]  ;;  %v3945_v20 = vor.u32 %v4783_v29, %v3944_v9  ;;  %v3693_v56 = vor.u32 %v4715_v30, %v3690_v46  ;;  %v3656_v28 = vld [vmem:[#allocation2 + $0x90] sm:$0xf]  ;;  %v3792_v44 = vld [vmem:[#allocation2 + $0x198] sm:$0xf]  ;;  %v4085_v29 = vor.u32 %v4812_v41, %v4082_v50 }
 0x30f   :  { %v4711_v47 = vld [vmem:[#allocation2 + $0xac] sm:$0xf0]  ;;  %v4707_v2 = vld [vmem:[#allocation2 + $0x94] sm:$0xf]  ;;  %v4744_v9 = vld [vmem:[#allocation2 + $0x1b4] sm:$0xf0] }
 0x310   :  { %2134 = vmatpush.bf16.msrb.mxu1 %v3841_v25  ;;  %2160 = vmatpush.bf16.msrb.mxu3 %v3845_v33  ;;  %v3912_v59 = vld [vmem:[#allocation2 + $0x290] sm:$0xf]  ;;  %v3949_v25 = vor.u32 %v4779_v23, %v3946_v42  ;;  %v3658_v60 = vld [vmem:[#allocation2 + $0xb0] sm:$0xf0]  ;;  %v4808_v30 = vld [vmem:[#allocation2 + $0x3b4] sm:$0xf0] }
 0x311   :  { %2148 = vmatmul.bf16.vlgmr.msrb.gmra.mxu2 %v5795_v38  ;;  %2122 = vmatmul.bf16.vlgmr.msrb.gmra.mxu0 %v5795_v38  ;;  %v4775_v43 = vld [vmem:[#allocation2 + $0x2ac] sm:$0xf0]  ;;  %v4771_v33 = vld [vmem:[#allocation2 + $0x294] sm:$0xf]  ;;  %v3661_v61 = vor.u32 %v4707_v2, %v3658_v60  ;;  %v4740_v46 = vld [vmem:[#allocation2 + $0x19c] sm:$0xf] }
 0x312   :  { %2166 = vmatpush.bf16.msra.mxu0 %v3817_v35  ;;  %2192 = vmatpush.bf16.msra.mxu2 %v3821_v58  ;;  %v3914_v35 = vld [vmem:[#allocation2 + $0x2b0] sm:$0xf0]  ;;  %v3913_v58 = vor.u32 %v4775_v43, %v3912_v59  ;;  %v3624_v3 = vld [vmem:[#allocation2 + $0x50] sm:$0xf]  ;;  %v3794_v23 = vld [vmem:[#allocation2 + $0x1b8] sm:$0xf0] }
 0x313   :  { %2161 = vmatmul.bf16.vlgmr.msrb.gmra.mxu3 %v5799_v39  ;;  %2135 = vmatmul.bf16.vlgmr.msrb.gmra.mxu1 %v5799_v39  ;;  %v4703_v0 = vld [vmem:[#allocation2 + $0x6c] sm:$0xf0]  ;;  %v3917_v48 = vor.u32 %v4771_v33, %v3914_v35  ;;  %v4699_v11 = vld [vmem:[#allocation2 + $0x54] sm:$0xf]  ;;  %v4804_v42 = vld [vmem:[#allocation2 + $0x39c] sm:$0xf] }
 0x314   :  { %2179 = vmatpush.bf16.msra.mxu1 %v4073_v54  ;;  %2205 = vmatpush.bf16.msra.mxu3 %v4077_v57  ;;  %v3657_v54 = vor.u32 %v4711_v47, %v3656_v28  ;;  %v3880_v57 = vld [vmem:[#allocation2 + $0x250] sm:$0xf]  ;;  %v3626_v7 = vld [vmem:[#allocation2 + $0x70] sm:$0xf0]  ;;  %v3797_v28 = vor.u32 %v4740_v46, %v3794_v23  ;;  %v3760_v47 = vld [vmem:[#allocation2 + $0x158] sm:$0xf] }
 0x315   :  { %v4767_v5 = vld [vmem:[#allocation2 + $0x26c] sm:$0xf0]  ;;  %v4763_v49 = vld [vmem:[#allocation2 + $0x254] sm:$0xf]  ;;  %v3629_v15 = vor.u32 %v4699_v11, %v3626_v7  ;;  %v4736_v59 = vld [vmem:[#allocation2 + $0x174] sm:$0xf0] }
 0x316   :  { %2167 = vmatpush.bf16.msra.mxu0 %v3785_v6  ;;  %2193 = vmatpush.bf16.msra.mxu2 %v3789_v10  ;;  %v3882_v6 = vld [vmem:[#allocation2 + $0x270] sm:$0xf0]  ;;  %v3592_v10 = vld [vmem:[#allocation2 + $0x10] sm:$0xf]  ;;  %v3881_v14 = vor.u32 %v4767_v5, %v3880_v57  ;;  %v4800_v2 = vld [vmem:[#allocation2 + $0x374] sm:$0xf0] }
 0x317   :  { %v4695_v13 = vld [vmem:[#allocation2 + $0x2c] sm:$0xf0]  ;;  %v4691_v21 = vld [vmem:[#allocation2 + $0x14] sm:$0xf]  ;;  %v3885_v27 = vor.u32 %v4763_v49, %v3882_v6  ;;  %v4732_v60 = vld [vmem:[#allocation2 + $0x15c] sm:$0xf] }
 0x318   :  { %2180 = vmatpush.bf16.msra.mxu1 %v4041_v8  ;;  %2206 = vmatpush.bf16.msra.mxu3 %v4045_v19  ;;  %v3625_v8 = vor.u32 %v4703_v0, %v3624_v3  ;;  %v3848_v19 = vld [vmem:[#allocation2 + $0x210] sm:$0xf]  ;;  %v3594_v31 = vld [vmem:[#allocation2 + $0x30] sm:$0xf0]  ;;  %v3593_v36 = vor.u32 %v4695_v13, %v3592_v10  ;;  %v3762_v33 = vld [vmem:[#allocation2 + $0x178] sm:$0xf0] }
 0x319   :  { %v4759_v24 = vld [vmem:[#allocation2 + $0x22c] sm:$0xf0]  ;;  %v4755_v22 = vld [vmem:[#allocation2 + $0x214] sm:$0xf]  ;;  %v3597_v40 = vor.u32 %v4691_v21, %v3594_v31  ;;  %v4796_v35 = vld [vmem:[#allocation2 + $0x35c] sm:$0xf]  ;;  %v3765_v3 = vor.u32 %v4732_v60, %v3762_v33 }
 0x31a   :  { %2168 = vmatpush.bf16.msra.mxu0 %v3753_v32  ;;  %2194 = vmatpush.bf16.msra.mxu2 %v3757_v34  ;;  %v3850_v32 = vld [vmem:[#allocation2 + $0x230] sm:$0xf0]  ;;  %v4752_v34 = vld [vmem:[#allocation2 + $0x1f4] sm:$0xf0]  ;;  %v3849_v4 = vor.u32 %v4759_v24, %v3848_v19  ;;  %v4724_v7 = vld [vmem:[#allocation2 + $0x11c] sm:$0xf] }
 0x31b   :  { %v3728_v0 = vld [vmem:[#allocation2 + $0x118] sm:$0xf]  ;;  %v3730_v49 = vld [vmem:[#allocation2 + $0x138] sm:$0xf0] }
 0x31c   :  { %2181 = vmatpush.bf16.msra.mxu1 %v4009_v26  ;;  %2207 = vmatpush.bf16.msra.mxu3 %v4013_v37  ;;  %v3824_v26 = vld [vmem:[#allocation2 + $0x1d8] sm:$0xf]  ;;  %v4748_v37 = vld [vmem:[#allocation2 + $0x1dc] sm:$0xf] }
 0x31d   :  { %v3829_v55 = vor.u32 %v4748_v37, %v3826_v1  ;;  %v4728_v57 = vld [vmem:[#allocation2 + $0x134] sm:$0xf0]  ;;  %v4788_v6 = vld [vmem:[#allocation2 + $0x31c] sm:$0xf] }
 0x31e   :  { %2169 = vmatpush.bf16.msra.mxu0 %v3721_v52  ;;  %2195 = vmatpush.bf16.msra.mxu2 %v3725_v12  ;;  %v3853_v52 = vor.u32 %v4755_v22, %v3850_v32  ;;  %v4081_v12 = vor.u32 %v4816_v51, %v4080_v62  ;;  %v4792_v11 = vld [vmem:[#allocation2 + $0x334] sm:$0xf0]  ;;  %v3729_v10 = vor.u32 %v4728_v57, %v3728_v0  ;;  %v4716_v31 = vld [vmem:[#allocation2 + $0xdc] sm:$0xf] }
 0x31f   :  { %v4720_v19 = vld [vmem:[#allocation2 + $0xf4] sm:$0xf0]  ;;  %v3698_v22 = vld [vmem:[#allocation2 + $0xf8] sm:$0xf0] }
 0x320   :  { %2182 = vmatpush.bf16.msra.mxu1 %v3977_v53  ;;  %2208 = vmatpush.bf16.msra.mxu3 %v3981_v45  ;;  %v3825_v53 = vor.u32 %v4752_v34, %v3824_v26  ;;  %v4048_v45 = vld [vmem:[#allocation2 + $0x398] sm:$0xf]  ;;  %v4780_v32 = vld [vmem:[#allocation2 + $0x2dc] sm:$0xf] }
 0x321   :  { %v3952_v24 = vld [vmem:[#allocation2 + $0x2d8] sm:$0xf]  ;;  %v3954_v26 = vld [vmem:[#allocation2 + $0x2f8] sm:$0xf0] }
 0x322   :  { %2170 = vmatpush.bf16.msra.mxu0 %v3689_v63  ;;  %2196 = vmatpush.bf16.msra.mxu2 %v3693_v56  ;;  %v4050_v63 = vld [vmem:[#allocation2 + $0x3b8] sm:$0xf0]  ;;  %v4049_v56 = vor.u32 %v4808_v30, %v4048_v45  ;;  %v3664_v51 = vld [vmem:[#allocation2 + $0x98] sm:$0xf] }
 0x323   :  { %v4053_v43 = vor.u32 %v4804_v42, %v4050_v63  ;;  %v4712_v37 = vld [vmem:[#allocation2 + $0xb4] sm:$0xf0]  ;;  %v4708_v41 = vld [vmem:[#allocation2 + $0x9c] sm:$0xf] }
 0x324   :  { %2183 = vmatpush.bf16.msra.mxu1 %v3945_v20  ;;  %2209 = vmatpush.bf16.msra.mxu3 %v3949_v25  ;;  %v3793_v20 = vor.u32 %v4744_v9, %v3792_v44  ;;  %v4016_v25 = vld [vmem:[#allocation2 + $0x358] sm:$0xf]  ;;  %v3666_v50 = vld [vmem:[#allocation2 + $0xb8] sm:$0xf0] }
 0x325   :  { %v3920_v1 = vld [vmem:[#allocation2 + $0x298] sm:$0xf]  ;;  %v3669_v44 = vor.u32 %v4708_v41, %v3666_v50  ;;  %v4700_v23 = vld [vmem:[#allocation2 + $0x5c] sm:$0xf] }
 0x326   :  { %2171 = vmatpush.bf16.msra.mxu0 %v3657_v54  ;;  %2197 = vmatpush.bf16.msra.mxu2 %v3661_v61  ;;  %v4018_v54 = vld [vmem:[#allocation2 + $0x378] sm:$0xf0]  ;;  %v4017_v61 = vor.u32 %v4800_v2, %v4016_v25  ;;  %v3632_v9 = vld [vmem:[#allocation2 + $0x58] sm:$0xf] }
 0x327   :  { %v4021_v5 = vor.u32 %v4796_v35, %v4018_v54  ;;  %v4704_v45 = vld [vmem:[#allocation2 + $0x74] sm:$0xf0]  ;;  %v3634_v42 = vld [vmem:[#allocation2 + $0x78] sm:$0xf0] }
 0x328   :  { %2184 = vmatpush.bf16.msra.mxu1 %v3913_v58  ;;  %2210 = vmatpush.bf16.msra.mxu3 %v3917_v48  ;;  %v3761_v58 = vor.u32 %v4736_v59, %v3760_v47  ;;  %v3984_v48 = vld [vmem:[#allocation2 + $0x318] sm:$0xf]  ;;  %v4764_v63 = vld [vmem:[#allocation2 + $0x25c] sm:$0xf]  ;;  %v3637_v47 = vor.u32 %v4700_v23, %v3634_v42 }
 0x329   :  { %v3985_v13 = vor.u32 %v4792_v11, %v3984_v48  ;;  %v4768_v46 = vld [vmem:[#allocation2 + $0x274] sm:$0xf0]  ;;  %v4692_v33 = vld [vmem:[#allocation2 + $0x1c] sm:$0xf]  ;;  %v1406_v48 = vperm.slane %v5125_v16, 0 }
 0x32a   :  { %2172 = vmatpush.bf16.msra.mxu0 %v3625_v8  ;;  %2198 = vmatpush.bf16.msra.mxu2 %v3629_v15  ;;  %v3986_v8 = vld [vmem:[#allocation2 + $0x338] sm:$0xf0]  ;;  %v3696_v15 = vld [vmem:[#allocation2 + $0xd8] sm:$0xf] }
 0x32b   :  { %v3989_v21 = vor.u32 %v4788_v6, %v3986_v8  ;;  %v3697_v34 = vor.u32 %v4720_v19, %v3696_v15  ;;  %v3600_v59 = vld [vmem:[#allocation2 + $0x18] sm:$0xf]  ;;  %v3602_v35 = vld [vmem:[#allocation2 + $0x38] sm:$0xf0] }
 0x32c   :  { %2185 = vmatpush.bf16.msra.mxu1 %v3881_v14  ;;  %2211 = vmatpush.bf16.msra.mxu3 %v3885_v27  ;;  %v3733_v14 = vor.u32 %v4724_v7, %v3730_v49  ;;  %v4784_v27 = vld [vmem:[#allocation2 + $0x2f4] sm:$0xf0]  ;;  %v4756_v54 = vld [vmem:[#allocation2 + $0x21c] sm:$0xf]  ;;  %v3605_v0 = vor.u32 %v4692_v33, %v3602_v35  ;;  %v1407_v49 = vperm.slane %v5125_v16, 1  ;;  %v1413_v33 = vperm.slane %v5125_v16, 7 }
 0x32d   :  { %v3953_v62 = vor.u32 %v4784_v27, %v3952_v24  ;;  %v4696_v25 = vld [vmem:[#allocation2 + $0x34] sm:$0xf0]  ;;  %v1408_v27 = vperm.slane %v5125_v16, 2 }
 0x32e   :  { %2173 = vmatpush.bf16.msra.mxu0 %v3593_v36  ;;  %2199 = vmatpush.bf16.msra.mxu2 %v3597_v40  ;;  %v3701_v36 = vor.u32 %v4716_v31, %v3698_v22  ;;  %v4776_v40 = vld [vmem:[#allocation2 + $0x2b4] sm:$0xf0] }
 0x32f   :  { %v4760_v60 = vld [vmem:[#allocation2 + $0x234] sm:$0xf0] }
 0x330   :  { %2186 = vmatpush.bf16.msra.mxu1 %v3849_v4  ;;  %2212 = vmatpush.bf16.msra.mxu3 %v3853_v52  ;;  %v3957_v4 = vor.u32 %v4780_v32, %v3954_v26  ;;  %v4772_v52 = vld [vmem:[#allocation2 + $0x29c] sm:$0xf]  ;;  %v1409_v26 = vperm.slane %v5125_v16, 3 }
 0x331   :  { %2200 = vmatmul.bf16.vlgmr.msra.gmra.mxu2 %v5795_v38  ;;  %2174 = vmatmul.bf16.vlgmr.msra.gmra.mxu0 %v5795_v38 }
 0x332   :  { %2218 = vmatpush.bf16.msrb.mxu0 %v3825_v53  ;;  %2244 = vmatpush.bf16.msrb.mxu2 %v3829_v55  ;;  %v3922_v53 = vld [vmem:[#allocation2 + $0x2b8] sm:$0xf0]  ;;  %v3921_v55 = vor.u32 %v4776_v40, %v3920_v1 }
 0x333   :  { %2213 = vmatmul.bf16.vlgmr.msra.gmra.mxu3 %v5799_v39  ;;  %2187 = vmatmul.bf16.vlgmr.msra.gmra.mxu1 %v5799_v39  ;;  %v3925_v30 = vor.u32 %v4772_v52, %v3922_v53  ;;  %v1410_v53 = vperm.slane %v5125_v16, 4 }
 0x334   :  { %2231 = vmatpush.bf16.msrb.mxu1 %v4081_v12  ;;  %2257 = vmatpush.bf16.msrb.mxu3 %v4085_v29  ;;  %v3665_v12 = vor.u32 %v4712_v37, %v3664_v51  ;;  %v3888_v29 = vld [vmem:[#allocation2 + $0x258] sm:$0xf] }
 0x336   :  { %2219 = vmatpush.bf16.msrb.mxu0 %v3793_v20  ;;  %2245 = vmatpush.bf16.msrb.mxu2 %v3797_v28  ;;  %v3890_v20 = vld [vmem:[#allocation2 + $0x278] sm:$0xf0]  ;;  %v3889_v28 = vor.u32 %v4768_v46, %v3888_v29 }
 0x337   :  { %v3893_v2 = vor.u32 %v4764_v63, %v3890_v20 }
 0x338   :  { %2232 = vmatpush.bf16.msrb.mxu1 %v4049_v56  ;;  %2258 = vmatpush.bf16.msrb.mxu3 %v4053_v43  ;;  %v3633_v56 = vor.u32 %v4704_v45, %v3632_v9  ;;  %v3856_v43 = vld [vmem:[#allocation2 + $0x218] sm:$0xf]  ;;  %v1411_v9 = vperm.slane %v5125_v16, 5 }
 0x33a   :  { %2220 = vmatpush.bf16.msrb.mxu0 %v3761_v58  ;;  %2246 = vmatpush.bf16.msrb.mxu2 %v3765_v3  ;;  %v3858_v58 = vld [vmem:[#allocation2 + $0x238] sm:$0xf0]  ;;  %v3857_v3 = vor.u32 %v4760_v60, %v3856_v43 }
 0x33b   :  { %v3861_v57 = vor.u32 %v4756_v54, %v3858_v58 }
 0x33c   :  { %2233 = vmatpush.bf16.msrb.mxu1 %v4017_v61  ;;  %2259 = vmatpush.bf16.msrb.mxu3 %v4021_v5  ;;  %v3601_v61 = vor.u32 %v4696_v25, %v3600_v59  ;;  %v1412_v59 = vperm.slane %v5125_v16, 6 }
 0x33e   :  { %2221 = vmatpush.bf16.msrb.mxu0 %v3729_v10  ;;  %2247 = vmatpush.bf16.msrb.mxu2 %v3733_v14 }
 0x340   :  { %2234 = vmatpush.bf16.msrb.mxu1 %v3985_v13  ;;  %2260 = vmatpush.bf16.msrb.mxu3 %v3989_v21 }
 0x342   :  { %2222 = vmatpush.bf16.msrb.mxu0 %v3697_v34  ;;  %2248 = vmatpush.bf16.msrb.mxu2 %v3701_v36 }
 0x344   :  { %2235 = vmatpush.bf16.msrb.mxu1 %v3953_v62  ;;  %2261 = vmatpush.bf16.msrb.mxu3 %v3957_v4 }
 0x346   :  { %2223 = vmatpush.bf16.msrb.mxu0 %v3665_v12  ;;  %2249 = vmatpush.bf16.msrb.mxu2 %v3669_v44 }
 0x348   :  { %2236 = vmatpush.bf16.msrb.mxu1 %v3921_v55  ;;  %2262 = vmatpush.bf16.msrb.mxu3 %v3925_v30 }
 0x34a   :  { %2224 = vmatpush.bf16.msrb.mxu0 %v3633_v56  ;;  %2250 = vmatpush.bf16.msrb.mxu2 %v3637_v47 }
 0x34c   :  { %2237 = vmatpush.bf16.msrb.mxu1 %v3889_v28  ;;  %2263 = vmatpush.bf16.msrb.mxu3 %v3893_v2 }
 0x34e   :  { %2225 = vmatpush.bf16.msrb.mxu0 %v3601_v61  ;;  %2251 = vmatpush.bf16.msrb.mxu2 %v3605_v0 }
 0x350   :  { %2238 = vmatpush.bf16.msrb.mxu1 %v3857_v3  ;;  %2264 = vmatpush.bf16.msrb.mxu3 %v3861_v57 }
 0x351   :  { %2226 = vmatmul.bf16.vlgmr.msrb.gmra.mxu0 %v5795_v38  ;;  %2252 = vmatmul.bf16.vlgmr.msrb.gmra.mxu2 %v5795_v38 }
 0x353   :  { %2239 = vmatmul.bf16.vlgmr.msrb.gmra.mxu1 %v5799_v39  ;;  %2265 = vmatmul.bf16.vlgmr.msrb.gmra.mxu3 %v5799_v39 }
 0x36e   :  { %v2071_v5 = vpop.f32.mrf.mxu0 }
 0x36f   :  { %v2072_v11 = vadd.f32 %v2071_v5, %v1406_v48 }
 0x370   :  { %v2084_v7 = vpop.f32.mrf.mxu1 }
 0x371   :  { %v5819_v6 = vadd.f32 %v2084_v7, %v2072_v11 }
 0x373   :  { %v2270_v8 = vmax.f32 %v5819_v6, 0.0 }
 0x374   :  { %v2097_v10 = vpop.f32.mrf.mxu2 }
 0x375   :  { %v2098_v13 = vadd.f32 %v2097_v10, %v1407_v49 }
 0x376   :  { %v2110_v14 = vpop.f32.mrf.mxu3  ;;  %v2073_v19 = vpop.f32.mrf.mxu0 }
 0x377   :  { %v5822_v15 = vadd.f32 %v2110_v14, %v2098_v13 }
 0x378   :  { %v2086_v38 = vpop.f32.mrf.mxu1 }
 0x379   :  { %v2271_v39 = vmax.f32 %v5822_v15, 0.0 }
 0x37c   :  { %v2099_v24 = vpop.f32.mrf.mxu2 }
 0x37e   :  { %v2112_v21 = vpop.f32.mrf.mxu3 }
 0x38e   :  { %v2123_v31 = vpop.f32.mrf.mxu0 }
 0x38f   :  { %v2124_v22 = vadd.f32 %v2123_v31, %v1408_v27 }
 0x390   :  { %v2136_v32 = vpop.f32.mrf.mxu1 }
 0x391   :  { %v5827_v34 = vadd.f32 %v2136_v32, %v2124_v22 }
 0x393   :  { %v2272_v62 = vmax.f32 %v5827_v34, 0.0 }
 0x394   :  { %v2149_v36 = vpop.f32.mrf.mxu2 }
 0x395   :  { %v2150_v51 = vadd.f32 %v2149_v36, %v1409_v26 }
 0x396   :  { %v2162_v37 = vpop.f32.mrf.mxu3  ;;  %v2125_v4 = vpop.f32.mrf.mxu0 }
 0x397   :  { %v5830_v1 = vadd.f32 %v2162_v37, %v2150_v51 }
 0x398   :  { %v2138_v40 = vpop.f32.mrf.mxu1 }
 0x399   :  { %v2273_v41 = vmax.f32 %v5830_v1, 0.0 }
 0x39c   :  { %v2151_v50 = vpop.f32.mrf.mxu2 }
 0x39e   :  { %v2164_v52 = vpop.f32.mrf.mxu3 }
 0x3ae   :  { %v2175_v12 = vpop.f32.mrf.mxu0 }
 0x3af   :  { %v2176_v55 = vadd.f32 %v2175_v12, %v1410_v53 }
 0x3b0   :  { %v2188_v44 = vpop.f32.mrf.mxu1 }
 0x3b1   :  { %v5835_v45 = vadd.f32 %v2188_v44, %v2176_v55 }
 0x3b3   :  { %v2274_v29 = vmax.f32 %v5835_v45, 0.0 }
 0x3b4   :  { %v2201_v30 = vpop.f32.mrf.mxu2 }
 0x3b5   :  { %v2202_v46 = vadd.f32 %v2201_v30, %v1411_v9 }
 0x3b6   :  { %v2214_v23 = vpop.f32.mrf.mxu3  ;;  %v2177_v63 = vpop.f32.mrf.mxu0 }
 0x3b7   :  { %v5838_v42 = vadd.f32 %v2214_v23, %v2202_v46 }
 0x3b8   :  { %v2190_v20 = vpop.f32.mrf.mxu1 }
 0x3b9   :  { %v2275_v56 = vmax.f32 %v5838_v42, 0.0 }
 0x3bc   :  { %v2203_v28 = vpop.f32.mrf.mxu2 }
 0x3be   :  { %v2216_v47 = vpop.f32.mrf.mxu3 }
 0x3ce   :  { %v2227_v25 = vpop.f32.mrf.mxu0 }
 0x3cf   :  { %v2228_v43 = vadd.f32 %v2227_v25, %v1412_v59 }
 0x3d0   :  { %v2240_v2 = vpop.f32.mrf.mxu1 }
 0x3d1   :  { %v5842_v60 = vadd.f32 %v2240_v2, %v2228_v43 }
 0x3d3   :  { %v2276_v35 = vmax.f32 %v5842_v60, 0.0 }
 0x3d4   :  { %v2253_v54 = vpop.f32.mrf.mxu2 }
 0x3d5   :  { %v2254_v58 = vadd.f32 %v2253_v54, %v1413_v33 }
 0x3d6   :  { %v2266_v61 = vpop.f32.mrf.mxu3  ;;  %v2229_v3 = vpop.f32.mrf.mxu0 }
 0x3d7   :  { %v5846_v57 = vadd.f32 %v2266_v61, %v2254_v58 }
 0x3d8   :  { %v2242_v0 = vpop.f32.mrf.mxu1 }
 0x3d9   :  { %v2277_v48 = vmax.f32 %v5846_v57, 0.0 }
 0x3dc   :  { %v2255_v5 = vpop.f32.mrf.mxu2 }
 0x3de   :  { %v2268_v11 = vpop.f32.mrf.mxu3 }
 0x3df   :  { %5016 = dma.done.wait [#allocation6 + $0x1], 16384 }
 0x3e0   :  { %5017 = vsyncadd [#allocation6 + $0x1], 4294950912  ;;  %v4144_v7 = vld [vmem:[#allocation3 + $0x70] sm:$0xf]  ;;  %v4832_v49 = vld [vmem:[#allocation3 + $0x74] sm:$0xf0] }
 0x3e1   :  { %v4208_v10 = vld [vmem:[#allocation3 + $0xf0] sm:$0xf]  ;;  %v4145_v13 = vor.u32 %v4832_v49, %v4144_v7  ;;  %v4848_v16 = vld [vmem:[#allocation3 + $0xf4] sm:$0xf0]  ;;  %v4136_v31 = vld [vmem:[#allocation3 + $0x60] sm:$0xf] }
 0x3e2   :  { %v4272_v14 = vld [vmem:[#allocation3 + $0x170] sm:$0xf]  ;;  %v4864_v19 = vld [vmem:[#allocation3 + $0x174] sm:$0xf0]  ;;  %v4209_v38 = vor.u32 %v4848_v16, %v4208_v10  ;;  %v4830_v32 = vld [vmem:[#allocation3 + $0x64] sm:$0xf0] }
 0x3e3   :  { %v4273_v24 = vor.u32 %v4864_v19, %v4272_v14  ;;  %v4336_v21 = vld [vmem:[#allocation3 + $0x1f0] sm:$0xf]  ;;  %v4880_v27 = vld [vmem:[#allocation3 + $0x1f4] sm:$0xf0]  ;;  %3063 = vmatpush.bf16.msra.mxu0 %v4145_v13  ;;  %v4200_v26 = vld [vmem:[#allocation3 + $0xe0] sm:$0xf]  ;;  %v4137_v51 = vor.u32 %v4830_v32, %v4136_v31 }
 0x3e4   :  { %v4337_v22 = vor.u32 %v4880_v27, %v4336_v21  ;;  %v4846_v36 = vld [vmem:[#allocation3 + $0xe4] sm:$0xf0]  ;;  %3076 = vmatpush.bf16.msra.mxu1 %v4209_v38  ;;  %v4264_v4 = vld [vmem:[#allocation3 + $0x160] sm:$0xf]  ;;  %v4128_v12 = vld [vmem:[#allocation3 + $0x50] sm:$0xf] }
 0x3e5   :  { %3089 = vmatpush.bf16.msra.mxu2 %v4273_v24  ;;  %v4201_v37 = vor.u32 %v4846_v36, %v4200_v26  ;;  %v4862_v40 = vld [vmem:[#allocation3 + $0x164] sm:$0xf0]  ;;  %v4328_v50 = vld [vmem:[#allocation3 + $0x1e0] sm:$0xf]  ;;  %v4828_v55 = vld [vmem:[#allocation3 + $0x54] sm:$0xf0] }
 0x3e6   :  { %3102 = vmatpush.bf16.msra.mxu3 %v4337_v22  ;;  %v4265_v52 = vor.u32 %v4862_v40, %v4264_v4  ;;  %v4878_v53 = vld [vmem:[#allocation3 + $0x1e4] sm:$0xf0]  ;;  %v4192_v9 = vld [vmem:[#allocation3 + $0xd0] sm:$0xf]  ;;  %v4844_v30 = vld [vmem:[#allocation3 + $0xd4] sm:$0xf0]  ;;  %v4129_v23 = vor.u32 %v4828_v55, %v4128_v12 }
 0x3e7   :  { %v4329_v44 = vor.u32 %v4878_v53, %v4328_v50  ;;  %v4256_v46 = vld [vmem:[#allocation3 + $0x150] sm:$0xf]  ;;  %3064 = vmatpush.bf16.msra.mxu0 %v4137_v51  ;;  %v4860_v63 = vld [vmem:[#allocation3 + $0x154] sm:$0xf0]  ;;  %v4193_v47 = vor.u32 %v4844_v30, %v4192_v9  ;;  %v4120_v25 = vld [vmem:[#allocation3 + $0x40] sm:$0xf] }
 0x3e8   :  { %v4320_v20 = vld [vmem:[#allocation3 + $0x1d0] sm:$0xf]  ;;  %v4876_v28 = vld [vmem:[#allocation3 + $0x1d4] sm:$0xf0]  ;;  %3077 = vmatpush.bf16.msra.mxu1 %v4201_v37  ;;  %v4257_v59 = vor.u32 %v4860_v63, %v4256_v46  ;;  %v4826_v43 = vld [vmem:[#allocation3 + $0x44] sm:$0xf0] }
 0x3e9   :  { %3090 = vmatpush.bf16.msra.mxu2 %v4265_v52  ;;  %v4184_v2 = vld [vmem:[#allocation3 + $0xc0] sm:$0xf]  ;;  %v4321_v33 = vor.u32 %v4876_v28, %v4320_v20  ;;  %v4842_v54 = vld [vmem:[#allocation3 + $0xc4] sm:$0xf0]  ;;  %v4121_v5 = vor.u32 %v4826_v43, %v4120_v25  ;;  %v4112_v49 = vld [vmem:[#allocation3 + $0x30] sm:$0xf] }
 0x3ea   :  { %3103 = vmatpush.bf16.msra.mxu3 %v4329_v44  ;;  %v4248_v58 = vld [vmem:[#allocation3 + $0x140] sm:$0xf]  ;;  %v4858_v61 = vld [vmem:[#allocation3 + $0x144] sm:$0xf0]  ;;  %v4185_v11 = vor.u32 %v4842_v54, %v4184_v2  ;;  %v4824_v10 = vld [vmem:[#allocation3 + $0x34] sm:$0xf0] }
 0x3eb   :  { %v4312_v3 = vld [vmem:[#allocation3 + $0x1c0] sm:$0xf]  ;;  %v4874_v0 = vld [vmem:[#allocation3 + $0x1c4] sm:$0xf0]  ;;  %3065 = vmatpush.bf16.msra.mxu0 %v4129_v23  ;;  %v4249_v7 = vor.u32 %v4858_v61, %v4248_v58  ;;  %v4176_v13 = vld [vmem:[#allocation3 + $0xb0] sm:$0xf]  ;;  %v4113_v27 = vor.u32 %v4824_v10, %v4112_v49 }
 0x3ec   :  { %3078 = vmatpush.bf16.msra.mxu1 %v4193_v47  ;;  %v4313_v16 = vor.u32 %v4874_v0, %v4312_v3  ;;  %v4840_v14 = vld [vmem:[#allocation3 + $0xb4] sm:$0xf0]  ;;  %v4240_v19 = vld [vmem:[#allocation3 + $0x130] sm:$0xf]  ;;  %v4104_v32 = vld [vmem:[#allocation3 + $0x20] sm:$0xf] }
 0x3ed   :  { %3091 = vmatpush.bf16.msra.mxu2 %v4257_v59  ;;  %v4856_v38 = vld [vmem:[#allocation3 + $0x134] sm:$0xf0]  ;;  %v4304_v24 = vld [vmem:[#allocation3 + $0x1b0] sm:$0xf]  ;;  %v4177_v31 = vor.u32 %v4840_v14, %v4176_v13  ;;  %v4822_v26 = vld [vmem:[#allocation3 + $0x24] sm:$0xf0] }
 0x3ee   :  { %3104 = vmatpush.bf16.msra.mxu3 %v4321_v33  ;;  %v4872_v21 = vld [vmem:[#allocation3 + $0x1b4] sm:$0xf0]  ;;  %v4241_v22 = vor.u32 %v4856_v38, %v4240_v19  ;;  %v4168_v36 = vld [vmem:[#allocation3 + $0xa0] sm:$0xf]  ;;  %v4838_v37 = vld [vmem:[#allocation3 + $0xa4] sm:$0xf0]  ;;  %v4105_v53 = vor.u32 %v4822_v26, %v4104_v32 }
 0x3ef   :  { %3066 = vmatpush.bf16.msra.mxu0 %v4121_v5  ;;  %v4305_v51 = vor.u32 %v4872_v21, %v4304_v24  ;;  %v4232_v4 = vld [vmem:[#allocation3 + $0x120] sm:$0xf]  ;;  %v4854_v40 = vld [vmem:[#allocation3 + $0x124] sm:$0xf0]  ;;  %v4169_v12 = vor.u32 %v4838_v37, %v4168_v36  ;;  %v4096_v44 = vld [vmem:[#allocation3 + $0x10] sm:$0xf] }
 0x3f0   :  { %3079 = vmatpush.bf16.msra.mxu1 %v4185_v11  ;;  %v4296_v50 = vld [vmem:[#allocation3 + $0x1a0] sm:$0xf]  ;;  %v4870_v52 = vld [vmem:[#allocation3 + $0x1a4] sm:$0xf0]  ;;  %v4233_v55 = vor.u32 %v4854_v40, %v4232_v4  ;;  %v4820_v9 = vld [vmem:[#allocation3 + $0x14] sm:$0xf0] }
 0x3f1   :  { %3092 = vmatpush.bf16.msra.mxu2 %v4249_v7  ;;  %v4160_v30 = vld [vmem:[#allocation3 + $0x90] sm:$0xf]  ;;  %v4297_v46 = vor.u32 %v4870_v52, %v4296_v50  ;;  %v4836_v23 = vld [vmem:[#allocation3 + $0x94] sm:$0xf0]  ;;  %v4097_v59 = vor.u32 %v4820_v9, %v4096_v44  ;;  %v4088_v25 = vld [vmem:[#allocation3] sm:$0xf]  ;;  %v5857_v44 = vpack.c.bf16 %v2270_v8, %v2270_v8  ;;  %v5862_v9 = vpack.c.bf16 %v2273_v41, %v2273_v41 }
 0x3f2   :  { %3105 = vmatpush.bf16.msra.mxu3 %v4313_v16  ;;  %v4224_v63 = vld [vmem:[#allocation3 + $0x110] sm:$0xf]  ;;  %v4852_v20 = vld [vmem:[#allocation3 + $0x114] sm:$0xf0]  ;;  %v4818_v43 = vld [vmem:[#allocation3 + $0x4] sm:$0xf0]  ;;  %v4161_v2 = vor.u32 %v4836_v23, %v4160_v30 }
 0x3f3   :  { %3067 = vmatpush.bf16.msra.mxu0 %v4113_v27  ;;  %v4288_v28 = vld [vmem:[#allocation3 + $0x190] sm:$0xf]  ;;  %v4868_v47 = vld [vmem:[#allocation3 + $0x194] sm:$0xf0]  ;;  %v4225_v33 = vor.u32 %v4852_v20, %v4224_v63  ;;  %v4152_v54 = vld [vmem:[#allocation3 + $0x80] sm:$0xf]  ;;  %v4089_v13 = vor.u32 %v4818_v43, %v4088_v25 }
 0x3f4   :  { %3080 = vmatpush.bf16.msra.mxu1 %v4177_v31  ;;  %v4834_v58 = vld [vmem:[#allocation3 + $0x84] sm:$0xf0]  ;;  %v4216_v61 = vld [vmem:[#allocation3 + $0x100] sm:$0xf]  ;;  %v4289_v3 = vor.u32 %v4868_v47, %v4288_v28  ;;  %v4400_v7 = vld [vmem:[#allocation3 + $0x270] sm:$0xf] }
 0x3f5   :  { %3093 = vmatpush.bf16.msra.mxu2 %v4241_v22  ;;  %v4850_v0 = vld [vmem:[#allocation3 + $0x104] sm:$0xf0]  ;;  %v4280_v5 = vld [vmem:[#allocation3 + $0x180] sm:$0xf]  ;;  %v4896_v49 = vld [vmem:[#allocation3 + $0x274] sm:$0xf0]  ;;  %v4153_v38 = vor.u32 %v4834_v58, %v4152_v54 }
 0x3f6   :  { %3106 = vmatpush.bf16.msra.mxu3 %v4305_v51  ;;  %v4866_v11 = vld [vmem:[#allocation3 + $0x184] sm:$0xf0]  ;;  %v4464_v10 = vld [vmem:[#allocation3 + $0x2f0] sm:$0xf]  ;;  %v4912_v16 = vld [vmem:[#allocation3 + $0x2f4] sm:$0xf0]  ;;  %v4217_v24 = vor.u32 %v4850_v0, %v4216_v61  ;;  %v4401_v22 = vor.u32 %v4896_v49, %v4400_v7 }
 0x3f7   :  { %3068 = vmatpush.bf16.msra.mxu0 %v4105_v53  ;;  %v4528_v14 = vld [vmem:[#allocation3 + $0x370] sm:$0xf]  ;;  %v4928_v19 = vld [vmem:[#allocation3 + $0x374] sm:$0xf0]  ;;  %v4281_v31 = vor.u32 %v4866_v11, %v4280_v5  ;;  %v4465_v32 = vor.u32 %v4912_v16, %v4464_v10  ;;  %v4392_v36 = vld [vmem:[#allocation3 + $0x260] sm:$0xf]  ;;  %v5852_v53 = vpack.c.bf16 %v2272_v62, %v2272_v62  ;;  %v5867_v62 = vpack.c.bf16 %v2271_v39, %v2271_v39 }
 0x3f8   :  { %3081 = vmatpush.bf16.msra.mxu1 %v4169_v12  ;;  %v4592_v21 = vld [vmem:[#allocation3 + $0x3f0] sm:$0xf]  ;;  %v4944_v27 = vld [vmem:[#allocation3 + $0x3f4] sm:$0xf0]  ;;  %v4529_v26 = vor.u32 %v4928_v19, %v4528_v14  ;;  %v4894_v51 = vld [vmem:[#allocation3 + $0x264] sm:$0xf0] }
 0x3f9   :  { %3094 = vmatpush.bf16.msra.mxu2 %v4233_v55  ;;  %v4456_v37 = vld [vmem:[#allocation3 + $0x2e0] sm:$0xf]  ;;  %v4593_v4 = vor.u32 %v4944_v27, %v4592_v21  ;;  %v4910_v40 = vld [vmem:[#allocation3 + $0x2e4] sm:$0xf0]  ;;  %v4393_v34 = vor.u32 %v4894_v51, %v4392_v36  ;;  %v4892_v8 = vld [vmem:[#allocation3 + $0x254] sm:$0xf0] }
 0x3fa   :  { %3107 = vmatpush.bf16.msra.mxu3 %v4297_v46  ;;  %v4520_v50 = vld [vmem:[#allocation3 + $0x360] sm:$0xf]  ;;  %v4926_v52 = vld [vmem:[#allocation3 + $0x364] sm:$0xf0]  ;;  %v4457_v30 = vor.u32 %v4910_v40, %v4456_v37  ;;  %v4384_v46 = vld [vmem:[#allocation3 + $0x250] sm:$0xf] }
 0x3fb   :  { %3069 = vmatpush.bf16.msra.mxu0 %v4097_v59  ;;  %v4584_v12 = vld [vmem:[#allocation3 + $0x3e0] sm:$0xf]  ;;  %v4942_v55 = vld [vmem:[#allocation3 + $0x3e4] sm:$0xf0]  ;;  %v4521_v6 = vor.u32 %v4926_v52, %v4520_v50  ;;  %v4448_v23 = vld [vmem:[#allocation3 + $0x2d0] sm:$0xf]  ;;  %v4385_v15 = vor.u32 %v4892_v8, %v4384_v46 }
 0x3fc   :  { %3082 = vmatpush.bf16.msra.mxu1 %v4161_v2  ;;  %v4585_v1 = vor.u32 %v4942_v55, %v4584_v12  ;;  %v4908_v63 = vld [vmem:[#allocation3 + $0x2d4] sm:$0xf0]  ;;  %v4512_v41 = vld [vmem:[#allocation3 + $0x350] sm:$0xf]  ;;  %v4376_v25 = vld [vmem:[#allocation3 + $0x240] sm:$0xf] }
 0x3fd   :  { %3095 = vmatpush.bf16.msra.mxu2 %v4225_v33  ;;  %v4924_v20 = vld [vmem:[#allocation3 + $0x354] sm:$0xf0]  ;;  %v4576_v28 = vld [vmem:[#allocation3 + $0x3d0] sm:$0xf]  ;;  %v4449_v39 = vor.u32 %v4908_v63, %v4448_v23  ;;  %v4890_v43 = vld [vmem:[#allocation3 + $0x244] sm:$0xf0] }
 0x3fe   :  { %3108 = vmatpush.bf16.msra.mxu3 %v4289_v3  ;;  %v4940_v47 = vld [vmem:[#allocation3 + $0x3d4] sm:$0xf0]  ;;  %v4513_v59 = vor.u32 %v4924_v20, %v4512_v41  ;;  %v4440_v2 = vld [vmem:[#allocation3 + $0x2c0] sm:$0xf]  ;;  %v4906_v54 = vld [vmem:[#allocation3 + $0x2c4] sm:$0xf0]  ;;  %v4377_v5 = vor.u32 %v4890_v43, %v4376_v25 }
 0x3ff   :  { %3070 = vmatpush.bf16.msra.mxu0 %v4089_v13  ;;  %v4577_v33 = vor.u32 %v4940_v47, %v4576_v28  ;;  %v4504_v58 = vld [vmem:[#allocation3 + $0x340] sm:$0xf]  ;;  %v4922_v61 = vld [vmem:[#allocation3 + $0x344] sm:$0xf0]  ;;  %v4441_v11 = vor.u32 %v4906_v54, %v4440_v2  ;;  %v4368_v49 = vld [vmem:[#allocation3 + $0x230] sm:$0xf] }
 0x400   :  { %3083 = vmatpush.bf16.msra.mxu1 %v4153_v38  ;;  %v4568_v3 = vld [vmem:[#allocation3 + $0x3c0] sm:$0xf]  ;;  %v4938_v0 = vld [vmem:[#allocation3 + $0x3c4] sm:$0xf0]  ;;  %v4505_v7 = vor.u32 %v4922_v61, %v4504_v58  ;;  %v4888_v10 = vld [vmem:[#allocation3 + $0x234] sm:$0xf0] }
 0x401   :  { %3096 = vmatpush.bf16.msra.mxu2 %v4217_v24  ;;  %v4432_v13 = vld [vmem:[#allocation3 + $0x2b0] sm:$0xf]  ;;  %v4569_v16 = vor.u32 %v4938_v0, %v4568_v3  ;;  %v4904_v14 = vld [vmem:[#allocation3 + $0x2b4] sm:$0xf0]  ;;  %v4369_v27 = vor.u32 %v4888_v10, %v4368_v49  ;;  %v4424_v36 = vld [vmem:[#allocation3 + $0x2a0] sm:$0xf] }
 0x402   :  { %3109 = vmatpush.bf16.msra.mxu3 %v4281_v31  ;;  %3071 = vmatmul.bf16.vlgmr.msra.gmra.mxu0 %v5857_v44  ;;  %v4496_v19 = vld [vmem:[#allocation3 + $0x330] sm:$0xf]  ;;  %v4920_v38 = vld [vmem:[#allocation3 + $0x334] sm:$0xf0]  ;;  %v4433_v31 = vor.u32 %v4904_v14, %v4432_v13  ;;  %v4902_v37 = vld [vmem:[#allocation3 + $0x2a4] sm:$0xf0] }
 0x403   :  { %3115 = vmatpush.bf16.msrb.mxu0 %v4401_v22  ;;  %3084 = vmatmul.bf16.vlgmr.msra.gmra.mxu1 %v5867_v62  ;;  %v4560_v24 = vld [vmem:[#allocation3 + $0x3b0] sm:$0xf]  ;;  %v4936_v21 = vld [vmem:[#allocation3 + $0x3b4] sm:$0xf0]  ;;  %v4497_v22 = vor.u32 %v4920_v38, %v4496_v19  ;;  %v4918_v40 = vld [vmem:[#allocation3 + $0x324] sm:$0xf0]  ;;  %v4425_v55 = vor.u32 %v4902_v37, %v4424_v36 }
 0x404   :  { %3128 = vmatpush.bf16.msrb.mxu1 %v4465_v32  ;;  %3097 = vmatmul.bf16.vlgmr.msra.gmra.mxu2 %v5852_v53  ;;  %v4360_v32 = vld [vmem:[#allocation3 + $0x220] sm:$0xf]  ;;  %v4561_v51 = vor.u32 %v4936_v21, %v4560_v24  ;;  %v4934_v52 = vld [vmem:[#allocation3 + $0x3a4] sm:$0xf0]  ;;  %v4416_v46 = vld [vmem:[#allocation3 + $0x290] sm:$0xf] }
 0x405   :  { %3141 = vmatpush.bf16.msrb.mxu2 %v4529_v26  ;;  %3110 = vmatmul.bf16.vlgmr.msra.gmra.mxu3 %v5862_v9  ;;  %v4886_v26 = vld [vmem:[#allocation3 + $0x224] sm:$0xf0]  ;;  %v4552_v50 = vld [vmem:[#allocation3 + $0x3a0] sm:$0xf]  ;;  %v4900_v23 = vld [vmem:[#allocation3 + $0x294] sm:$0xf0] }
 0x406   :  { %3154 = vmatpush.bf16.msrb.mxu3 %v4593_v4  ;;  %v4488_v4 = vld [vmem:[#allocation3 + $0x320] sm:$0xf]  ;;  %v4361_v12 = vor.u32 %v4886_v26, %v4360_v32  ;;  %v4553_v8 = vor.u32 %v4934_v52, %v4552_v50  ;;  %v4916_v63 = vld [vmem:[#allocation3 + $0x314] sm:$0xf0]  ;;  %v4544_v41 = vld [vmem:[#allocation3 + $0x390] sm:$0xf]  ;;  %v5881_v52 = vpack.c.bf16 %v2274_v29, %v2274_v29 }
 0x407   :  { %3116 = vmatpush.bf16.msrb.mxu0 %v4393_v34  ;;  %v4489_v34 = vor.u32 %v4918_v40, %v4488_v4  ;;  %v4932_v20 = vld [vmem:[#allocation3 + $0x394] sm:$0xf0]  ;;  %v4344_v47 = vld [vmem:[#allocation3 + $0x200] sm:$0xf]  ;;  %v4898_v43 = vld [vmem:[#allocation3 + $0x284] sm:$0xf0]  ;;  %v5876_v4 = vpack.c.bf16 %v2276_v35, %v2276_v35  ;;  %v5891_v35 = vpack.c.bf16 %v2275_v56, %v2275_v56 }
 0x408   :  { %3129 = vmatpush.bf16.msrb.mxu1 %v4457_v30  ;;  %v4352_v30 = vld [vmem:[#allocation3 + $0x210] sm:$0xf]  ;;  %v4408_v25 = vld [vmem:[#allocation3 + $0x280] sm:$0xf]  ;;  %v4914_v54 = vld [vmem:[#allocation3 + $0x304] sm:$0xf0] }
 0x409   :  { %3142 = vmatpush.bf16.msrb.mxu2 %v4521_v6  ;;  %v4884_v6 = vld [vmem:[#allocation3 + $0x214] sm:$0xf0]  ;;  %v4472_v2 = vld [vmem:[#allocation3 + $0x300] sm:$0xf]  ;;  %v4930_v61 = vld [vmem:[#allocation3 + $0x384] sm:$0xf0]  ;;  %v4409_v13 = vor.u32 %v4898_v43, %v4408_v25 }
 0x40a   :  { %3155 = vmatpush.bf16.msrb.mxu3 %v4585_v1  ;;  %v4480_v1 = vld [vmem:[#allocation3 + $0x310] sm:$0xf]  ;;  %v4353_v28 = vor.u32 %v4884_v6, %v4352_v30  ;;  %v4536_v58 = vld [vmem:[#allocation3 + $0x380] sm:$0xf]  ;;  %v4831_v3 = vld [vmem:[#allocation3 + $0x74] sm:$0xf] }
 0x40b   :  { %3117 = vmatpush.bf16.msrb.mxu0 %v4385_v15  ;;  %v4882_v15 = vld [vmem:[#allocation3 + $0x204] sm:$0xf0]  ;;  %v4146_v0 = vld [vmem:[#allocation3 + $0x78] sm:$0xf0]  ;;  %v4863_v49 = vld [vmem:[#allocation3 + $0x174] sm:$0xf]  ;;  %v4537_v38 = vor.u32 %v4930_v61, %v4536_v58 }
 0x40c   :  { %3130 = vmatpush.bf16.msrb.mxu1 %v4449_v39  ;;  %v4417_v39 = vor.u32 %v4900_v23, %v4416_v46  ;;  %v4274_v10 = vld [vmem:[#allocation3 + $0x178] sm:$0xf0]  ;;  %v4879_v14 = vld [vmem:[#allocation3 + $0x1f4] sm:$0xf]  ;;  %v4149_v24 = vor.u32 %v4831_v3, %v4146_v0  ;;  %v4845_v32 = vld [vmem:[#allocation3 + $0xe4] sm:$0xf] }
 0x40d   :  { %3143 = vmatpush.bf16.msrb.mxu2 %v4513_v59  ;;  %v4481_v59 = vor.u32 %v4916_v63, %v4480_v1  ;;  %v4338_v19 = vld [vmem:[#allocation3 + $0x1f8] sm:$0xf0]  ;;  %v4202_v36 = vld [vmem:[#allocation3 + $0xe8] sm:$0xf0]  ;;  %v4877_v40 = vld [vmem:[#allocation3 + $0x1e4] sm:$0xf] }
 0x40e   :  { %3156 = vmatpush.bf16.msrb.mxu3 %v4577_v33  ;;  %v4545_v33 = vor.u32 %v4932_v20, %v4544_v41  ;;  %v4341_v26 = vor.u32 %v4879_v14, %v4338_v19  ;;  %v4266_v37 = vld [vmem:[#allocation3 + $0x168] sm:$0xf0]  ;;  %v4130_v29 = vld [vmem:[#allocation3 + $0x58] sm:$0xf0]  ;;  %v4843_v30 = vld [vmem:[#allocation3 + $0xd4] sm:$0xf] }
 0x40f   :  { %3118 = vmatpush.bf16.msrb.mxu0 %v4377_v5  ;;  %v4847_v5 = vld [vmem:[#allocation3 + $0xf4] sm:$0xf]  ;;  %v4330_v50 = vld [vmem:[#allocation3 + $0x1e8] sm:$0xf0]  ;;  %v4258_v46 = vld [vmem:[#allocation3 + $0x158] sm:$0xf0] }
 0x410   :  { %3131 = vmatpush.bf16.msrb.mxu1 %v4441_v11  ;;  %v4345_v11 = vor.u32 %v4882_v15, %v4344_v47  ;;  %v4333_v57 = vor.u32 %v4877_v40, %v4330_v50  ;;  %v4859_v6 = vld [vmem:[#allocation3 + $0x154] sm:$0xf]  ;;  %v4322_v56 = vld [vmem:[#allocation3 + $0x1d8] sm:$0xf0]  ;;  %v4825_v63 = vld [vmem:[#allocation3 + $0x44] sm:$0xf] }
 0x411   :  { %3144 = vmatpush.bf16.msrb.mxu2 %v4505_v7  ;;  %v4210_v7 = vld [vmem:[#allocation3 + $0xf8] sm:$0xf0]  ;;  %v4875_v42 = vld [vmem:[#allocation3 + $0x1d4] sm:$0xf]  ;;  %v4261_v1 = vor.u32 %v4859_v6, %v4258_v46  ;;  %v4122_v41 = vld [vmem:[#allocation3 + $0x48] sm:$0xf0] }
 0x412   :  { %3157 = vmatpush.bf16.msrb.mxu3 %v4569_v16  ;;  %v4473_v16 = vor.u32 %v4914_v54, %v4472_v2  ;;  %v4213_v21 = vor.u32 %v4847_v5, %v4210_v7  ;;  %v4841_v20 = vld [vmem:[#allocation3 + $0xc4] sm:$0xf]  ;;  %v4186_v47 = vld [vmem:[#allocation3 + $0xc8] sm:$0xf0]  ;;  %v4125_v43 = vor.u32 %v4825_v63, %v4122_v41  ;;  %v4823_v54 = vld [vmem:[#allocation3 + $0x34] sm:$0xf] }
 0x413   :  { %3119 = vmatpush.bf16.msrb.mxu0 %v4369_v27  ;;  %v4277_v27 = vor.u32 %v4863_v49, %v4274_v10  ;;  %v4857_v15 = vld [vmem:[#allocation3 + $0x144] sm:$0xf]  ;;  %v4314_v25 = vld [vmem:[#allocation3 + $0x1c8] sm:$0xf0]  ;;  %v4189_v2 = vor.u32 %v4841_v20, %v4186_v47  ;;  %v4114_v58 = vld [vmem:[#allocation3 + $0x38] sm:$0xf0] }
 0x414   :  { %3132 = vmatpush.bf16.msrb.mxu1 %v4433_v31  ;;  %v4829_v31 = vld [vmem:[#allocation3 + $0x64] sm:$0xf]  ;;  %v4839_v61 = vld [vmem:[#allocation3 + $0xb4] sm:$0xf]  ;;  %v4178_v0 = vld [vmem:[#allocation3 + $0xb8] sm:$0xf0]  ;;  %v4117_v10 = vor.u32 %v4823_v54, %v4114_v58 }
 0x415   :  { %3145 = vmatpush.bf16.msrb.mxu2 %v4497_v22  ;;  %v4138_v22 = vld [vmem:[#allocation3 + $0x68] sm:$0xf0]  ;;  %v4855_v5 = vld [vmem:[#allocation3 + $0x134] sm:$0xf]  ;;  %v4306_v49 = vld [vmem:[#allocation3 + $0x1b8] sm:$0xf0] }
 0x416   :  { %3158 = vmatpush.bf16.msrb.mxu3 %v4561_v51  ;;  %v4861_v51 = vld [vmem:[#allocation3 + $0x164] sm:$0xf]  ;;  %v4141_v60 = vor.u32 %v4829_v31, %v4138_v22  ;;  %v4871_v7 = vld [vmem:[#allocation3 + $0x1b4] sm:$0xf]  ;;  %v4106_v19 = vld [vmem:[#allocation3 + $0x28] sm:$0xf0] }
 0x417   :  { %3120 = vmatpush.bf16.msrb.mxu0 %v4361_v12  ;;  %v5886_v12 = vpack.c.bf16 %v2277_v48, %v2277_v48  ;;  %v4269_v45 = vor.u32 %v4861_v51, %v4266_v37  ;;  %v4194_v48 = vld [vmem:[#allocation3 + $0xd8] sm:$0xf0]  ;;  %v4821_v14 = vld [vmem:[#allocation3 + $0x24] sm:$0xf]  ;;  %v4234_v31 = vld [vmem:[#allocation3 + $0x128] sm:$0xf0] }
 0x418   :  { %3133 = vmatpush.bf16.msrb.mxu1 %v4425_v55  ;;  %v4205_v55 = vor.u32 %v4845_v32, %v4202_v36  ;;  %v4197_v23 = vor.u32 %v4843_v30, %v4194_v48  ;;  %v4869_v22 = vld [vmem:[#allocation3 + $0x1a4] sm:$0xf]  ;;  %v4298_v32 = vld [vmem:[#allocation3 + $0x1a8] sm:$0xf0]  ;;  %v4819_v37 = vld [vmem:[#allocation3 + $0x14] sm:$0xf] }
 0x419   :  { %3146 = vmatpush.bf16.msrb.mxu2 %v4489_v34  ;;  %v4827_v34 = vld [vmem:[#allocation3 + $0x54] sm:$0xf]  ;;  %v4098_v40 = vld [vmem:[#allocation3 + $0x18] sm:$0xf0]  ;;  %v4817_v48 = vld [vmem:[#allocation3 + $0x4] sm:$0xf] }
 0x41a   :  { %3159 = vmatpush.bf16.msrb.mxu3 %v4553_v8  ;;  %v4133_v8 = vor.u32 %v4827_v34, %v4130_v29  ;;  %v4835_v50 = vld [vmem:[#allocation3 + $0x94] sm:$0xf]  ;;  %v4226_v34 = vld [vmem:[#allocation3 + $0x118] sm:$0xf0]  ;;  %v4090_v6 = vld [vmem:[#allocation3 + $0x8] sm:$0xf0] }
 0x41b   :  { %3121 = vmatpush.bf16.msrb.mxu0 %v4353_v28  ;;  %v4325_v28 = vor.u32 %v4875_v42, %v4322_v56  ;;  %v4867_v29 = vld [vmem:[#allocation3 + $0x194] sm:$0xf]  ;;  %v4290_v30 = vld [vmem:[#allocation3 + $0x198] sm:$0xf0]  ;;  %v4833_v56 = vld [vmem:[#allocation3 + $0x84] sm:$0xf] }
 0x41c   :  { %3134 = vmatpush.bf16.msrb.mxu1 %v4417_v39  ;;  %v4250_v39 = vld [vmem:[#allocation3 + $0x148] sm:$0xf0]  ;;  %v4865_v41 = vld [vmem:[#allocation3 + $0x184] sm:$0xf]  ;;  %v4402_v47 = vld [vmem:[#allocation3 + $0x278] sm:$0xf0] }
 0x41d   :  { %3147 = vmatpush.bf16.msrb.mxu2 %v4481_v59  ;;  %v4873_v59 = vld [vmem:[#allocation3 + $0x1c4] sm:$0xf]  ;;  %v4218_v63 = vld [vmem:[#allocation3 + $0x108] sm:$0xf0]  ;;  %v4943_v54 = vld [vmem:[#allocation3 + $0x3f4] sm:$0xf] }
 0x41e   :  { %3160 = vmatpush.bf16.msrb.mxu3 %v4545_v33  ;;  %v4253_v33 = vor.u32 %v4857_v15, %v4250_v39  ;;  %v4317_v3 = vor.u32 %v4873_v59, %v4314_v25  ;;  %v4282_v20 = vld [vmem:[#allocation3 + $0x188] sm:$0xf0]  ;;  %v4911_v15 = vld [vmem:[#allocation3 + $0x2f4] sm:$0xf]  ;;  %v4093_v39 = vor.u32 %v4817_v48, %v4090_v6  ;;  %v4466_v59 = vld [vmem:[#allocation3 + $0x2f8] sm:$0xf0] }
 0x41f   :  { %3122 = vmatpush.bf16.msrb.mxu0 %v4345_v11  ;;  %v4242_v11 = vld [vmem:[#allocation3 + $0x138] sm:$0xf0]  ;;  %v4927_v25 = vld [vmem:[#allocation3 + $0x374] sm:$0xf]  ;;  %v4921_v48 = vld [vmem:[#allocation3 + $0x344] sm:$0xf] }
 0x420   :  { %3135 = vmatpush.bf16.msrb.mxu1 %v4409_v13  ;;  %v4181_v13 = vor.u32 %v4839_v61, %v4178_v0  ;;  %v4594_v58 = vld [vmem:[#allocation3 + $0x3f8] sm:$0xf0]  ;;  %v4285_v61 = vor.u32 %v4865_v41, %v4282_v20  ;;  %v4469_v0 = vor.u32 %v4911_v15, %v4466_v59  ;;  %v4937_v6 = vld [vmem:[#allocation3 + $0x3c4] sm:$0xf]  ;;  %v4919_v41 = vld [vmem:[#allocation3 + $0x334] sm:$0xf] }
 0x421   :  { %3148 = vmatpush.bf16.msrb.mxu2 %v4473_v16  ;;  %v4245_v16 = vor.u32 %v4855_v5, %v4242_v11  ;;  %v4893_v11 = vld [vmem:[#allocation3 + $0x264] sm:$0xf]  ;;  %v4498_v20 = vld [vmem:[#allocation3 + $0x338] sm:$0xf0] }
 0x422   :  { %3161 = vmatpush.bf16.msrb.mxu3 %v4537_v38  ;;  %3123 = vmatmul.bf16.vlgmr.msrb.gmra.mxu0 %v5881_v52  ;;  %v4837_v38 = vld [vmem:[#allocation3 + $0xa4] sm:$0xf]  ;;  %v4501_v59 = vor.u32 %v4919_v41, %v4498_v20 }
 0x423   :  { %3167 = vmatpush.bf16.msra.mxu0 %v4149_v24  ;;  %3136 = vmatmul.bf16.vlgmr.msrb.gmra.mxu1 %v5891_v35  ;;  %v4309_v24 = vor.u32 %v4871_v7, %v4306_v49  ;;  %v4394_v7 = vld [vmem:[#allocation3 + $0x268] sm:$0xf0]  ;;  %v4909_v49 = vld [vmem:[#allocation3 + $0x2e4] sm:$0xf] }
 0x424   :  { %3180 = vmatpush.bf16.msra.mxu1 %v4213_v21  ;;  %3149 = vmatmul.bf16.vlgmr.msrb.gmra.mxu2 %v5876_v4  ;;  %v4170_v21 = vld [vmem:[#allocation3 + $0xa8] sm:$0xf0] }
 0x425   :  { %3193 = vmatpush.bf16.msra.mxu2 %v4277_v27  ;;  %3162 = vmatmul.bf16.vlgmr.msrb.gmra.mxu3 %v5886_v12  ;;  %v4853_v27 = vld [vmem:[#allocation3 + $0x124] sm:$0xf]  ;;  %v4173_v36 = vor.u32 %v4837_v38, %v4170_v21  ;;  %v4586_v38 = vld [vmem:[#allocation3 + $0x3e8] sm:$0xf0] }
 0x426   :  { %3206 = vmatpush.bf16.msra.mxu3 %v4341_v26  ;;  %v4109_v26 = vor.u32 %v4821_v14, %v4106_v19  ;;  %v4237_v51 = vor.u32 %v4853_v27, %v4234_v31  ;;  %v4522_v14 = vld [vmem:[#allocation3 + $0x368] sm:$0xf0]  ;;  %v4941_v19 = vld [vmem:[#allocation3 + $0x3e4] sm:$0xf]  ;;  %v4891_v31 = vld [vmem:[#allocation3 + $0x254] sm:$0xf] }
 0x427   :  { %3168 = vmatpush.bf16.msra.mxu0 %v4141_v60  ;;  %v4301_v60 = vor.u32 %v4869_v22, %v4298_v32  ;;  %v4386_v22 = vld [vmem:[#allocation3 + $0x258] sm:$0xf0]  ;;  %v4907_v32 = vld [vmem:[#allocation3 + $0x2d4] sm:$0xf] }
 0x428   :  { %3181 = vmatpush.bf16.msra.mxu1 %v4205_v55  ;;  %v4162_v55 = vld [vmem:[#allocation3 + $0x98] sm:$0xf0] }
 0x429   :  { %3194 = vmatpush.bf16.msra.mxu2 %v4269_v45  ;;  %v4851_v45 = vld [vmem:[#allocation3 + $0x114] sm:$0xf]  ;;  %v4165_v46 = vor.u32 %v4835_v50, %v4162_v55  ;;  %v4578_v50 = vld [vmem:[#allocation3 + $0x3d8] sm:$0xf0] }
 0x42a   :  { %3207 = vmatpush.bf16.msra.mxu3 %v4333_v57  ;;  %v4101_v57 = vor.u32 %v4819_v37, %v4098_v40  ;;  %v4229_v42 = vor.u32 %v4851_v45, %v4226_v34  ;;  %v4514_v37 = vld [vmem:[#allocation3 + $0x358] sm:$0xf0]  ;;  %v4939_v40 = vld [vmem:[#allocation3 + $0x3d4] sm:$0xf]  ;;  %v4889_v34 = vld [vmem:[#allocation3 + $0x244] sm:$0xf] }
 0x42b   :  { %3169 = vmatpush.bf16.msra.mxu0 %v4133_v8  ;;  %v4154_v8 = vld [vmem:[#allocation3 + $0x88] sm:$0xf0] }
 0x42c   :  { %3182 = vmatpush.bf16.msra.mxu1 %v4197_v23  ;;  %v4849_v23 = vld [vmem:[#allocation3 + $0x104] sm:$0xf] }
 0x42d   :  { %3195 = vmatpush.bf16.msra.mxu2 %v4261_v1  ;;  %v4293_v1 = vor.u32 %v4867_v29, %v4290_v30  ;;  %v4378_v29 = vld [vmem:[#allocation3 + $0x248] sm:$0xf0]  ;;  %v4581_v30 = vor.u32 %v4939_v40, %v4578_v50  ;;  %v4913_v40 = vld [vmem:[#allocation3 + $0x304] sm:$0xf] }
 0x42e   :  { %3208 = vmatpush.bf16.msra.mxu3 %v4325_v28  ;;  %v4895_v28 = vld [vmem:[#allocation3 + $0x274] sm:$0xf]  ;;  %v4474_v50 = vld [vmem:[#allocation3 + $0x308] sm:$0xf0] }
 0x42f   :  { %3170 = vmatpush.bf16.msra.mxu0 %v4125_v43  ;;  %v4530_v43 = vld [vmem:[#allocation3 + $0x378] sm:$0xf0] }
 0x430   :  { %3183 = vmatpush.bf16.msra.mxu1 %v4189_v2  ;;  %v4157_v2 = vor.u32 %v4833_v56, %v4154_v8  ;;  %v4533_v5 = vor.u32 %v4927_v25, %v4530_v43  ;;  %v4887_v56 = vld [vmem:[#allocation3 + $0x234] sm:$0xf]  ;;  %v4370_v8 = vld [vmem:[#allocation3 + $0x238] sm:$0xf0]  ;;  %v4885_v25 = vld [vmem:[#allocation3 + $0x224] sm:$0xf] }
 0x431   :  { %3196 = vmatpush.bf16.msra.mxu2 %v4253_v33  ;;  %v4221_v33 = vor.u32 %v4849_v23, %v4218_v63  ;;  %v4903_v23 = vld [vmem:[#allocation3 + $0x2b4] sm:$0xf]  ;;  %v4434_v63 = vld [vmem:[#allocation3 + $0x2b8] sm:$0xf0]  ;;  %v4373_v15 = vor.u32 %v4887_v56, %v4370_v8  ;;  %v4362_v43 = vld [vmem:[#allocation3 + $0x228] sm:$0xf0] }
 0x432   :  { %3209 = vmatpush.bf16.msra.mxu3 %v4317_v3  ;;  %v4405_v3 = vor.u32 %v4895_v28, %v4402_v47  ;;  %v4935_v28 = vld [vmem:[#allocation3 + $0x3b4] sm:$0xf]  ;;  %v4562_v47 = vld [vmem:[#allocation3 + $0x3b8] sm:$0xf0] }
 0x433   :  { %3171 = vmatpush.bf16.msra.mxu0 %v4117_v10  ;;  %v4597_v10 = vor.u32 %v4943_v54, %v4594_v58  ;;  %v4426_v54 = vld [vmem:[#allocation3 + $0x2a8] sm:$0xf0]  ;;  %v4917_v58 = vld [vmem:[#allocation3 + $0x324] sm:$0xf] }
 0x434   :  { %3184 = vmatpush.bf16.msra.mxu1 %v4181_v13  ;;  %v4458_v13 = vld [vmem:[#allocation3 + $0x2e8] sm:$0xf0] }
 0x435   :  { %3197 = vmatpush.bf16.msra.mxu2 %v4245_v16  ;;  %v4925_v16 = vld [vmem:[#allocation3 + $0x364] sm:$0xf]  ;;  %v4461_v21 = vor.u32 %v4909_v49, %v4458_v13  ;;  %v4883_v49 = vld [vmem:[#allocation3 + $0x214] sm:$0xf] }
 0x436   :  { %3210 = vmatpush.bf16.msra.mxu3 %v4309_v24  ;;  %v4397_v24 = vor.u32 %v4893_v11, %v4394_v7  ;;  %v4525_v27 = vor.u32 %v4925_v16, %v4522_v14  ;;  %v4899_v13 = vld [vmem:[#allocation3 + $0x294] sm:$0xf]  ;;  %v4418_v14 = vld [vmem:[#allocation3 + $0x298] sm:$0xf0] }
 0x437   :  { %3172 = vmatpush.bf16.msra.mxu0 %v4109_v26  ;;  %v4589_v26 = vor.u32 %v4941_v19, %v4586_v38  ;;  %v4915_v19 = vld [vmem:[#allocation3 + $0x314] sm:$0xf]  ;;  %v4482_v38 = vld [vmem:[#allocation3 + $0x318] sm:$0xf0] }
 0x438   :  { %3185 = vmatpush.bf16.msra.mxu1 %v4173_v36  ;;  %v4450_v36 = vld [vmem:[#allocation3 + $0x2d8] sm:$0xf0] }
 0x439   :  { %3198 = vmatpush.bf16.msra.mxu2 %v4237_v51  ;;  %v4923_v51 = vld [vmem:[#allocation3 + $0x354] sm:$0xf]  ;;  %v4453_v55 = vor.u32 %v4907_v32, %v4450_v36  ;;  %v4881_v32 = vld [vmem:[#allocation3 + $0x204] sm:$0xf] }
 0x43a   :  { %3211 = vmatpush.bf16.msra.mxu3 %v4301_v60  ;;  %v4389_v60 = vor.u32 %v4891_v31, %v4386_v22  ;;  %v4517_v45 = vor.u32 %v4923_v51, %v4514_v37  ;;  %v4421_v31 = vor.u32 %v4899_v13, %v4418_v14  ;;  %v4485_v22 = vor.u32 %v4915_v19, %v4482_v38  ;;  %v4897_v36 = vld [vmem:[#allocation3 + $0x284] sm:$0xf]  ;;  %v4410_v37 = vld [vmem:[#allocation3 + $0x288] sm:$0xf0] }
 0x43b   :  { %3173 = vmatpush.bf16.msra.mxu0 %v4101_v57  ;;  %v4442_v57 = vld [vmem:[#allocation3 + $0x2c8] sm:$0xf0] }
 0x43c   :  { %3186 = vmatpush.bf16.msra.mxu1 %v4165_v46  ;;  %v4570_v46 = vld [vmem:[#allocation3 + $0x3c8] sm:$0xf0] }
 0x43d   :  { %3199 = vmatpush.bf16.msra.mxu2 %v4229_v42 }
 0x43e   :  { %3212 = vmatpush.bf16.msra.mxu3 %v4293_v1  ;;  %v4573_v1 = vor.u32 %v4937_v6, %v4570_v46 }
 0x43f   :  { %3174 = vmatpush.bf16.msra.mxu0 %v4093_v39  ;;  %v4437_v39 = vor.u32 %v4903_v23, %v4434_v63 }
 0x440   :  { %3187 = vmatpush.bf16.msra.mxu1 %v4157_v2  ;;  %v4901_v2 = vld [vmem:[#allocation3 + $0x2a4] sm:$0xf] }
 0x441   :  { %3200 = vmatpush.bf16.msra.mxu2 %v4221_v33  ;;  %v4565_v33 = vor.u32 %v4935_v28, %v4562_v47  ;;  %v4429_v11 = vor.u32 %v4901_v2, %v4426_v54 }
 0x442   :  { %3213 = vmatpush.bf16.msra.mxu3 %v4285_v61  ;;  %3175 = vmatmul.bf16.vlgmr.msra.gmra.mxu0 %v5857_v44  ;;  %v4381_v44 = vor.u32 %v4889_v34, %v4378_v29  ;;  %v4490_v61 = vld [vmem:[#allocation3 + $0x328] sm:$0xf0]  ;;  %v4413_v34 = vor.u32 %v4897_v36, %v4410_v37  ;;  %v4477_v29 = vor.u32 %v4913_v40, %v4474_v50 }
 0x443   :  { %3219 = vmatpush.bf16.msrb.mxu0 %v4405_v3  ;;  %3188 = vmatmul.bf16.vlgmr.msra.gmra.mxu1 %v5867_v62  ;;  %v4933_v3 = vld [vmem:[#allocation3 + $0x3a4] sm:$0xf]  ;;  %v4493_v7 = vor.u32 %v4917_v58, %v4490_v61  ;;  %v2420_v61 = vperm.slane %v5130_v17, 1 }
 0x444   :  { %3232 = vmatpush.bf16.msrb.mxu1 %v4469_v0  ;;  %3201 = vmatmul.bf16.vlgmr.msra.gmra.mxu2 %v5852_v53  ;;  %v4905_v53 = vld [vmem:[#allocation3 + $0x2c4] sm:$0xf]  ;;  %v4554_v0 = vld [vmem:[#allocation3 + $0x3a8] sm:$0xf0] }
 0x445   :  { %3245 = vmatpush.bf16.msrb.mxu2 %v4533_v5  ;;  %3214 = vmatmul.bf16.vlgmr.msra.gmra.mxu3 %v5862_v9  ;;  %v4506_v9 = vld [vmem:[#allocation3 + $0x348] sm:$0xf0]  ;;  %v4445_v42 = vor.u32 %v4905_v53, %v4442_v57  ;;  %v4365_v5 = vor.u32 %v4885_v25, %v4362_v43  ;;  %v4557_v16 = vor.u32 %v4933_v3, %v4554_v0 }
 0x446   :  { %3258 = vmatpush.bf16.msrb.mxu3 %v4597_v10  ;;  %v4509_v62 = vor.u32 %v4921_v48, %v4506_v9  ;;  %v4354_v10 = vld [vmem:[#allocation3 + $0x218] sm:$0xf0] }
 0x447   :  { %3220 = vmatpush.bf16.msrb.mxu0 %v4397_v24  ;;  %v4931_v24 = vld [vmem:[#allocation3 + $0x394] sm:$0xf] }
 0x448   :  { %3233 = vmatpush.bf16.msrb.mxu1 %v4461_v21  ;;  %v4546_v21 = vld [vmem:[#allocation3 + $0x398] sm:$0xf0] }
 0x449   :  { %3246 = vmatpush.bf16.msrb.mxu2 %v4525_v27  ;;  %v4357_v27 = vor.u32 %v4883_v49, %v4354_v10  ;;  %v4549_v51 = vor.u32 %v4931_v24, %v4546_v21 }
 0x44a   :  { %3259 = vmatpush.bf16.msrb.mxu3 %v4589_v26  ;;  %v4346_v26 = vld [vmem:[#allocation3 + $0x208] sm:$0xf0] }
 0x44b   :  { %3221 = vmatpush.bf16.msrb.mxu0 %v4389_v60  ;;  %v4929_v60 = vld [vmem:[#allocation3 + $0x384] sm:$0xf] }
 0x44c   :  { %3234 = vmatpush.bf16.msrb.mxu1 %v4453_v55  ;;  %v4538_v55 = vld [vmem:[#allocation3 + $0x388] sm:$0xf0] }
 0x44d   :  { %3247 = vmatpush.bf16.msrb.mxu2 %v4517_v45  ;;  %v4349_v45 = vor.u32 %v4881_v32, %v4346_v26  ;;  %v4541_v53 = vor.u32 %v4929_v60, %v4538_v55 }
 0x44e   :  { %3260 = vmatpush.bf16.msrb.mxu3 %v4581_v30  ;;  %v2419_v30 = vperm.slane %v5130_v17, 0 }
 0x44f   :  { %3222 = vmatpush.bf16.msrb.mxu0 %v4381_v44 }
 0x450   :  { %3235 = vmatpush.bf16.msrb.mxu1 %v4445_v42 }
 0x451   :  { %3248 = vmatpush.bf16.msrb.mxu2 %v4509_v62 }
 0x452   :  { %3261 = vmatpush.bf16.msrb.mxu3 %v4573_v1 }
 0x453   :  { %3223 = vmatpush.bf16.msrb.mxu0 %v4373_v15 }
 0x454   :  { %3236 = vmatpush.bf16.msrb.mxu1 %v4437_v39 }
 0x455   :  { %3249 = vmatpush.bf16.msrb.mxu2 %v4501_v59 }
 0x456   :  { %3262 = vmatpush.bf16.msrb.mxu3 %v4565_v33 }
 0x457   :  { %3224 = vmatpush.bf16.msrb.mxu0 %v4365_v5 }
 0x458   :  { %3237 = vmatpush.bf16.msrb.mxu1 %v4429_v11 }
 0x459   :  { %3250 = vmatpush.bf16.msrb.mxu2 %v4493_v7 }
 0x45a   :  { %3263 = vmatpush.bf16.msrb.mxu3 %v4557_v16 }
 0x45b   :  { %3225 = vmatpush.bf16.msrb.mxu0 %v4357_v27 }
 0x45c   :  { %3238 = vmatpush.bf16.msrb.mxu1 %v4421_v31 }
 0x45d   :  { %3251 = vmatpush.bf16.msrb.mxu2 %v4485_v22 }
 0x45e   :  { %3264 = vmatpush.bf16.msrb.mxu3 %v4549_v51 }
 0x45f   :  { %3226 = vmatpush.bf16.msrb.mxu0 %v4349_v45 }
 0x460   :  { %3239 = vmatpush.bf16.msrb.mxu1 %v4413_v34 }
 0x461   :  { %3252 = vmatpush.bf16.msrb.mxu2 %v4477_v29 }
 0x462   :  { %3265 = vmatpush.bf16.msrb.mxu3 %v4541_v53  ;;  %3227 = vmatmul.bf16.vlgmr.msrb.gmra.mxu0 %v5881_v52 }
 0x463   :  { %3240 = vmatmul.bf16.vlgmr.msrb.gmra.mxu1 %v5891_v35 }
 0x464   :  { %3253 = vmatmul.bf16.vlgmr.msrb.gmra.mxu2 %v5876_v4 }
 0x465   :  { %3266 = vmatmul.bf16.vlgmr.msrb.gmra.mxu3 %v5886_v12 }
 0x47f   :  { %v3072_v57 = vpop.f32.mrf.mxu0 }
 0x480   :  { %v3073_v48 = vadd.f32 %v3072_v57, %v2419_v30  ;;  %v3085_v9 = vpop.f32.mrf.mxu1 }
 0x482   :  { %v3086_v6 = vadd.f32 %v3085_v9, %v3073_v48 }
 0x487   :  { %v3098_v46 = vpop.f32.mrf.mxu2  ;;  %v3074_v56 = vpop.f32.mrf.mxu0 }
 0x488   :  { %v3099_v44 = vadd.f32 %v3098_v46, %v3086_v6  ;;  %v3111_v42 = vpop.f32.mrf.mxu3  ;;  %v3087_v8 = vpop.f32.mrf.mxu1 }
 0x48a   :  { %v3112_v62 = vadd.f32 %v3111_v42, %v3099_v44 }
 0x48f   :  { %v3100_v23 = vpop.f32.mrf.mxu2 }
 0x490   :  { %v3113_v52 = vpop.f32.mrf.mxu3 }
 0x49f   :  { %v3124_v1 = vpop.f32.mrf.mxu0 }
 0x4a0   :  { %v3125_v35 = vadd.f32 %v3124_v1, %v3112_v62  ;;  %v3137_v63 = vpop.f32.mrf.mxu1 }
 0x4a2   :  { %v3138_v4 = vadd.f32 %v3137_v63, %v3125_v35 }
 0x4a7   :  { %v3150_v41 = vpop.f32.mrf.mxu2  ;;  %v3126_v47 = vpop.f32.mrf.mxu0 }
 0x4a8   :  { %v3151_v12 = vadd.f32 %v3150_v41, %v3138_v4  ;;  %v3163_v20 = vpop.f32.mrf.mxu3  ;;  %v3139_v15 = vpop.f32.mrf.mxu1 }
 0x4aa   :  { %v5906_v28 = vadd.f32 %v3163_v20, %v3151_v12 }
 0x4af   :  { %v3152_v39 = vpop.f32.mrf.mxu2 }
 0x4b0   :  { %v3165_v59 = vpop.f32.mrf.mxu3 }
 0x4bf   :  { %v3176_v25 = vpop.f32.mrf.mxu0 }
 0x4c0   :  { %v3189_v43 = vpop.f32.mrf.mxu1  ;;  %v3177_v5 = vadd.f32 %v3176_v25, %v2420_v61 }
 0x4c2   :  { %v3190_v11 = vadd.f32 %v3189_v43, %v3177_v5 }
 0x4c7   :  { %v3202_v2 = vpop.f32.mrf.mxu2  ;;  %v3178_v54 = vpop.f32.mrf.mxu0 }
 0x4c8   :  { %v3215_v33 = vpop.f32.mrf.mxu3  ;;  %v3191_v58 = vpop.f32.mrf.mxu1  ;;  %v3203_v7 = vadd.f32 %v3202_v2, %v3190_v11 }
 0x4ca   :  { %v3216_v49 = vadd.f32 %v3215_v33, %v3203_v7 }
 0x4cf   :  { %v3204_v3 = vpop.f32.mrf.mxu2 }
 0x4d0   :  { %v3217_v0 = vpop.f32.mrf.mxu3 }
 0x4df   :  { %v3228_v10 = vpop.f32.mrf.mxu0 }
 0x4e0   :  { %v3241_v13 = vpop.f32.mrf.mxu1  ;;  %v3229_v16 = vadd.f32 %v3228_v10, %v3216_v49 }
 0x4e2   :  { %v3242_v14 = vadd.f32 %v3241_v13, %v3229_v16 }
 0x4e7   :  { %v3254_v19 = vpop.f32.mrf.mxu2  ;;  %v3230_v21 = vpop.f32.mrf.mxu0 }
 0x4e8   :  { %v3255_v38 = vadd.f32 %v3254_v19, %v3242_v14  ;;  %v3267_v24 = vpop.f32.mrf.mxu3  ;;  %v3243_v27 = vpop.f32.mrf.mxu1 }
 0x4ea   :  { %v3268_v31 = vadd.f32 %v3267_v24, %v3255_v38 }
 0x4ef   :  { %v3256_v22 = vpop.f32.mrf.mxu2 }
 0x4f0   :  { %v3269_v32 = vpop.f32.mrf.mxu3 }
 0x4f1   :  { %5018 = dma.done.wait [#allocation6 + $0x2], 2048 }
 0x4f2   :  { %5019 = vsyncadd [#allocation6 + $0x2], 4294965248  ;;  %v4952_v17 = vld [vmem:[#allocation4 + $0x48] sm:$0xff]  ;;  %v4959_v51 = vld [vmem:[#allocation4 + $0x78] sm:$0xff]  ;;  %v3274_v9 = vpack.c.bf16 %v5906_v28, %v5906_v28  ;;  %v3275_v6 = vpack.c.bf16 %v3268_v31, %v3268_v31  ;;  %v3309_v46 = vperm.slane %v5135_v18, 0 }
 0x4f3   :  { %v4960_v26 = vld [vmem:[#allocation4 + $0x28] sm:$0xff]  ;;  %3407 = vmatpush.bf16.msra.mxu0 %v4952_v17  ;;  %v4958_v40 = vld [vmem:[#allocation4 + $0x70] sm:$0xff]  ;;  %v4957_v60 = vld [vmem:[#allocation4 + $0x60] sm:$0xff] }
 0x4f4   :  { %3420 = vmatpush.bf16.msra.mxu1 %v4960_v26  ;;  %v4951_v36 = vld [vmem:[#allocation4 + $0x8] sm:$0xff]  ;;  %v4949_v50 = vld [vmem:[#allocation4 + $0x50] sm:$0xff]  ;;  %v4948_v55 = vld [vmem:[#allocation4 + $0x18] sm:$0xff] }
 0x4f5   :  { %v4950_v37 = vld [vmem:[#allocation4 + $0x68] sm:$0xff]  ;;  %v4956_v45 = vld [vmem:[#allocation4 + $0x38] sm:$0xff]  ;;  %v4955_v29 = vld [vmem:[#allocation4 + $0x10] sm:$0xff] }
 0x4f6   :  { %v4947_v34 = vld [vmem:[#allocation4 + $0x58] sm:$0xff]  ;;  %v4946_v53 = vld [vmem:[#allocation4] sm:$0xff]  ;;  %v4945_v57 = vld [vmem:[#allocation4 + $0x30] sm:$0xff] }
 0x4f7   :  { %3408 = vmatpush.bf16.msra.mxu0 %v4951_v36  ;;  %v4954_v30 = vld [vmem:[#allocation4 + $0x20] sm:$0xff] }
 0x4f8   :  { %3421 = vmatpush.bf16.msra.mxu1 %v4959_v51  ;;  %v4953_v48 = vld [vmem:[#allocation4 + $0x40] sm:$0xff] }
 0x4fb   :  { %3409 = vmatpush.bf16.msra.mxu0 %v4950_v37 }
 0x4fc   :  { %3422 = vmatpush.bf16.msra.mxu1 %v4958_v40 }
 0x4ff   :  { %3410 = vmatpush.bf16.msra.mxu0 %v4949_v50 }
 0x500   :  { %3423 = vmatpush.bf16.msra.mxu1 %v4957_v60 }
 0x503   :  { %3411 = vmatpush.bf16.msra.mxu0 %v4948_v55 }
 0x504   :  { %3424 = vmatpush.bf16.msra.mxu1 %v4956_v45 }
 0x507   :  { %3412 = vmatpush.bf16.msra.mxu0 %v4947_v34 }
 0x508   :  { %3425 = vmatpush.bf16.msra.mxu1 %v4955_v29 }
 0x50b   :  { %3413 = vmatpush.bf16.msra.mxu0 %v4946_v53 }
 0x50c   :  { %3426 = vmatpush.bf16.msra.mxu1 %v4954_v30 }
 0x50f   :  { %3414 = vmatpush.bf16.msra.mxu0 %v4945_v57 }
 0x510   :  { %3427 = vmatpush.bf16.msra.mxu1 %v4953_v48 }
 0x512   :  { %3415 = vmatmul.bf16.vlgmr.msra.gmra.mxu0 %v3274_v9 }
 0x513   :  { %3428 = vmatmul.bf16.vlgmr.msra.gmra.mxu1 %v3275_v6 }
 0x58f   :  { %v3416_v44 = vpop.f32.mrf.mxu0 }
 0x590   :  { %v3429_v42 = vpop.f32.mrf.mxu1  ;;  %v3417_v62 = vadd.f32 %v3416_v44, %v3309_v46 }
 0x592   :  { %v3430_v56 = vadd.f32 %v3429_v42, %v3417_v62 }
 0x594   :  { %3433 = vst [vmem:[%s5921_s8] sm:$0xff] %v3430_v56 }
 0x597   :  { %v3418_v8 = vpop.f32.mrf.mxu0 }
 0x598   :  { %v3431_v23 = vpop.f32.mrf.mxu1 }
 0x599   :  { %3438 = vsyncmov [#allocation6] }
 0x59c   :  { %s3439_s19 = vpop.sfrf %3438 }
 0x59d   :  { %p4662_p0 = scmp.ne.s32.totalorder %s3439_s19, 0 }
 0x59f   :  { %3443 = shalt.err (%p4662_p0)  }
 0x5a0   :  { %3445 = vsyncmov [#allocation6 + $0x1] }
 0x5a3   :  { %s3446_s20 = vpop.sfrf %3445 }
 0x5a4   :  { %p4663_p1 = scmp.ne.s32.totalorder %s3446_s20, 0 }
 0x5a6   :  { %3450 = shalt.err (%p4663_p1)  }
 0x5a7   :  { %3452 = vsyncmov [#allocation6 + $0x2] }
 0x5aa   :  { %s3453_s21 = vpop.sfrf %3452 }
 0x5ab   :  { %p4664_p2 = scmp.ne.s32.totalorder %s3453_s21, 0 }
 0x5ad   :  { %3457 = shalt.err (%p4664_p2)  }

</bundles_post_ra>
